<compile_context>
chip_gen: v7x
topology: tpu7x:2x2x1
jax: 0.10.0
libtpu: 0.0.40
codegen_flags: <defaults>
</compile_context>

<pallas_src>
import functools

import jax
import jax.numpy as jnp
from jax.experimental import pallas as pl
from jax.experimental.pallas import tpu as pltpu

IN_SIZE = 38
H1 = 256
H2 = 256
OUT_SIZE = 1
LN_EPS = 1e-5
LEAKY_SLOPE = 0.01  # nn.LeakyReLU default


def _ln_leaky(h, gamma, beta, act_dtype):
    # h: (TB, H) f32. Single-pass LN stats: var = E[h^2] - mean^2 (clamped >= 0
    # so padded all-constant tail rows / cancellation never feed rsqrt a
    # negative). Stats stay in f32; the scale/shift + LeakyReLU run in
    # act_dtype (bf16 on v6e/v7x, f32 on v5e) since h is re-cast to bf16 for
    # the next matmul anyway.
    mean = jnp.mean(h, axis=-1, keepdims=True)
    mean_sq = jnp.mean(h * h, axis=-1, keepdims=True)
    var = jnp.maximum(mean_sq - mean * mean, 0.0)
    inv = jax.lax.rsqrt(var + LN_EPS)
    xhat = ((h - mean) * inv).astype(act_dtype)
    z = xhat * gamma.astype(act_dtype) + beta.astype(act_dtype)
    return jnp.where(z >= 0, z, LEAKY_SLOPE * z)


def mlp_kernel(x_ref, w1_ref, w2_ref, w3_ref, b3_ref, vecs_ref, o_ref, *, act_dtype):
    x = x_ref[...]                                   # (TB, 38) f32
    v = vecs_ref[...]                                # (6, 256) f32: b1,g1,be1,b2,g2,be2
    b1, g1, be1 = v[0:1], v[1:2], v[2:3]
    b2, g2, be2 = v[3:4], v[4:5], v[5:6]

    # Layer 1: Linear(38 -> 256) + LayerNorm + LeakyReLU.
    # Weights arrive pre-cast to bf16; f32 accumulation on the MXU.
    h = jnp.dot(x.astype(jnp.bfloat16), w1_ref[...],
                preferred_element_type=jnp.float32) + b1
    h = _ln_leaky(h, g1, be1, act_dtype)
    # TODO(synk): Dropout(0.3) is identity in eval mode; training-mode RNG masking not implemented.

    # Layer 2: Linear(256 -> 256) + LayerNorm + LeakyReLU.
    h = jnp.dot(h.astype(jnp.bfloat16), w2_ref[...],
                preferred_element_type=jnp.float32) + b2
    h = _ln_leaky(h, g2, be2, act_dtype)

    # Output head: Linear(256 -> 1) + Sigmoid.
    # Compute the (TB, 1) column on the MXU and relayout ONLY that tiny result
    # to the lane-dense (1, TB) output row (no full-h transpose).
    y_col = jnp.dot(h.astype(jnp.bfloat16), w3_ref[...],
                    preferred_element_type=jnp.float32)       # (TB, 1) f32
    y = y_col.T + b3_ref[...]                                 # (1, TB) f32
    o_ref[...] = jax.nn.sigmoid(y).astype(o_ref.dtype)


def _default_config():
    # v6e / v7x: bf16 VALU available -> bf16 epilogue storage, 512-row tiles.
    # v5e / older: keep f32 epilogue, 256-row tiles (single vector-store slot,
    # smaller live intermediate).
    try:
        kind = jax.devices()[0].device_kind.lower()
    except Exception:  # pragma: no cover - be robust off-TPU
        kind = ""
    if "v6" in kind or "v7" in kind:
        return 512, jnp.bfloat16
    return 256, jnp.float32


def mlp_forward(x, params, *, tile_b=None, act_dtype=None):
    B, F = x.shape
    assert F == IN_SIZE

    d_tile, d_act = _default_config()
    if tile_b is None:
        tile_b = d_tile
    if act_dtype is None:
        act_dtype = d_act
    assert tile_b % 128 == 0  # multiple of 128 keeps MXU full + lane-dense output store

    (w1, b1, g1, be1, w2, b2, g2, be2, w3, b3) = params
    # Pack the six (1, 256) per-feature f32 vectors into a single (6, 256) input.
    vecs = jnp.concatenate([b1, g1, be1, b2, g2, be2], axis=0)
    # Pre-cast weights to bf16 once in the wrapper (resident blocks in-kernel).
    w1_bf = w1.astype(jnp.bfloat16)       # (38, 256)
    w2_bf = w2.astype(jnp.bfloat16)       # (256, 256)
    w3_bf = w3.astype(jnp.bfloat16)       # (256, 1) column
    b3r = b3.reshape(1, 1).astype(jnp.float32)

    num_tiles = pl.cdiv(B, tile_b)
    b_pad = num_tiles * tile_b
    if b_pad != B:                        # pad the last tile instead of asserting divisibility
        x = jnp.pad(x, ((0, b_pad - B), (0, 0)))

    kernel = functools.partial(mlp_kernel, act_dtype=act_dtype)

    out_row = pl.pallas_call(
        kernel,
        out_shape=jax.ShapeDtypeStruct((1, b_pad), jnp.float32),
        grid_spec=pltpu.PrefetchScalarGridSpec(
            num_scalar_prefetch=0,
            grid=(num_tiles,),
            in_specs=[
                pl.BlockSpec((tile_b, IN_SIZE), lambda i: (i, 0)),    # x tile
                pl.BlockSpec((IN_SIZE, H1), lambda i: (0, 0)),        # w1 bf16 (resident)
                pl.BlockSpec((H1, H2), lambda i: (0, 0)),             # w2 bf16 (resident)
                pl.BlockSpec((H2, OUT_SIZE), lambda i: (0, 0)),       # w3 bf16 column
                pl.BlockSpec((1, 1), lambda i: (0, 0)),               # b3
                pl.BlockSpec((6, H1), lambda i: (0, 0)),              # packed b/γ/β vectors
            ],
            out_specs=pl.BlockSpec((1, tile_b), lambda i: (0, i)),    # lane-dense output row
        ),
        compiler_params=pltpu.CompilerParams(
            dimension_semantics=("parallel",)),
    )(x, w1_bf, w2_bf, w3_bf, b3r, vecs)

    return out_row.reshape(b_pad, OUT_SIZE)[:B]


def init_params(key):
    ks = jax.random.split(key, 6)
    # Deterministic synthetic init (shapes match the PyTorch module).
    w1 = jax.random.normal(ks[0], (IN_SIZE, H1), jnp.float32) * 0.05
    b1 = jax.random.normal(ks[1], (1, H1), jnp.float32) * 0.05
    g1 = jnp.ones((1, H1), jnp.float32)       # LayerNorm weight
    be1 = jnp.zeros((1, H1), jnp.float32)     # LayerNorm bias
    w2 = jax.random.normal(ks[2], (H1, H2), jnp.float32) * 0.05
    b2 = jax.random.normal(ks[3], (1, H2), jnp.float32) * 0.05
    g2 = jnp.ones((1, H2), jnp.float32)
    be2 = jnp.zeros((1, H2), jnp.float32)
    w3 = jax.random.normal(ks[4], (H2, OUT_SIZE), jnp.float32) * 0.05
    b3 = jax.random.normal(ks[5], (1, OUT_SIZE), jnp.float32) * 0.05
    return (w1, b1, g1, be1, w2, b2, g2, be2, w3, b3)


def mlp_reference(x, params):
    (w1, b1, g1, be1, w2, b2, g2, be2, w3, b3) = params

    def ln(h, g, b):
        m = jnp.mean(h, axis=-1, keepdims=True)
        v = jnp.mean((h - m) ** 2, axis=-1, keepdims=True)
        return (h - m) / jnp.sqrt(v + LN_EPS) * g + b

    h = x @ w1 + b1
    h = ln(h, g1, be1)
    h = jnp.where(h >= 0, h, LEAKY_SLOPE * h)
    h = h @ w2 + b2
    h = ln(h, g2, be2)
    h = jnp.where(h >= 0, h, LEAKY_SLOPE * h)
    y = h @ w3 + b3
    return jax.nn.sigmoid(y)


if __name__ == "__main__":
    key = jax.random.PRNGKey(0)
    kx, kp = jax.random.split(key)
    B = 1000  # not a multiple of tile_b -> exercises padding; >=2 grid steps on every chip
    x = jax.random.normal(kx, (B, IN_SIZE), jnp.float32)
    params = init_params(kp)

    out = jax.block_until_ready(mlp_forward(x, params))
    ref = mlp_reference(x, params)

    assert out.shape == (B, OUT_SIZE)
    # bf16 MXU operands + (on v6e/v7x) bf16 epilogue storage, f32 accumulation/stats
    # -> tolerance loosened vs. the pure-f32 reference.
    max_diff = float(jnp.max(jnp.abs(out - ref)))
    assert jnp.allclose(out, ref, atol=2e-2, rtol=2e-2), f"max abs diff {max_diff}"
    print("KERNEL_OK")
</pallas_src>

<mosaic_0001>
module attributes {stable_mosaic.version = 11 : i64} {
  func.func @mlp_kernel(%arg0: i32, %arg1: memref<256x38xf32, #tpu.memory_space<vmem>>, %arg2: memref<38x256xbf16, #tpu.memory_space<vmem>>, %arg3: memref<256x256xbf16, #tpu.memory_space<vmem>>, %arg4: memref<256x1xbf16, #tpu.memory_space<vmem>>, %arg5: memref<1x1xf32, #tpu.memory_space<vmem>>, %arg6: memref<6x256xf32, #tpu.memory_space<vmem>>, %arg7: memref<1x256xf32, #tpu.memory_space<vmem>>) attributes {dimension_semantics = [#tpu.dimension_semantics<parallel>], iteration_bounds = array<i64: 4>, scalar_prefetch = 0 : i64, scratch_operands = 0 : i64, tpu.core_type = #tpu.core_type<tc>, window_params = [{transform_indices = @transform_0, window_bounds = array<i64: 256, 38>}, {pipeline_mode = #tpu.pipeline_mode<synchronous>, transform_indices = @transform_1, window_bounds = array<i64: 38, 256>}, {pipeline_mode = #tpu.pipeline_mode<synchronous>, transform_indices = @transform_2, window_bounds = array<i64: 256, 256>}, {pipeline_mode = #tpu.pipeline_mode<synchronous>, transform_indices = @transform_3, window_bounds = array<i64: 256, 1>}, {pipeline_mode = #tpu.pipeline_mode<synchronous>, transform_indices = @transform_4, window_bounds = array<i64: 1, 1>}, {pipeline_mode = #tpu.pipeline_mode<synchronous>, transform_indices = @transform_5, window_bounds = array<i64: 6, 256>}, {transform_indices = @transform_6, window_bounds = array<i64: 1, 256>}]} {
    %c0 = arith.constant 0 : index
    %c0_0 = arith.constant 0 : index
    %0 = vector.load %arg1[%c0, %c0_0] : memref<256x38xf32, #tpu.memory_space<vmem>>, vector<256x38xf32>
    %c0_1 = arith.constant 0 : index
    %c0_2 = arith.constant 0 : index
    %1 = vector.load %arg6[%c0_1, %c0_2] : memref<6x256xf32, #tpu.memory_space<vmem>>, vector<6x256xf32>
    %2 = vector.extract_strided_slice %1 {offsets = [0, 0], sizes = [1, 256], strides = [1, 1]} : vector<6x256xf32> to vector<1x256xf32>
    %3 = vector.extract_strided_slice %1 {offsets = [1, 0], sizes = [1, 256], strides = [1, 1]} : vector<6x256xf32> to vector<1x256xf32>
    %4 = vector.extract_strided_slice %1 {offsets = [2, 0], sizes = [1, 256], strides = [1, 1]} : vector<6x256xf32> to vector<1x256xf32>
    %5 = vector.extract_strided_slice %1 {offsets = [3, 0], sizes = [1, 256], strides = [1, 1]} : vector<6x256xf32> to vector<1x256xf32>
    %6 = vector.extract_strided_slice %1 {offsets = [4, 0], sizes = [1, 256], strides = [1, 1]} : vector<6x256xf32> to vector<1x256xf32>
    %7 = vector.extract_strided_slice %1 {offsets = [5, 0], sizes = [1, 256], strides = [1, 1]} : vector<6x256xf32> to vector<1x256xf32>
    %8 = arith.truncf %0 : vector<256x38xf32> to vector<256x38xbf16>
    %c0_3 = arith.constant 0 : index
    %c0_4 = arith.constant 0 : index
    %9 = vector.load %arg2[%c0_3, %c0_4] : memref<38x256xbf16, #tpu.memory_space<vmem>>, vector<38x256xbf16>
    %cst = arith.constant dense<0.000000e+00> : vector<256x256xf32>
    %10 = tpu.matmul %8, %9, %cst {dimension_numbers = #tpu.dot_dimension_numbers<[1], [0], [0], [1], [0, 0, 1, 1], [], []>} : vector<256x38xbf16>, vector<38x256xbf16>, vector<256x256xf32> -> vector<256x256xf32>
    %11 = vector.broadcast %2 : vector<1x256xf32> to vector<256x256xf32>
    %12 = arith.addf %10, %11 : vector<256x256xf32>
    %cst_5 = arith.constant dense<0.000000e+00> : vector<256xf32>
    %13 = vector.multi_reduction <add>, %12, %cst_5 [1] : vector<256x256xf32> to vector<256xf32>
    %14 = vector.shape_cast %13 : vector<256xf32> to vector<256x1xf32>
    %cst_6 = arith.constant 2.560000e+02 : f32
    %15 = vector.broadcast %cst_6 : f32 to vector<256x1xf32>
    %16 = arith.divf %14, %15 : vector<256x1xf32>
    %17 = arith.mulf %12, %12 : vector<256x256xf32>
    %cst_7 = arith.constant dense<0.000000e+00> : vector<256xf32>
    %18 = vector.multi_reduction <add>, %17, %cst_7 [1] : vector<256x256xf32> to vector<256xf32>
    %19 = vector.shape_cast %18 : vector<256xf32> to vector<256x1xf32>
    %cst_8 = arith.constant 2.560000e+02 : f32
    %20 = vector.broadcast %cst_8 : f32 to vector<256x1xf32>
    %21 = arith.divf %19, %20 : vector<256x1xf32>
    %22 = arith.mulf %16, %16 : vector<256x1xf32>
    %23 = arith.subf %21, %22 : vector<256x1xf32>
    %cst_9 = arith.constant 0.000000e+00 : f32
    %24 = vector.broadcast %cst_9 : f32 to vector<256x1xf32>
    %25 = arith.maximumf %23, %24 : vector<256x1xf32>
    %cst_10 = arith.constant 9.99999974E-6 : f32
    %26 = vector.broadcast %cst_10 : f32 to vector<256x1xf32>
    %27 = arith.addf %25, %26 : vector<256x1xf32>
    %28 = math.rsqrt %27 : vector<256x1xf32>
    %29 = vector.broadcast %16 : vector<256x1xf32> to vector<256x256xf32>
    %30 = arith.subf %12, %29 : vector<256x256xf32>
    %31 = vector.broadcast %28 : vector<256x1xf32> to vector<256x256xf32>
    %32 = arith.mulf %30, %31 : vector<256x256xf32>
    %33 = vector.broadcast %3 : vector<1x256xf32> to vector<256x256xf32>
    %34 = arith.mulf %32, %33 : vector<256x256xf32>
    %35 = vector.broadcast %4 : vector<1x256xf32> to vector<256x256xf32>
    %36 = arith.addf %34, %35 : vector<256x256xf32>
    %cst_11 = arith.constant 0.000000e+00 : f32
    %37 = vector.broadcast %cst_11 : f32 to vector<256x256xf32>
    %38 = arith.cmpf oge, %36, %37 : vector<256x256xf32>
    %cst_12 = arith.constant 0.00999999977 : f32
    %39 = vector.broadcast %cst_12 : f32 to vector<256x256xf32>
    %40 = arith.mulf %39, %36 : vector<256x256xf32>
    %41 = arith.select %38, %36, %40 : vector<256x256xi1>, vector<256x256xf32>
    %42 = arith.truncf %41 : vector<256x256xf32> to vector<256x256xbf16>
    %c0_13 = arith.constant 0 : index
    %c0_14 = arith.constant 0 : index
    %43 = vector.load %arg3[%c0_13, %c0_14] : memref<256x256xbf16, #tpu.memory_space<vmem>>, vector<256x256xbf16>
    %cst_15 = arith.constant dense<0.000000e+00> : vector<256x256xf32>
    %44 = tpu.matmul %42, %43, %cst_15 {dimension_numbers = #tpu.dot_dimension_numbers<[1], [0], [0], [1], [0, 0, 1, 1], [], []>} : vector<256x256xbf16>, vector<256x256xbf16>, vector<256x256xf32> -> vector<256x256xf32>
    %45 = vector.broadcast %5 : vector<1x256xf32> to vector<256x256xf32>
    %46 = arith.addf %44, %45 : vector<256x256xf32>
    %cst_16 = arith.constant dense<0.000000e+00> : vector<256xf32>
    %47 = vector.multi_reduction <add>, %46, %cst_16 [1] : vector<256x256xf32> to vector<256xf32>
    %48 = vector.shape_cast %47 : vector<256xf32> to vector<256x1xf32>
    %cst_17 = arith.constant 2.560000e+02 : f32
    %49 = vector.broadcast %cst_17 : f32 to vector<256x1xf32>
    %50 = arith.divf %48, %49 : vector<256x1xf32>
    %51 = arith.mulf %46, %46 : vector<256x256xf32>
    %cst_18 = arith.constant dense<0.000000e+00> : vector<256xf32>
    %52 = vector.multi_reduction <add>, %51, %cst_18 [1] : vector<256x256xf32> to vector<256xf32>
    %53 = vector.shape_cast %52 : vector<256xf32> to vector<256x1xf32>
    %cst_19 = arith.constant 2.560000e+02 : f32
    %54 = vector.broadcast %cst_19 : f32 to vector<256x1xf32>
    %55 = arith.divf %53, %54 : vector<256x1xf32>
    %56 = arith.mulf %50, %50 : vector<256x1xf32>
    %57 = arith.subf %55, %56 : vector<256x1xf32>
    %cst_20 = arith.constant 0.000000e+00 : f32
    %58 = vector.broadcast %cst_20 : f32 to vector<256x1xf32>
    %59 = arith.maximumf %57, %58 : vector<256x1xf32>
    %cst_21 = arith.constant 9.99999974E-6 : f32
    %60 = vector.broadcast %cst_21 : f32 to vector<256x1xf32>
    %61 = arith.addf %59, %60 : vector<256x1xf32>
    %62 = math.rsqrt %61 : vector<256x1xf32>
    %63 = vector.broadcast %50 : vector<256x1xf32> to vector<256x256xf32>
    %64 = arith.subf %46, %63 : vector<256x256xf32>
    %65 = vector.broadcast %62 : vector<256x1xf32> to vector<256x256xf32>
    %66 = arith.mulf %64, %65 : vector<256x256xf32>
    %67 = vector.broadcast %6 : vector<1x256xf32> to vector<256x256xf32>
    %68 = arith.mulf %66, %67 : vector<256x256xf32>
    %69 = vector.broadcast %7 : vector<1x256xf32> to vector<256x256xf32>
    %70 = arith.addf %68, %69 : vector<256x256xf32>
    %cst_22 = arith.constant 0.000000e+00 : f32
    %71 = vector.broadcast %cst_22 : f32 to vector<256x256xf32>
    %72 = arith.cmpf oge, %70, %71 : vector<256x256xf32>
    %cst_23 = arith.constant 0.00999999977 : f32
    %73 = vector.broadcast %cst_23 : f32 to vector<256x256xf32>
    %74 = arith.mulf %73, %70 : vector<256x256xf32>
    %75 = arith.select %72, %70, %74 : vector<256x256xi1>, vector<256x256xf32>
    %76 = arith.truncf %75 : vector<256x256xf32> to vector<256x256xbf16>
    %c0_24 = arith.constant 0 : index
    %c0_25 = arith.constant 0 : index
    %77 = vector.load %arg4[%c0_24, %c0_25] : memref<256x1xbf16, #tpu.memory_space<vmem>>, vector<256x1xbf16>
    %cst_26 = arith.constant dense<0.000000e+00> : vector<256x1xf32>
    %78 = tpu.matmul %76, %77, %cst_26 {dimension_numbers = #tpu.dot_dimension_numbers<[1], [0], [0], [1], [0, 0, 1, 1], [], []>} : vector<256x256xbf16>, vector<256x1xbf16>, vector<256x1xf32> -> vector<256x1xf32>
    %79 = tpu.transpose %78, [1, 0] : vector<256x1xf32> -> vector<1x256xf32>
    %c0_27 = arith.constant 0 : index
    %c0_28 = arith.constant 0 : index
    %80 = vector.load %arg5[%c0_27, %c0_28] : memref<1x1xf32, #tpu.memory_space<vmem>>, vector<1x1xf32>
    %81 = vector.broadcast %80 : vector<1x1xf32> to vector<1x256xf32>
    %82 = arith.addf %79, %81 : vector<1x256xf32>
    %83 = arith.negf %82 : vector<1x256xf32>
    %84 = math.exp %83 : vector<1x256xf32>
    %cst_29 = arith.constant 1.000000e+00 : f32
    %85 = vector.broadcast %cst_29 : f32 to vector<1x256xf32>
    %86 = arith.addf %85, %84 : vector<1x256xf32>
    %87 = arith.divf %85, %86 : vector<1x256xf32>
    %c0_30 = arith.constant 0 : index
    %c0_31 = arith.constant 0 : index
    %88 = vector.load %arg7[%c0_30, %c0_31] : memref<1x256xf32, #tpu.memory_space<vmem>>, vector<1x256xf32>
    tpu.vector_store %arg7[%c0_30, %c0_31], %87 {strides = array<i32>} : memref<1x256xf32, #tpu.memory_space<vmem>>, vector<1x256xf32>,
    return
  }
  func.func @transform_0(%arg0: i32) -> (i32, i32) {
    %c0_i32 = arith.constant 0 : i32
    %c0_i32_0 = arith.constant 0 : i32
    return %arg0, %c0_i32 : i32, i32
  }
  func.func @transform_1(%arg0: i32) -> (i32, i32) {
    %c0_i32 = arith.constant 0 : i32
    %c0_i32_0 = arith.constant 0 : i32
    %c0_i32_1 = arith.constant 0 : i32
    return %c0_i32, %c0_i32_0 : i32, i32
  }
  func.func @transform_2(%arg0: i32) -> (i32, i32) {
    %c0_i32 = arith.constant 0 : i32
    %c0_i32_0 = arith.constant 0 : i32
    %c0_i32_1 = arith.constant 0 : i32
    return %c0_i32, %c0_i32_0 : i32, i32
  }
  func.func @transform_3(%arg0: i32) -> (i32, i32) {
    %c0_i32 = arith.constant 0 : i32
    %c0_i32_0 = arith.constant 0 : i32
    %c0_i32_1 = arith.constant 0 : i32
    return %c0_i32, %c0_i32_0 : i32, i32
  }
  func.func @transform_4(%arg0: i32) -> (i32, i32) {
    %c0_i32 = arith.constant 0 : i32
    %c0_i32_0 = arith.constant 0 : i32
    %c0_i32_1 = arith.constant 0 : i32
    return %c0_i32, %c0_i32_0 : i32, i32
  }
  func.func @transform_5(%arg0: i32) -> (i32, i32) {
    %c0_i32 = arith.constant 0 : i32
    %c0_i32_0 = arith.constant 0 : i32
    %c0_i32_1 = arith.constant 0 : i32
    return %c0_i32, %c0_i32_0 : i32, i32
  }
  func.func @transform_6(%arg0: i32) -> (i32, i32) {
    %c0_i32 = arith.constant 0 : i32
    %c0_i32_0 = arith.constant 0 : i32
    return %c0_i32, %arg0 : i32, i32
  }
}

</mosaic_0001>

<bundles_post_ra>
// kernel: tpu_custom_call.1
= control target key start
LH: loop header
LB: loop body
LE: loop exit
PB: predicated region body
PF: predicated region fallthrough
CT: control target
= control target key end

     0   :  { %s6358_s0 = inlined_call_operand.vmem [shape: f32[1024,38], index: 0, kind: input, shape index: {}]   ;;  %s6359_s1 = inlined_call_operand.vmem [shape: bf16[38,256], index: 1, kind: input, shape index: {}]   ;;  %s6360_s2 = inlined_call_operand.vmem [shape: bf16[256,256], index: 2, kind: input, shape index: {}]   ;;  %s6361_s3 = inlined_call_operand.vmem [shape: bf16[256,1], index: 3, kind: input, shape index: {}]   ;;  %s6362_s4 = inlined_call_operand.<no memory space> [shape: f32[1,1], index: 4, kind: input, shape index: {}]   ;;  %s6363_s5 = inlined_call_operand.vmem [shape: f32[6,256], index: 5, kind: input, shape index: {}]   ;;  %s6364_s6 = inlined_call_operand.hbm [shape: f32[1,1024], index: 6, kind: output, shape index: {}]  }
   0x1   :  { %v11_v0 = vstv %s6362_s4 }
   0x2   :  { %12 = vst [vmem:[#allocation2] sm:$0x1] %v11_v0 }
   0x3   :  { %13 = vsyncpa [#allocation4], 0 }
   0x4   :  { %15 = vsyncpa [#allocation4 + $0x1], 0  ;;  %s3975_s23 = smov 0   ;;  %s3977_s24 = smov 0  }
   0x5   :  { %s3979_s25 = smov 0   ;;  %s3981_s26 = smov 0  }
   0x6 LB: > { %s3412_s4 = sadd.s32 4294967295, %s3932_s26   ;;  %s3413_s27 = sadd.s32 4294967294, %s3932_s26   ;;  %s3932_s26 = sphi %s3981_s26, %s6722_s26   ;;  %s3928_s25 = sphi %s3979_s25, %s6721_s25   ;;  %s3924_s24 = sphi %s3977_s24, %s6720_s24   ;;  %s3920_s23 = sphi %s3975_s23, %s6719_s23  }
   0x7   : > { %s3998_s28 = sadd.s32 1, %s3932_s26   ;;  %s159_s29 = sadd.s32 1, %s3928_s25 }
   0x8   : > { %s156_s30 = ssub.s32 %s3932_s26, %s3998_s28  ;;  %p169_p0 = scmp.ne.s32.totalorder %s3928_s25, %s3924_s24 }
   0x9   : > { %p157_p1 = scmp.eq.s32.totalorder %s156_s30, 0  ;;  %p170_p2 = scmp.eq.s32.totalorder %s3412_s4, 3 }
   0xa   : > { %p175_p3 = scmp.ne.s32.totalorder %s3924_s24, %s3920_s23  ;;  %p176_p4 = scmp.eq.s32.totalorder %s3413_s27, 3 }
   0xb   : > { %s4008_s7 = scalar_select %p157_p1, %s3928_s25, %s159_s29  }
   0xc   : > { %p4010_p5 = por %p170_p2, %p169_p0  ;;  %p4014_p6 = por %p176_p4, %p175_p3 }
   0xd   : > { %p3416_p7 = scmp.ge.s32.totalorder %s3932_s26, 1  ;;  %p218_p8 = scmp.lt.s32.totalorder %s3932_s26, 5 }
   0xf   : > { %p219_p9 = pnand %p3416_p7, %p218_p8 }
  0x11   : > { %222 = sbr.rel (%p219_p9) target bundleno = 1346 (0x542), region = 44 }
  0x18   : > { %v3660_v1 = vld [vmem:[%s6359_s1 + $0x4] ss:$8 sps:$4 sm:$0xff]   ;;  %v3662_v2 = vld [vmem:[%s6359_s1] ss:$8 sps:$4 sm:$0xff]   ;;  %v6366_v3 = vmov 0   ;;  %s4027_s14 = sshll.u32 %s3412_s4, 5  ;;  %v6365_v58 = vlaneseq }
  0x19   : > { %432 = vmatprep.mubr.bf16.mxu0 %v6366_v3  ;;  %512 = vmatprep.mubr.bf16.mxu1 %v6366_v3  ;;  %v3663_v4 = vld [vmem:[%s6359_s1 + $0x14] ss:$8 sps:$4 sm:$0xff]   ;;  %v310_v5 = vld [vmem:[%s6359_s1 + $0x20] sm:$0x77]  ;;  %v3665_v6 = vld [vmem:[%s6359_s1 + $0x10] ss:$8 sps:$4 sm:$0xff]   ;;  %s6316_s27 = scalar_lea.hbm %s6364_s6, %s4027_s14 }
  0x1a   : > { %400 = vmatprep.subr.bf16.mxu0 %v3660_v1  ;;  %3611 = vmatprep.subr.bf16.mxu1 %v3660_v1  ;;  %p249_p10 = scmp.lt.s32.totalorder %s4027_s14, 127  ;;  %v3425_v7 = vcombine.high %v310_v5, %v310_v5  ;;  %v3424_v8 = vcombine.low %v310_v5, %v310_v5  ;;  %vm393_vm0 = vcmask 1042432   ;;  %vm344_vm1 = vcmask 310272   ;;  %v3668_v60 = vld [vmem:[%s6360_s2] ss:$8 sps:$4 sm:$0xff]   ;;  %s245_s18 = sand.u32 1, %s3924_s24  }
  0x1b   : > { %401 = vmatpush1.bf16.msra.mxu0 %v3662_v2  ;;  %3614 = vmatpush1.bf16.msra.mxu1 %v3662_v2  ;;  %v4110_v59 = vshrl.u32 %v6365_v58, 7  ;;  %v3670_v61 = vld [vmem:[%s6360_s2 + $0x4] ss:$8 sps:$4 sm:$0xff]   ;;  %v3671_v0 = vld [vmem:[%s6360_s2 + $0x10] ss:$8 sps:$4 sm:$0xff]   ;;  %s3417_s19 = sshll.u32 %s245_s18, 1 }
  0x1c   : > { %402 = vmatprep.subr.bf16.mxu0 %v3663_v4  ;;  %3612 = vmatprep.subr.bf16.mxu1 %v3663_v4  ;;  %s250_s21 = scalar_select %p249_p10, %s4027_s14, 127  ;;  %v395_v9 = vsel %vm393_vm0, %v3424_v8, 0  ;;  %v4124_v63 = vld [vmem:[%s6363_s5] sm:$0x3f]  ;;  %v3673_v1 = vld [vmem:[%s6360_s2 + $0x14] ss:$8 sps:$4 sm:$0xff]  }
  0x1d   : > { %3658 = vset.pattern.permute.xlu1 %v6366_v3  ;;  %6510 = vst [vmem:[#allocation6_spill] sm:$0xff] %v4110_v59  ;;  %v4119_v62 = vsub.s32 0, %v4110_v59  ;;  %v4135_v2 = vld [vmem:[%s6363_s5 + $0x8] sm:$0x3f]  ;;  %s247_s20 = scalar_lea.vmem [#allocation3], %s3417_s19  ;;  %s3936_s10 = smov [#allocation3]  }
  0x1e   : > { %s3419_s22 = sshll.u32 %s250_s21, 3  ;;  %s3354_s21 = sshll.u32 %s247_s20, 4  ;;  %s6318_s21 = int_to_ptr.vmem [resolvable:$true] %s3354_s21 }
  0x1f   : > { %403 = vmatpush1.bf16.msra.mxu0 %v3665_v6  ;;  %3615 = vmatpush1.bf16.msra.mxu1 %v3665_v6  ;;  %s4045_s29 = scalar_lea.vmem %s6358_s0, %s3419_s22  ;;  %6511 = vst [vmem:[#allocation7_spill] sm:$0xff] %v4119_v62  ;;  %v4139_v4 = vrot.slane %v4124_v63, %v4119_v62  ;;  %v4143_v5 = vrot.slane %v4135_v2, %v4119_v62  ;;  %v3674_v6 = vld [vmem:[%s6360_s2 + $0x20] ss:$8 sps:$4 sm:$0xff]   ;;  %s3870_s30 = scalar_lea.vmem %s6318_s21, 32 }
  0x20   : > { %3426 = vmatprep.subr.msk.bf16.mxu0 %vm393_vm0, %v3425_v7  ;;  %3613 = vmatprep.subr.msk.bf16.mxu1 %vm393_vm0, %v3425_v7  ;;  %v256_v10 = vld [vmem:[%s4045_s29] sm:$0xff]  ;;  %v257_v11 = vld [vmem:[%s4045_s29 + $0x8] sm:$0xff]  ;;  %v258_v15 = vld [vmem:[%s4045_s29 + $0x10] sm:$0xff]  ;;  %p3871_p11 = scmp.ne.s32.totalorder %s6318_s21, %s3870_s30  ;;  %s3874_s11 = sshll.u32 %s3936_s10, 4  ;;  %s3875_s11 = int_to_ptr.vmem [resolvable:$false] %s3874_s11 }
  0x21   : > { %v290_v12 = vpack.c.bf16 %v257_v11, %v256_v10  ;;  %v272_v13 = vld [vmem:[%s4045_s29 + $0x80] sm:$0xff]  ;;  %v273_v14 = vld [vmem:[%s4045_s29 + $0x88] sm:$0xff]  ;;  %v259_v16 = vld [vmem:[%s4045_s29 + $0x18] sm:$0xff]  ;;  %s3876_s12 = scalar_lea.vmem %s3875_s11, 64  ;;  %p3877_p0 = scmp.lt.s32.totalorder %s6318_s21, %s3875_s11 }
  0x22   : > { %v298_v17 = vpack.c.bf16 %v273_v14, %v272_v13  ;;  %v291_v18 = vpack.c.bf16 %v259_v16, %v258_v15  ;;  %v274_v19 = vld [vmem:[%s4045_s29 + $0x90] sm:$0xff]  ;;  %v275_v20 = vld [vmem:[%s4045_s29 + $0x98] sm:$0xff]  ;;  %v260_v21 = vld [vmem:[%s4045_s29 + $0x20] sm:$0xff]  ;;  %p3872_p12 = pnand %p3871_p11, %p4010_p5  ;;  %p3878_p1 = scmp.lt.s32.totalorder %s3876_s12, %s3870_s30 }
  0x23   : > { %405 = vmatpush1.bf16.msra.mxu0 %v395_v9  ;;  %3616 = vmatpush1.bf16.msra.mxu1 %v395_v9  ;;  %v261_v22 = vld [vmem:[%s4045_s29 + $0x28] sm:$0xff]  ;;  %v299_v23 = vpack.c.bf16 %v275_v20, %v274_v19  ;;  %v276_v24 = vld [vmem:[%s4045_s29 + $0xa0] sm:$0xff]  ;;  %v262_v27 = vld [vmem:[%s4045_s29 + $0x30] sm:$0xff] }
  0x24   : > { %v277_v25 = vld [vmem:[%s4045_s29 + $0xa8] sm:$0xff]  ;;  %v292_v26 = vpack.c.bf16 %v261_v22, %v260_v21  ;;  %v263_v28 = vld [vmem:[%s4045_s29 + $0x38] sm:$0xff]  ;;  %v278_v30 = vld [vmem:[%s4045_s29 + $0xb0] sm:$0xff]  ;;  %1770 = vmatprep.subr.bf16.mxu1 %v3670_v61  ;;  %p3873_p13 = pneg %p3872_p12  ;;  %p3879_p2 = por %p3878_p1, %p3877_p0 }
  0x25   : > { %v300_v29 = vpack.c.bf16 %v277_v25, %v276_v24  ;;  %v279_v31 = vld [vmem:[%s4045_s29 + $0xb8] sm:$0xff]  ;;  %v293_v32 = vpack.c.bf16 %v263_v28, %v262_v27  ;;  %v264_v34 = vld [vmem:[%s4045_s29 + $0x40] sm:$0xff]  ;;  %v265_v35 = vld [vmem:[%s4045_s29 + $0x48] sm:$0xff] }
  0x26   : > { %3427 = vmatmul.mubr.msk.bf16.vlgmr.msra.gmra.mrb[0].mxu0 %vm344_vm1, %v290_v12  ;;  %3435 = vmatmul.mubr.msk.bf16.vlgmr.msra.gmra.mrb[0].mxu1 %vm344_vm1, %v298_v17  ;;  %v301_v33 = vpack.c.bf16 %v279_v31, %v278_v30  ;;  %v294_v36 = vpack.c.bf16 %v265_v35, %v264_v34  ;;  %v280_v37 = vld [vmem:[%s4045_s29 + $0xc0] sm:$0xff]  ;;  %v281_v38 = vld [vmem:[%s4045_s29 + $0xc8] sm:$0xff]  ;;  %v266_v40 = vld [vmem:[%s4045_s29 + $0x50] sm:$0xff]  ;;  %p3880_p3 = pnand %p3879_p2, %p3873_p13 }
  0x27   : > { %442 = vmatprep.mubr.bf16.mxu0 %v6366_v3  ;;  %522 = vmatprep.mubr.bf16.mxu1 %v6366_v3  ;;  %v302_v39 = vpack.c.bf16 %v281_v38, %v280_v37  ;;  %v267_v41 = vld [vmem:[%s4045_s29 + $0x58] sm:$0xff]  ;;  %v282_v43 = vld [vmem:[%s4045_s29 + $0xd0] sm:$0xff]  ;;  %v268_v46 = vld [vmem:[%s4045_s29 + $0x60] sm:$0xff] }
  0x28   : > { %v295_v42 = vpack.c.bf16 %v267_v41, %v266_v40  ;;  %v283_v44 = vld [vmem:[%s4045_s29 + $0xd8] sm:$0xff]  ;;  %v269_v47 = vld [vmem:[%s4045_s29 + $0x68] sm:$0xff]  ;;  %v284_v49 = vld [vmem:[%s4045_s29 + $0xe0] sm:$0xff]  ;;  %1771 = vmatpush1.bf16.msra.mxu1 %v3668_v60 }
  0x29   : > { %v303_v45 = vpack.c.bf16 %v283_v44, %v282_v43  ;;  %v296_v48 = vpack.c.bf16 %v269_v47, %v268_v46  ;;  %v285_v50 = vld [vmem:[%s4045_s29 + $0xe8] sm:$0xff]  ;;  %v270_v52 = vld [vmem:[%s4045_s29 + $0x70] sm:$0xff]  ;;  %v271_v53 = vld [vmem:[%s4045_s29 + $0x78] sm:$0xff]  ;;  %1772 = vmatprep.subr.bf16.mxu1 %v3673_v1 }
  0x2a   : > { %v304_v51 = vpack.c.bf16 %v285_v50, %v284_v49  ;;  %v297_v54 = vpack.c.bf16 %v271_v53, %v270_v52  ;;  %v286_v55 = vld [vmem:[%s4045_s29 + $0xf0] sm:$0xff]  ;;  %v287_v56 = vld [vmem:[%s4045_s29 + $0xf8] sm:$0xff]  ;;  %v3676_v7 = vld [vmem:[%s6360_s2 + $0x24] ss:$8 sps:$4 sm:$0xff]   ;;  %s3340_s29 = scalar_lea.sflag [#allocation4], %s245_s18 }
  0x2b   : > { %v305_v57 = vpack.c.bf16 %v287_v56, %v286_v55  ;;  %v3677_v13 = vld [vmem:[%s6360_s2 + $0x30] ss:$8 sps:$4 sm:$0xff]   ;;  %v3679_v14 = vld [vmem:[%s6360_s2 + $0x34] ss:$8 sps:$4 sm:$0xff]   ;;  %v3682_v24 = vld [vmem:[%s6360_s2 + $0x44] ss:$8 sps:$4 sm:$0xff]  }
  0x2c   : > { %1773 = vmatpush1.bf16.msra.mxu1 %v3671_v0  ;;  %v3680_v27 = vld [vmem:[%s6360_s2 + $0x40] ss:$8 sps:$4 sm:$0xff]   ;;  %v3688_v47 = vld [vmem:[%s6360_s2 + $0x64] ss:$8 sps:$4 sm:$0xff]  }
  0x2d   : > { %1774 = vmatprep.subr.bf16.mxu1 %v3676_v7  ;;  %v3686_v55 = vld [vmem:[%s6360_s2 + $0x60] ss:$8 sps:$4 sm:$0xff]  }
  0x2e   : > { %3428 = vmatmul.mubr.msk.bf16.gmra.mrb[4].mxu0 %vm344_vm1, %v291_v18  ;;  %3436 = vmatmul.mubr.msk.bf16.gmra.mrb[4].mxu1 %vm344_vm1, %v299_v23 }
  0x2f   : > { %452 = vmatprep.mubr.bf16.mxu0 %v6366_v3  ;;  %532 = vmatprep.mubr.bf16.mxu1 %v6366_v3 }
  0x30   : > { %1775 = vmatpush1.bf16.msra.mxu1 %v3674_v6 }
  0x31   : > { %1776 = vmatprep.subr.bf16.mxu1 %v3679_v14 }
  0x34   : > { %1777 = vmatpush1.bf16.msra.mxu1 %v3677_v13 }
  0x35   : > { %1778 = vmatprep.subr.bf16.mxu1 %v3682_v24 }
  0x36   : > { %3429 = vmatmul.mubr.msk.bf16.gmra.mrb[8].mxu0 %vm344_vm1, %v292_v26  ;;  %3437 = vmatmul.mubr.msk.bf16.gmra.mrb[8].mxu1 %vm344_vm1, %v300_v29 }
  0x37   : > { %462 = vmatprep.mubr.bf16.mxu0 %v6366_v3  ;;  %542 = vmatprep.mubr.bf16.mxu1 %v6366_v3 }
  0x38   : > { %1779 = vmatpush1.bf16.msra.mxu1 %v3680_v27 }
  0x3e   : > { %3430 = vmatmul.mubr.msk.bf16.gmra.mrb[12].mxu0 %vm344_vm1, %v293_v32  ;;  %3438 = vmatmul.mubr.msk.bf16.gmra.mrb[12].mxu1 %vm344_vm1, %v301_v33  ;;  %v3685_v33 = vld [vmem:[%s6360_s2 + $0x54] ss:$8 sps:$4 sm:$0xff]  }
  0x3f   : > { %472 = vmatprep.mubr.bf16.mxu0 %v6366_v3  ;;  %552 = vmatprep.mubr.bf16.mxu1 %v6366_v3 }
  0x40   : > { %1780 = vmatprep.subr.bf16.mxu1 %v3685_v33 }
  0x46   : > { %3431 = vmatmul.mubr.msk.bf16.gmra.mrb[16].mxu0 %vm344_vm1, %v294_v36  ;;  %3439 = vmatmul.mubr.msk.bf16.gmra.mrb[16].mxu1 %vm344_vm1, %v302_v39  ;;  %v3683_v39 = vld [vmem:[%s6360_s2 + $0x50] ss:$8 sps:$4 sm:$0xff]  }
  0x47   : > { %482 = vmatprep.mubr.bf16.mxu0 %v6366_v3  ;;  %562 = vmatprep.mubr.bf16.mxu1 %v6366_v3 }
  0x48   : > { %1781 = vmatpush1.bf16.msra.mxu1 %v3683_v39 }
  0x49   : > { %1782 = vmatprep.subr.bf16.mxu1 %v3688_v47 }
  0x4c   : > { %1783 = vmatpush1.bf16.msra.mxu1 %v3686_v55 }
  0x4e   : > { %3432 = vmatmul.mubr.msk.bf16.gmra.mrb[20].mxu0 %vm344_vm1, %v295_v42  ;;  %3440 = vmatmul.mubr.msk.bf16.gmra.mrb[20].mxu1 %vm344_vm1, %v303_v45 }
  0x4f   : > { %492 = vmatprep.mubr.bf16.mxu0 %v6366_v3  ;;  %572 = vmatprep.mubr.bf16.mxu1 %v6366_v3 }
  0x56   : > { %3433 = vmatmul.mubr.msk.bf16.gmra.mrb[24].mxu0 %vm344_vm1, %v296_v48  ;;  %3441 = vmatmul.mubr.msk.bf16.gmra.mrb[24].mxu1 %vm344_vm1, %v304_v51 }
  0x57   : > { %502 = vmatprep.mubr.bf16.mxu0 %v6366_v3  ;;  %582 = vmatprep.mubr.bf16.mxu1 %v6366_v3 }
  0x5e   : > { %3434 = vmatmul.mubr.msk.bf16.gmra.mrb[28].mxu0 %vm344_vm1, %v297_v54  ;;  %3442 = vmatmul.mubr.msk.bf16.gmra.mrb[28].mxu1 %vm344_vm1, %v305_v57 }
  0xf9   : > { %v434_v8 = vpop.f32.mrb[0].mxu0  ;;  %v514_v18 = vpop.f32.mrb[0].mxu1 }
  0xfa   : > { %v4152_v9 = vadd.f32 %v434_v8, %v4139_v4  ;;  %v436_v10 = vpop.f32.mrb[1].mxu0  ;;  %v4176_v22 = vadd.f32 %v514_v18, %v4139_v4  ;;  %v516_v23 = vpop.f32.mrb[1].mxu1 }
  0xfb   : > { %v4155_v11 = vadd.f32 %v436_v10, %v4143_v5  ;;  %v438_v12 = vpop.f32.mrb[2].mxu0  ;;  %v4182_v25 = vadd.f32 %v516_v23, %v4143_v5  ;;  %v518_v26 = vpop.f32.mrb[2].mxu1 }
  0xfc   : > { %v4164_v15 = vadd.f32 %v438_v12, %v4139_v4  ;;  %v440_v16 = vpop.f32.mrb[3].mxu0  ;;  %v722_v17 = vmul.f32 %v4152_v9, %v4152_v9  ;;  %v4192_v31 = vadd.f32 %v518_v26, %v4139_v4  ;;  %v520_v32 = vpop.f32.mrb[3].mxu1 }
  0xfd   : > { %v4169_v19 = vadd.f32 %v440_v16, %v4143_v5  ;;  %v593_v20 = vadd.f32 %v4155_v11, %v4152_v9  ;;  %v723_v21 = vmul.f32 %v4155_v11, %v4155_v11  ;;  %v4198_v34 = vadd.f32 %v520_v32, %v4143_v5 }
  0xfe   : > { %v724_v29 = vmul.f32 %v4164_v15, %v4164_v15 }
  0xff   : > { %594 = vadd.xlane.f32.xlu0 %v593_v20  ;;  %v786_v28 = vadd.f32 %v723_v21, %v722_v17  ;;  %v725_v30 = vmul.f32 %v4169_v19, %v4169_v19  ;;  %v596_v36 = vadd.f32 %v4169_v19, %v4164_v15  ;;  %v3691_v21 = vld [vmem:[%s6360_s2 + $0x74] ss:$8 sps:$4 sm:$0xff]  }
 0x100   : > { %1784 = vmatprep.subr.bf16.mxu1 %v3691_v21 }
 0x101   : > { %v444_v35 = vpop.f32.mrb[4].mxu0  ;;  %787 = vadd.xlane.f32.xlu1 %v786_v28  ;;  %v789_v42 = vadd.f32 %v725_v30, %v724_v29  ;;  %v524_v46 = vpop.f32.mrb[4].mxu1  ;;  %v3689_v29 = vld [vmem:[%s6360_s2 + $0x70] ss:$8 sps:$4 sm:$0xff]  }
 0x102   : > { %v4203_v37 = vadd.f32 %v444_v35, %v4139_v4  ;;  %v446_v38 = vpop.f32.mrb[5].mxu0  ;;  %v4227_v51 = vadd.f32 %v524_v46, %v4139_v4  ;;  %v526_v52 = vpop.f32.mrb[5].mxu1  ;;  %1785 = vmatpush1.bf16.msra.mxu1 %v3689_v29  ;;  %v3692_v46 = vld [vmem:[%s6360_s2 + $0x80] ss:$8 sps:$4 sm:$0xff]  }
 0x103   : > { %v4209_v40 = vadd.f32 %v446_v38, %v4143_v5  ;;  %v448_v41 = vpop.f32.mrb[6].mxu0  ;;  %597 = vadd.xlane.f32.xlu0 %v596_v36  ;;  %v4230_v53 = vadd.f32 %v526_v52, %v4143_v5  ;;  %v528_v54 = vpop.f32.mrb[6].mxu1 }
 0x104   : > { %v4212_v43 = vadd.f32 %v448_v41, %v4139_v4  ;;  %v450_v44 = vpop.f32.mrb[7].mxu0  ;;  %v726_v45 = vmul.f32 %v4203_v37, %v4203_v37  ;;  %v4242_v61 = vadd.f32 %v528_v54, %v4139_v4  ;;  %v530_v0 = vpop.f32.mrb[7].mxu1 }
 0x105   : > { %v4220_v48 = vadd.f32 %v450_v44, %v4143_v5  ;;  %790 = vadd.xlane.f32.xlu1 %v789_v42  ;;  %v599_v49 = vadd.f32 %v4209_v40, %v4203_v37  ;;  %v727_v50 = vmul.f32 %v4209_v40, %v4209_v40  ;;  %v4245_v1 = vadd.f32 %v530_v0, %v4143_v5  ;;  %v3694_v42 = vld [vmem:[%s6360_s2 + $0x84] ss:$8 sps:$4 sm:$0xff]  }
 0x106   : > { %v728_v57 = vmul.f32 %v4212_v43, %v4212_v43  ;;  %1786 = vmatprep.subr.bf16.mxu1 %v3694_v42 }
 0x107   : > { %600 = vadd.xlane.f32.xlu0 %v599_v49  ;;  %v602_v56 = vadd.f32 %v4220_v48, %v4212_v43  ;;  %v729_v60 = vmul.f32 %v4220_v48, %v4220_v48  ;;  %v792_v7 = vadd.f32 %v727_v50, %v726_v45  ;;  %1787 = vmatpush1.bf16.msra.mxu1 %v3692_v46 }
 0x109   : > { %v454_v6 = vpop.f32.mrb[8].mxu0  ;;  %603 = vadd.xlane.f32.xlu1 %v602_v56  ;;  %v795_v14 = vadd.f32 %v729_v60, %v728_v57  ;;  %v534_v20 = vpop.f32.mrb[8].mxu1 }
 0x10a   : > { %v4248_v8 = vadd.f32 %v454_v6, %v4139_v4  ;;  %v456_v10 = vpop.f32.mrb[9].mxu0  ;;  %v4269_v27 = vadd.f32 %v534_v20, %v4139_v4  ;;  %v536_v28 = vpop.f32.mrb[9].mxu1  ;;  %v3695_v20 = vld [vmem:[%s6360_s2 + $0x90] ss:$8 sps:$4 sm:$0xff]  }
 0x10b   : > { %v4251_v12 = vadd.f32 %v456_v10, %v4143_v5  ;;  %v458_v13 = vpop.f32.mrb[10].mxu0  ;;  %793 = vadd.xlane.f32.xlu0 %v792_v7  ;;  %v4275_v30 = vadd.f32 %v536_v28, %v4143_v5  ;;  %v538_v32 = vpop.f32.mrb[10].mxu1 }
 0x10c   : > { %v4254_v16 = vadd.f32 %v458_v13, %v4139_v4  ;;  %v460_v17 = vpop.f32.mrb[11].mxu0  ;;  %v730_v18 = vmul.f32 %v4248_v8, %v4248_v8  ;;  %6512 = vst [vmem:[#allocation8_spill] sm:$0xff] %v4269_v27  ;;  %v4284_v38 = vadd.f32 %v538_v32, %v4139_v4  ;;  %v540_v39 = vpop.f32.mrb[11].mxu1 }
 0x10d   : > { %v4262_v23 = vadd.f32 %v460_v17, %v4143_v5  ;;  %796 = vadd.xlane.f32.xlu1 %v795_v14  ;;  %v605_v24 = vadd.f32 %v4251_v12, %v4248_v8  ;;  %v731_v26 = vmul.f32 %v4251_v12, %v4251_v12  ;;  %6513 = vst [vmem:[#allocation9_spill] sm:$0xff] %v4275_v30  ;;  %v3697_v14 = vld [vmem:[%s6360_s2 + $0x94] ss:$8 sps:$4 sm:$0xff]  }
 0x10e   : > { %v732_v35 = vmul.f32 %v4254_v16, %v4254_v16  ;;  %6514 = vst [vmem:[#allocation10_spill] sm:$0xff] %v4284_v38  ;;  %v4287_v41 = vadd.f32 %v540_v39, %v4143_v5  ;;  %1788 = vmatprep.subr.bf16.mxu1 %v3697_v14 }
 0x10f   : > { %606 = vadd.xlane.f32.xlu0 %v605_v24  ;;  %v608_v33 = vadd.f32 %v4262_v23, %v4254_v16  ;;  %v733_v36 = vmul.f32 %v4262_v23, %v4262_v23  ;;  %v798_v45 = vadd.f32 %v731_v26, %v730_v18  ;;  %1789 = vmatpush1.bf16.msra.mxu1 %v3695_v20 }
 0x110   : > { %6515 = vst [vmem:[#allocation11_spill] sm:$0xff] %v4287_v41 }
 0x111   : > { %v464_v44 = vpop.f32.mrb[12].mxu0  ;;  %609 = vadd.xlane.f32.xlu1 %v608_v33  ;;  %v801_v54 = vadd.f32 %v733_v36, %v732_v35  ;;  %v544_v60 = vpop.f32.mrb[12].mxu1  ;;  %v3700_v36 = vld [vmem:[%s6360_s2 + $0xa4] ss:$8 sps:$4 sm:$0xff]  }
 0x112   : > { %v4296_v47 = vadd.f32 %v464_v44, %v4139_v4  ;;  %v466_v49 = vpop.f32.mrb[13].mxu0  ;;  %v4314_v10 = vadd.f32 %v544_v60, %v4139_v4  ;;  %v546_v13 = vpop.f32.mrb[13].mxu1  ;;  %v3698_v44 = vld [vmem:[%s6360_s2 + $0xa0] ss:$8 sps:$4 sm:$0xff]   ;;  %1790 = vmatprep.subr.bf16.mxu1 %v3700_v36 }
 0x113   : > { %v4299_v50 = vadd.f32 %v466_v49, %v4143_v5  ;;  %v468_v52 = vpop.f32.mrb[14].mxu0  ;;  %799 = vadd.xlane.f32.xlu0 %v798_v45  ;;  %v4320_v17 = vadd.f32 %v546_v13, %v4143_v5  ;;  %v548_v18 = vpop.f32.mrb[14].mxu1  ;;  %1791 = vmatpush1.bf16.msra.mxu1 %v3698_v44 }
 0x114   : > { %v4302_v55 = vadd.f32 %v468_v52, %v4139_v4  ;;  %v470_v56 = vpop.f32.mrb[15].mxu0  ;;  %v734_v57 = vmul.f32 %v4296_v47, %v4296_v47  ;;  %6517 = vst [vmem:[#allocation13_spill] sm:$0xff] %v4314_v10  ;;  %v4332_v28 = vadd.f32 %v548_v18, %v4139_v4  ;;  %v550_v29 = vpop.f32.mrb[15].mxu1  ;;  %v3703_v18 = vld [vmem:[%s6360_s2 + $0xb4] ss:$8 sps:$4 sm:$0xff]  }
 0x115   : > { %v4307_v0 = vadd.f32 %v470_v56, %v4143_v5  ;;  %802 = vadd.xlane.f32.xlu1 %v801_v54  ;;  %v611_v6 = vadd.f32 %v4299_v50, %v4296_v47  ;;  %v735_v7 = vmul.f32 %v4299_v50, %v4299_v50  ;;  %6518 = vst [vmem:[#allocation14_spill] sm:$0xff] %v4320_v17 }
 0x116   : > { %v736_v24 = vmul.f32 %v4302_v55, %v4302_v55  ;;  %6519 = vst [vmem:[#allocation15_spill] sm:$0xff] %v4332_v28  ;;  %v4335_v32 = vadd.f32 %v550_v29, %v4143_v5  ;;  %1792 = vmatprep.subr.bf16.mxu1 %v3703_v18 }
 0x117   : > { %6516 = vst [vmem:[#allocation12_spill] sm:$0xff] %v4307_v0  ;;  %612 = vadd.xlane.f32.xlu0 %v611_v6  ;;  %v614_v21 = vadd.f32 %v4307_v0, %v4302_v55  ;;  %v737_v26 = vmul.f32 %v4307_v0, %v4307_v0  ;;  %v804_v35 = vadd.f32 %v735_v7, %v734_v57 }
 0x118   : > { %6520 = vst [vmem:[#allocation16_spill] sm:$0xff] %v4335_v32 }
 0x119   : > { %v474_v33 = vpop.f32.mrb[16].mxu0  ;;  %615 = vadd.xlane.f32.xlu1 %v614_v21  ;;  %v807_v49 = vadd.f32 %v737_v26, %v736_v24  ;;  %v554_v57 = vpop.f32.mrb[16].mxu1  ;;  %v3701_v24 = vld [vmem:[%s6360_s2 + $0xb0] ss:$8 sps:$4 sm:$0xff]  }
 0x11a   : > { %v4341_v39 = vadd.f32 %v474_v33, %v4139_v4  ;;  %v476_v42 = vpop.f32.mrb[17].mxu0  ;;  %v4362_v13 = vadd.f32 %v554_v57, %v4139_v4  ;;  %v556_v14 = vpop.f32.mrb[17].mxu1  ;;  %1793 = vmatpush1.bf16.msra.mxu1 %v3701_v24 }
 0x11b   : > { %v4347_v45 = vadd.f32 %v476_v42, %v4143_v5  ;;  %v478_v46 = vpop.f32.mrb[18].mxu0  ;;  %805 = vadd.xlane.f32.xlu0 %v804_v35  ;;  %v4368_v20 = vadd.f32 %v556_v14, %v4143_v5  ;;  %v558_v21 = vpop.f32.mrb[18].mxu1 }
 0x11c   : > { %6521 = vst [vmem:[#allocation17_spill] sm:$0xff] %v4341_v39  ;;  %v4350_v52 = vadd.f32 %v478_v46, %v4139_v4  ;;  %v480_v54 = vpop.f32.mrb[19].mxu0  ;;  %v738_v56 = vmul.f32 %v4341_v39, %v4341_v39  ;;  %6525 = vst [vmem:[#allocation21_spill] sm:$0xff] %v4362_v13  ;;  %v4380_v35 = vadd.f32 %v558_v21, %v4139_v4  ;;  %v560_v36 = vpop.f32.mrb[19].mxu1 }
 0x11d   : > { %6522 = vst [vmem:[#allocation18_spill] sm:$0xff] %v4347_v45  ;;  %v4355_v60 = vadd.f32 %v480_v54, %v4143_v5  ;;  %808 = vadd.xlane.f32.xlu1 %v807_v49  ;;  %v617_v6 = vadd.f32 %v4347_v45, %v4341_v39  ;;  %v739_v7 = vmul.f32 %v4347_v45, %v4347_v45  ;;  %6526 = vst [vmem:[#allocation22_spill] sm:$0xff] %v4368_v20  ;;  %v3706_v49 = vld [vmem:[%s6360_s2 + $0xc4] ss:$8 sps:$4 sm:$0xff]  }
 0x11e   : > { %6523 = vst [vmem:[#allocation19_spill] sm:$0xff] %v4350_v52  ;;  %v740_v29 = vmul.f32 %v4350_v52, %v4350_v52  ;;  %6527 = vst [vmem:[#allocation23_spill] sm:$0xff] %v4380_v35  ;;  %v4383_v42 = vadd.f32 %v560_v36, %v4143_v5  ;;  %1794 = vmatprep.subr.bf16.mxu1 %v3706_v49  ;;  %v3709_v49 = vld [vmem:[%s6360_s2 + $0xd4] ss:$8 sps:$4 sm:$0xff]  }
 0x11f   : > { %6524 = vst [vmem:[#allocation20_spill] sm:$0xff] %v4355_v60  ;;  %618 = vadd.xlane.f32.xlu0 %v617_v6  ;;  %v620_v26 = vadd.f32 %v4355_v60, %v4350_v52  ;;  %v741_v33 = vmul.f32 %v4355_v60, %v4355_v60  ;;  %v810_v46 = vadd.f32 %v739_v7, %v738_v56  ;;  %v3704_v6 = vld [vmem:[%s6360_s2 + $0xc0] ss:$8 sps:$4 sm:$0xff]  }
 0x120   : > { %6528 = vst [vmem:[#allocation24_spill] sm:$0xff] %v4383_v42  ;;  %1795 = vmatpush1.bf16.msra.mxu1 %v3704_v6 }
 0x121   : > { %v484_v44 = vpop.f32.mrb[20].mxu0  ;;  %621 = vadd.xlane.f32.xlu1 %v620_v26  ;;  %v813_v21 = vadd.f32 %v741_v33, %v740_v29  ;;  %v564_v36 = vpop.f32.mrb[20].mxu1  ;;  %1796 = vmatprep.subr.bf16.mxu1 %v3709_v49 }
 0x122   : > { %v4389_v54 = vadd.f32 %v484_v44, %v4139_v4  ;;  %v486_v57 = vpop.f32.mrb[21].mxu0  ;;  %v4410_v29 = vadd.f32 %v564_v36, %v4139_v4  ;;  %v566_v33 = vpop.f32.mrb[21].mxu1 }
 0x123   : > { %v4395_v14 = vadd.f32 %v486_v57, %v4143_v5  ;;  %v488_v18 = vpop.f32.mrb[22].mxu0  ;;  %811 = vadd.xlane.f32.xlu0 %v810_v46  ;;  %v4416_v57 = vadd.f32 %v566_v33, %v4143_v5 }
 0x124   : > { %6529 = vst [vmem:[#allocation25_spill] sm:$0xff] %v4389_v54  ;;  %v4398_v56 = vadd.f32 %v488_v18, %v4139_v4  ;;  %v490_v7 = vpop.f32.mrb[23].mxu0  ;;  %v742_v26 = vmul.f32 %v4389_v54, %v4389_v54  ;;  %6533 = vst [vmem:[#allocation29_spill] sm:$0xff] %v4410_v29  ;;  %v568_v18 = vpop.f32.mrb[22].mxu1 }
 0x125   : > { %6530 = vst [vmem:[#allocation26_spill] sm:$0xff] %v4395_v14  ;;  %v4403_v24 = vadd.f32 %v490_v7, %v4143_v5  ;;  %814 = vadd.xlane.f32.xlu1 %v813_v21  ;;  %v623_v44 = vadd.f32 %v4395_v14, %v4389_v54  ;;  %v743_v46 = vmul.f32 %v4395_v14, %v4395_v14  ;;  %6534 = vst [vmem:[#allocation30_spill] sm:$0xff] %v4416_v57  ;;  %v3707_v21 = vld [vmem:[%s6360_s2 + $0xd0] ss:$8 sps:$4 sm:$0xff]   ;;  %v570_v33 = vpop.f32.mrb[23].mxu1 }
 0x126   : > { %6531 = vst [vmem:[#allocation27_spill] sm:$0xff] %v4398_v56  ;;  %v744_v36 = vmul.f32 %v4398_v56, %v4398_v56  ;;  %v4428_v3 = vadd.f32 %v568_v18, %v4139_v4  ;;  %v4431_v6 = vadd.f32 %v570_v33, %v4143_v5  ;;  %v3712_v14 = vld [vmem:[%s6360_s2 + $0xe4] ss:$8 sps:$4 sm:$0xff]   ;;  %1797 = vmatpush1.bf16.msra.mxu1 %v3707_v21  ;;  %v3710_v18 = vld [vmem:[%s6360_s2 + $0xe0] ss:$8 sps:$4 sm:$0xff]  }
 0x127   : > { %6532 = vst [vmem:[#allocation28_spill] sm:$0xff] %v4403_v24  ;;  %624 = vadd.xlane.f32.xlu0 %v623_v44  ;;  %v626_v7 = vadd.f32 %v4403_v24, %v4398_v56  ;;  %v745_v58 = vmul.f32 %v4403_v24, %v4403_v24  ;;  %v816_v44 = vadd.f32 %v743_v46, %v742_v26 }
 0x128   : > { %6535 = vst [vmem:[#allocation31_spill] sm:$0xff] %v4428_v3  ;;  %6536 = vst [vmem:[#allocation32_spill] sm:$0xff] %v4431_v6  ;;  %1798 = vmatprep.subr.bf16.mxu1 %v3712_v14 }
 0x129   : > { %v494_v62 = vpop.f32.mrb[24].mxu0  ;;  %627 = vadd.xlane.f32.xlu1 %v626_v7  ;;  %v819_v7 = vadd.f32 %v745_v58, %v744_v36  ;;  %v574_v24 = vpop.f32.mrb[24].mxu1  ;;  %v3715_v36 = vld [vmem:[%s6360_s2 + $0xf4] ss:$8 sps:$4 sm:$0xff]  }
 0x12a   : > { %v4437_v56 = vadd.f32 %v494_v62, %v4139_v4  ;;  %v496_v54 = vpop.f32.mrb[25].mxu0  ;;  %v4458_v58 = vadd.f32 %v574_v24, %v4139_v4  ;;  %v576_v14 = vpop.f32.mrb[25].mxu1  ;;  %1799 = vmatpush1.bf16.msra.mxu1 %v3710_v18 }
 0x12b   : > { %v4443_v33 = vadd.f32 %v496_v54, %v4143_v5  ;;  %v498_v49 = vpop.f32.mrb[26].mxu0  ;;  %817 = vadd.xlane.f32.xlu0 %v816_v44  ;;  %1800 = vmatprep.subr.bf16.mxu1 %v3715_v36 }
 0x12c   : > { %6537 = vst [vmem:[#allocation33_spill] sm:$0xff] %v4437_v56  ;;  %v4446_v26 = vadd.f32 %v498_v49, %v4139_v4  ;;  %v500_v46 = vpop.f32.mrb[27].mxu0  ;;  %v746_v62 = vmul.f32 %v4437_v56, %v4437_v56  ;;  %6541 = vst [vmem:[#allocation37_spill] sm:$0xff] %v4458_v58  ;;  %v4464_v49 = vadd.f32 %v576_v14, %v4143_v5 }
 0x12d   : > { %6538 = vst [vmem:[#allocation34_spill] sm:$0xff] %v4443_v33  ;;  %v4451_v21 = vadd.f32 %v500_v46, %v4143_v5  ;;  %820 = vadd.xlane.f32.xlu1 %v819_v7  ;;  %v629_v54 = vadd.f32 %v4443_v33, %v4437_v56  ;;  %v747_v44 = vmul.f32 %v4443_v33, %v4443_v33  ;;  %v578_v46 = vpop.f32.mrb[26].mxu1  ;;  %v3713_v7 = vld [vmem:[%s6360_s2 + $0xf0] ss:$8 sps:$4 sm:$0xff]  }
 0x12e   : > { %6539 = vst [vmem:[#allocation35_spill] sm:$0xff] %v4446_v26  ;;  %6542 = vst [vmem:[#allocation38_spill] sm:$0xff] %v4464_v49  ;;  %v748_v24 = vmul.f32 %v4446_v26, %v4446_v26  ;;  %v4476_v60 = vadd.f32 %v578_v46, %v4139_v4  ;;  %v580_v14 = vpop.f32.mrb[27].mxu1  ;;  %1801 = vmatpush1.bf16.msra.mxu1 %v3713_v7 }
 0x12f   : > { %6540 = vst [vmem:[#allocation36_spill] sm:$0xff] %v4451_v21  ;;  %630 = vadd.xlane.f32.xlu0 %v629_v54  ;;  %v632_v33 = vadd.f32 %v4451_v21, %v4446_v26  ;;  %v749_v56 = vmul.f32 %v4451_v21, %v4451_v21  ;;  %v4479_v18 = vadd.f32 %v580_v14, %v4143_v5 }
 0x130   : > { %6543 = vst [vmem:[#allocation39_spill] sm:$0xff] %v4476_v60  ;;  %v822_v54 = vadd.f32 %v747_v44, %v746_v62 }
 0x131   : > { %6544 = vst [vmem:[#allocation40_spill] sm:$0xff] %v4479_v18  ;;  %v504_v52 = vpop.f32.mrb[28].mxu0  ;;  %633 = vadd.xlane.f32.xlu1 %v632_v33  ;;  %v825_v46 = vadd.f32 %v749_v56, %v748_v24  ;;  %v584_v33 = vpop.f32.mrb[28].mxu1 }
 0x132   : > { %v4482_v45 = vadd.f32 %v504_v52, %v4139_v4  ;;  %v506_v39 = vpop.f32.mrb[29].mxu0  ;;  %v4500_v56 = vadd.f32 %v584_v33, %v4139_v4 }
 0x133   : > { %v4485_v26 = vadd.f32 %v506_v39, %v4143_v5  ;;  %v508_v21 = vpop.f32.mrb[30].mxu0  ;;  %823 = vadd.xlane.f32.xlu0 %v822_v54 }
 0x134   : > { %6545 = vst [vmem:[#allocation41_spill] sm:$0xff] %v4482_v45  ;;  %v4488_v0 = vadd.f32 %v508_v21, %v4139_v4  ;;  %v510_v14 = vpop.f32.mrb[31].mxu0  ;;  %v750_v36 = vmul.f32 %v4482_v45, %v4482_v45  ;;  %6549 = vst [vmem:[#allocation45_spill] sm:$0xff] %v4500_v56  ;;  %v586_v21 = vpop.f32.mrb[29].mxu1 }
 0x135   : > { %6546 = vst [vmem:[#allocation42_spill] sm:$0xff] %v4485_v26  ;;  %v4493_v62 = vadd.f32 %v510_v14, %v4143_v5  ;;  %826 = vadd.xlane.f32.xlu1 %v825_v46  ;;  %v635_v52 = vadd.f32 %v4485_v26, %v4482_v45  ;;  %v751_v39 = vmul.f32 %v4485_v26, %v4485_v26  ;;  %v588_v7 = vpop.f32.mrb[30].mxu1 }
 0x136   : > { %6547 = vst [vmem:[#allocation43_spill] sm:$0xff] %v4488_v0  ;;  %v4503_v44 = vadd.f32 %v586_v21, %v4143_v5  ;;  %v752_v54 = vmul.f32 %v4488_v0, %v4488_v0  ;;  %v4512_v14 = vadd.f32 %v588_v7, %v4139_v4  ;;  %v590_v33 = vpop.f32.mrb[31].mxu1  ;;  %v641_v45 = vadd.f32 %v4182_v25, %v4176_v22 }
 0x137   : > { %6548 = vst [vmem:[#allocation44_spill] sm:$0xff] %v4493_v62  ;;  %636 = vadd.xlane.f32.xlu0 %v635_v52  ;;  %v638_v24 = vadd.f32 %v4493_v62, %v4488_v0  ;;  %v753_v46 = vmul.f32 %v4493_v62, %v4493_v62  ;;  %v4515_v26 = vadd.f32 %v590_v33, %v4143_v5 }
 0x138   : > { %6550 = vst [vmem:[#allocation46_spill] sm:$0xff] %v4503_v44  ;;  %6551 = vst [vmem:[#allocation47_spill] sm:$0xff] %v4512_v14  ;;  %v828_v21 = vadd.f32 %v751_v39, %v750_v36  ;;  %v754_v0 = vmul.f32 %v4176_v22, %v4176_v22  ;;  %v755_v62 = vmul.f32 %v4182_v25, %v4182_v25 }
 0x139   : > { %6552 = vst [vmem:[#allocation48_spill] sm:$0xff] %v4515_v26  ;;  %639 = vadd.xlane.f32.xlu1 %v638_v24  ;;  %v831_v52 = vadd.f32 %v753_v46, %v752_v54  ;;  %v644_v4 = vadd.f32 %v4198_v34, %v4192_v31  ;;  %v756_v5 = vmul.f32 %v4192_v31, %v4192_v31 }
 0x13a   : > { %v757_v36 = vmul.f32 %v4198_v34, %v4198_v34  ;;  %v834_v39 = vadd.f32 %v755_v62, %v754_v0  ;;  %v647_v24 = vadd.f32 %v4230_v53, %v4227_v51  ;;  %v759_v54 = vmul.f32 %v4230_v53, %v4230_v53 }
 0x13b   : > { %829 = vadd.xlane.f32.xlu0 %v828_v21  ;;  %v650_v46 = vadd.f32 %v4245_v1, %v4242_v61  ;;  %v760_v33 = vmul.f32 %v4242_v61, %v4242_v61  ;;  %v761_v0 = vmul.f32 %v4245_v1, %v4245_v1 }
 0x13c   : > { %v837_v7 = vadd.f32 %v757_v36, %v756_v5  ;;  %v763_v5 = vmul.f32 %v4275_v30, %v4275_v30  ;;  %v656_v36 = vadd.f32 %v4287_v41, %v4284_v38 }
 0x13d   : > { %832 = vadd.xlane.f32.xlu1 %v831_v52  ;;  %v843_v21 = vadd.f32 %v761_v0, %v760_v33  ;;  %v653_v52 = vadd.f32 %v4275_v30, %v4269_v27  ;;  %v767_v33 = vmul.f32 %v4320_v17, %v4320_v17  ;;  %v662_v0 = vadd.f32 %v4335_v32, %v4332_v28 }
 0x13f   : > { %642 = vadd.xlane.f32.xlu0 %v641_v45  ;;  %v758_v45 = vmul.f32 %v4227_v51, %v4227_v51 }
 0x141   : > { %645 = vadd.xlane.f32.xlu1 %v644_v4  ;;  %v840_v62 = vadd.f32 %v759_v54, %v758_v45  ;;  %v762_v4 = vmul.f32 %v4269_v27, %v4269_v27  ;;  %v659_v54 = vadd.f32 %v4320_v17, %v4314_v10  ;;  %v6567_v27 = vld [vmem:[#allocation34_spill] sm:$0xff] }
 0x143   : > { %835 = vadd.xlane.f32.xlu0 %v834_v39  ;;  %v764_v39 = vmul.f32 %v4284_v38, %v4284_v38 }
 0x145   : > { %838 = vadd.xlane.f32.xlu1 %v837_v7  ;;  %v765_v7 = vmul.f32 %v4287_v41, %v4287_v41 }
 0x147   : > { %648 = vadd.xlane.f32.xlu0 %v647_v24  ;;  %v846_v24 = vadd.f32 %v763_v5, %v762_v4  ;;  %v849_v45 = vadd.f32 %v765_v7, %v764_v39  ;;  %v665_v5 = vadd.f32 %v4368_v20, %v4362_v13  ;;  %v771_v39 = vmul.f32 %v4368_v20, %v4368_v20 }
 0x148   : > { %v668_v7 = vadd.f32 %v4383_v42, %v4380_v35 }
 0x149   : > { %651 = vadd.xlane.f32.xlu1 %v650_v46  ;;  %v766_v46 = vmul.f32 %v4314_v10, %v4314_v10 }
 0x14b   : > { %841 = vadd.xlane.f32.xlu0 %v840_v62  ;;  %v768_v62 = vmul.f32 %v4332_v28, %v4332_v28 }
 0x14d   : > { %844 = vadd.xlane.f32.xlu1 %v843_v21  ;;  %v769_v21 = vmul.f32 %v4335_v32, %v4335_v32 }
 0x14f   : > { %654 = vadd.xlane.f32.xlu0 %v653_v52  ;;  %v852_v52 = vadd.f32 %v767_v33, %v766_v46  ;;  %v855_v4 = vadd.f32 %v769_v21, %v768_v62  ;;  %v671_v33 = vadd.f32 %v4416_v57, %v4410_v29  ;;  %v775_v62 = vmul.f32 %v4416_v57, %v4416_v57  ;;  %v6555_v57 = vld [vmem:[#allocation18_spill] sm:$0xff] }
 0x150   : > { %v674_v21 = vadd.f32 %v4431_v6, %v4428_v3 }
 0x151   : > { %657 = vadd.xlane.f32.xlu1 %v656_v36  ;;  %v770_v36 = vmul.f32 %v4362_v13, %v4362_v13 }
 0x153   : > { %847 = vadd.xlane.f32.xlu0 %v846_v24  ;;  %v772_v24 = vmul.f32 %v4380_v35, %v4380_v35 }
 0x155   : > { %850 = vadd.xlane.f32.xlu1 %v849_v45  ;;  %v773_v45 = vmul.f32 %v4383_v42, %v4383_v42 }
 0x157   : > { %660 = vadd.xlane.f32.xlu0 %v659_v54  ;;  %v858_v54 = vadd.f32 %v771_v39, %v770_v36  ;;  %v861_v46 = vadd.f32 %v773_v45, %v772_v24  ;;  %v677_v39 = vadd.f32 %v4464_v49, %v4458_v58  ;;  %v779_v24 = vmul.f32 %v4464_v49, %v4464_v49 }
 0x158   : > { %v680_v45 = vadd.f32 %v4479_v18, %v4476_v60 }
 0x159   : > { %663 = vadd.xlane.f32.xlu1 %v662_v0  ;;  %v774_v0 = vmul.f32 %v4410_v29, %v4410_v29 }
 0x15b   : > { %853 = vadd.xlane.f32.xlu0 %v852_v52  ;;  %v776_v52 = vmul.f32 %v4428_v3, %v4428_v3 }
 0x15d   : > { %856 = vadd.xlane.f32.xlu1 %v855_v4  ;;  %v777_v4 = vmul.f32 %v4431_v6, %v4431_v6 }
 0x15f   : > { %666 = vadd.xlane.f32.xlu0 %v665_v5  ;;  %v864_v5 = vadd.f32 %v775_v62, %v774_v0  ;;  %v867_v36 = vadd.f32 %v777_v4, %v776_v52  ;;  %v683_v62 = vadd.f32 %v4503_v44, %v4500_v56  ;;  %v783_v52 = vmul.f32 %v4503_v44, %v4503_v44 }
 0x160   : > { %v686_v4 = vadd.f32 %v4515_v26, %v4512_v14 }
 0x161   : > { %669 = vadd.xlane.f32.xlu1 %v668_v7  ;;  %v778_v7 = vmul.f32 %v4458_v58, %v4458_v58 }
 0x163   : > { %859 = vadd.xlane.f32.xlu0 %v858_v54  ;;  %v780_v54 = vmul.f32 %v4476_v60, %v4476_v60 }
 0x165   : > { %862 = vadd.xlane.f32.xlu1 %v861_v46  ;;  %v781_v46 = vmul.f32 %v4479_v18, %v4479_v18 }
 0x167   : > { %672 = vadd.xlane.f32.xlu0 %v671_v33  ;;  %v870_v33 = vadd.f32 %v779_v24, %v778_v7  ;;  %v873_v0 = vadd.f32 %v781_v46, %v780_v54 }
 0x169   : > { %675 = vadd.xlane.f32.xlu1 %v674_v21  ;;  %v782_v21 = vmul.f32 %v4500_v56, %v4500_v56 }
 0x16b   : > { %865 = vadd.xlane.f32.xlu0 %v864_v5  ;;  %v784_v5 = vmul.f32 %v4512_v14, %v4512_v14 }
 0x16d   : > { %868 = vadd.xlane.f32.xlu1 %v867_v36  ;;  %v785_v36 = vmul.f32 %v4515_v26, %v4515_v26 }
 0x16f   : > { %678 = vadd.xlane.f32.xlu0 %v677_v39  ;;  %v876_v39 = vadd.f32 %v783_v52, %v782_v21  ;;  %v879_v7 = vadd.f32 %v785_v36, %v784_v5 }
 0x171   : > { %681 = vadd.xlane.f32.xlu1 %v680_v45 }
 0x173   : > { %871 = vadd.xlane.f32.xlu0 %v870_v33 }
 0x175   : > { %874 = vadd.xlane.f32.xlu1 %v873_v0 }
 0x177   : > { %684 = vadd.xlane.f32.xlu0 %v683_v62 }
 0x179   : > { %687 = vadd.xlane.f32.xlu1 %v686_v4 }
 0x17b   : > { %877 = vadd.xlane.f32.xlu0 %v876_v39 }
 0x17d   : > { %880 = vadd.xlane.f32.xlu1 %v879_v7 }
 0x18c   : > { %v595_v24 = vpop.xlane.xlu0 %594 }
 0x18d   : > { %v690_v45 = vmul.f32 0.00390625, %v595_v24 }
 0x18e   : > { %v788_v54 = vpop.xlane.xlu1 %787 }
 0x18f   : > { %v882_v46 = vmul.f32 0.00390625, %v788_v54  ;;  %v914_v33 = vmul.f32 %v690_v45, %v690_v45 }
 0x190   : > { %v598_v0 = vpop.xlane.xlu0 %597 }
 0x191   : > { %v946_v62 = vsub.f32 %v882_v46, %v914_v33  ;;  %v4613_v44 = vmul.f32 0.00390625, %v598_v0 }
 0x192   : > { %v791_v56 = vpop.xlane.xlu1 %790 }
 0x193   : > { %v978_v18 = vmax.f32 %v946_v62, 0.0  ;;  %v883_v14 = vmul.f32 0.00390625, %v791_v56  ;;  %v915_v26 = vmul.f32 %v4613_v44, %v4613_v44  ;;  %v1204_v56 = vsub.s32 1, %v4110_v59 }
 0x194   : > { %v601_v4 = vpop.xlane.xlu0 %600  ;;  %v1276_v62 = vsub.s32 2, %v4110_v59 }
 0x195   : > { %v1010_v21 = vadd.f32 1e-05, %v978_v18  ;;  %v4617_v52 = vmul.f32 0.00390625, %v601_v4  ;;  %v947_v5 = vsub.f32 %v883_v14, %v915_v26  ;;  %v4630_v60 = vrot.slane %v4124_v63, %v1204_v56 }
 0x196   : > { %v604_v36 = vpop.xlane.xlu1 %603  ;;  %v4636_v59 = vrot.slane %v4124_v63, %v1276_v62 }
 0x197   : > { %3732 = vrsqrt.f32 %v1010_v21  ;;  %v4619_v39 = vmul.f32 0.00390625, %v604_v36  ;;  %v979_v7 = vmax.f32 %v947_v5, 0.0  ;;  %v916_v54 = vmul.f32 %v4617_v52, %v4617_v52 }
 0x198   : > { %v794_v24 = vpop.xlane.xlu0 %793 }
 0x199   : > { %v884_v46 = vmul.f32 0.00390625, %v794_v24  ;;  %v1011_v33 = vadd.f32 1e-05, %v979_v7  ;;  %v917_v26 = vmul.f32 %v4619_v39, %v4619_v39  ;;  %v4633_v7 = vrot.slane %v4135_v2, %v1204_v56 }
 0x19a   : > { %v797_v0 = vpop.xlane.xlu1 %796 }
 0x19b   : > { %v948_v18 = vsub.f32 %v884_v46, %v916_v54  ;;  %v885_v14 = vmul.f32 0.00390625, %v797_v0  ;;  %3734 = vrsqrt.f32 %v1011_v33  ;;  %v1074_v54 = vsub.f32 %v4152_v9, %v690_v45 }
 0x19c   : > { %v607_v4 = vpop.xlane.xlu0 %606  ;;  %v1075_v46 = vsub.f32 %v4155_v11, %v690_v45  ;;  %v4641_v0 = vrot.slane %v4135_v2, %v1276_v62 }
 0x19d   : > { %v980_v21 = vmax.f32 %v948_v18, 0.0  ;;  %v949_v5 = vsub.f32 %v885_v14, %v917_v26  ;;  %v4627_v36 = vmul.f32 0.00390625, %v607_v4  ;;  %v1076_v18 = vsub.f32 %v4164_v15, %v4613_v44 }
 0x19e   : > { %v610_v24 = vpop.xlane.xlu1 %609  ;;  %v1077_v26 = vsub.f32 %v4169_v19, %v4613_v44 }
 0x19f   : > { %v981_v33 = vmax.f32 %v949_v5, 0.0  ;;  %v1012_v14 = vadd.f32 1e-05, %v980_v21  ;;  %v4647_v56 = vmul.f32 0.00390625, %v610_v24  ;;  %v918_v2 = vmul.f32 %v4627_v36, %v4627_v36 }
 0x1a0   : > { %v800_v4 = vpop.xlane.xlu0 %799 }
 0x1a1   : > { %v3733_v63 = vpop.eup %3732  ;;  %v886_v45 = vmul.f32 0.00390625, %v800_v4  ;;  %v1013_v44 = vadd.f32 1e-05, %v981_v33  ;;  %v919_v24 = vmul.f32 %v4647_v56, %v4647_v56  ;;  %3736 = vrsqrt.f32 %v1012_v14 }
 0x1a2   : > { %v1138_v62 = vmul.f32 %v3733_v63, %v1074_v54  ;;  %v803_v21 = vpop.xlane.xlu1 %802  ;;  %v1139_v49 = vmul.f32 %v3733_v63, %v1075_v46 }
 0x1a3   : > { %v950_v5 = vsub.f32 %v886_v45, %v918_v2  ;;  %v887_v9 = vmul.f32 0.00390625, %v803_v21  ;;  %3738 = vrsqrt.f32 %v1013_v44 }
 0x1a4   : > { %v1210_v11 = vmul.f32 %v4630_v60, %v1138_v62  ;;  %v613_v15 = vpop.xlane.xlu0 %612  ;;  %v1211_v63 = vmul.f32 %v4633_v7, %v1139_v49 }
 0x1a5   : > { %v982_v19 = vmax.f32 %v950_v5, 0.0  ;;  %v951_v2 = vsub.f32 %v887_v9, %v919_v24  ;;  %v4668_v45 = vmul.f32 0.00390625, %v613_v15  ;;  %v3735_v58 = vpop.eup %3734 }
 0x1a6   : > { %v616_v14 = vpop.xlane.xlu1 %615  ;;  %v4674_v62 = vadd.f32 %v4636_v59, %v1210_v11  ;;  %v1140_v21 = vmul.f32 %v3735_v58, %v1076_v18  ;;  %v1141_v33 = vmul.f32 %v3735_v58, %v1077_v26  ;;  %v1283_v26 = vadd.f32 %v4641_v0, %v1211_v63 }
 0x1a7   : > { %v1014_v54 = vadd.f32 1e-05, %v982_v19  ;;  %v983_v4 = vmax.f32 %v951_v2, 0.0  ;;  %v4680_v15 = vmul.f32 0.00390625, %v616_v14  ;;  %v920_v44 = vmul.f32 %v4668_v45, %v4668_v45  ;;  %v6553_v2 = vld [vmem:[#allocation12_spill] sm:$0xff] }
 0x1a8   : > { %v806_v24 = vpop.xlane.xlu0 %805  ;;  %v1212_v49 = vmul.f32 %v4630_v60, %v1140_v21  ;;  %v1213_v46 = vmul.f32 %v4633_v7, %v1141_v33  ;;  %vm1346_vm2 = vcmp.ge.f32.partialorder %v4674_v62, 0.0  ;;  %vm1347_vm3 = vcmp.ge.f32.partialorder %v1283_v26, 0.0 }
 0x1a9   : > { %3740 = vrsqrt.f32 %v1014_v54  ;;  %v1015_v11 = vadd.f32 1e-05, %v983_v4  ;;  %v888_v18 = vmul.f32 0.00390625, %v806_v24  ;;  %v921_v14 = vmul.f32 %v4680_v15, %v4680_v15 }
 0x1aa   : > { %v809_v9 = vpop.xlane.xlu1 %808  ;;  %v1285_v4 = vadd.f32 %v4641_v0, %v1213_v46  ;;  %v1284_v21 = vadd.f32 %v4636_v59, %v1212_v49  ;;  %v1410_v24 = vmul.f32 0.01, %v4674_v62  ;;  %v6554_v46 = vld [vmem:[#allocation17_spill] sm:$0xff]  ;;  %v6557_v49 = vld [vmem:[#allocation20_spill] sm:$0xff] }
 0x1ab   : > { %3742 = vrsqrt.f32 %v1015_v11  ;;  %v952_v6 = vsub.f32 %v888_v18, %v920_v44  ;;  %v889_v58 = vmul.f32 0.00390625, %v809_v9  ;;  %v3737_v33 = vpop.eup %3736  ;;  %v1411_v9 = vmul.f32 0.01, %v1283_v26 }
 0x1ac   : > { %v619_v54 = vpop.xlane.xlu0 %618  ;;  %vm1349_vm4 = vcmp.ge.f32.partialorder %v1285_v4, 0.0  ;;  %v1413_v44 = vmul.f32 0.01, %v1285_v4  ;;  %vm1348_vm5 = vcmp.ge.f32.partialorder %v1284_v21, 0.0  ;;  %v1412_v17 = vmul.f32 0.01, %v1284_v21 }
 0x1ad   : > { %v984_v19 = vmax.f32 %v952_v6, 0.0  ;;  %v953_v5 = vsub.f32 %v889_v58, %v921_v14  ;;  %v4697_v3 = vmul.f32 0.00390625, %v619_v54  ;;  %v3739_v42 = vpop.eup %3738  ;;  %v1475_v54 = vsel %vm1347_vm3, %v1283_v26, %v1411_v9 }
 0x1ae   : > { %v622_v11 = vpop.xlane.xlu1 %621  ;;  %v1477_v35 = vsel %vm1349_vm4, %v1285_v4, %v1413_v44  ;;  %v1476_v9 = vsel %vm1348_vm5, %v1284_v21, %v1412_v17 }
 0x1af   : > { %v1016_v63 = vadd.f32 1e-05, %v984_v19  ;;  %v985_v18 = vmax.f32 %v953_v5, 0.0  ;;  %v4703_v6 = vmul.f32 0.00390625, %v622_v11  ;;  %v922_v14 = vmul.f32 %v4697_v3, %v4697_v3  ;;  %v6556_v5 = vld [vmem:[#allocation19_spill] sm:$0xff] }
 0x1b0   : > { %v812_v58 = vpop.xlane.xlu0 %811  ;;  %v1539_v19 = vpack.c.bf16 %v1477_v35, %v1475_v54  ;;  %v1474_v35 = vsel %vm1346_vm2, %v4674_v62, %v1410_v24 }
 0x1b1   : > { %3744 = vrsqrt.f32 %v1016_v63  ;;  %v1017_v20 = vadd.f32 1e-05, %v985_v18  ;;  %v890_v13 = vmul.f32 0.00390625, %v812_v58  ;;  %v923_v11 = vmul.f32 %v4703_v6, %v4703_v6 }
 0x1b2   : > { %v815_v29 = vpop.xlane.xlu1 %814  ;;  %1802 = vmatprep.mubr.bf16.mxu1 %v1539_v19  ;;  %v6558_v63 = vsub.f32 %v4209_v40, %v4617_v52  ;;  %v6559_v58 = vsub.f32 %v4220_v48, %v4619_v39  ;;  %v1538_v62 = vpack.c.bf16 %v1476_v9, %v1474_v35  ;;  %v6561_v48 = vsub.f32 %v4212_v43, %v4619_v39 }
 0x1b3   : > { %v4713_v10 = vpop.eup %3740  ;;  %3746 = vrsqrt.f32 %v1017_v20  ;;  %v954_v26 = vsub.f32 %v890_v13, %v922_v14  ;;  %v891_v4 = vmul.f32 0.00390625, %v815_v29  ;;  %v6560_v13 = vsub.f32 %v4203_v37, %v4617_v52 }
 0x1b4   : > { %v625_v44 = vpop.xlane.xlu0 %624  ;;  %v1143_v18 = vmul.f32 %v3737_v33, %v6558_v63  ;;  %v1145_v54 = vmul.f32 %v3739_v42, %v6559_v58  ;;  %v1144_v63 = vmul.f32 %v3739_v42, %v6561_v48  ;;  %1803 = vmatmul.mubr.bf16.vlgmr.msra.gmra.mrb[32].mxu1 %v1538_v62 }
 0x1b5   : > { %v1142_v20 = vmul.f32 %v3737_v33, %v6560_v13  ;;  %v4728_v29 = vpop.eup %3742  ;;  %v986_v14 = vmax.f32 %v954_v26, 0.0  ;;  %v955_v19 = vsub.f32 %v891_v4, %v923_v11  ;;  %v4730_v24 = vmul.f32 0.00390625, %v625_v44  ;;  %v6562_v33 = vld [vmem:[#allocation25_spill] sm:$0xff]  ;;  %v6563_v26 = vld [vmem:[#allocation26_spill] sm:$0xff]  ;;  %v6564_v13 = vld [vmem:[#allocation27_spill] sm:$0xff] }
 0x1b6   : > { %v628_v17 = vpop.xlane.xlu1 %627  ;;  %v1215_v21 = vmul.f32 %v4633_v7, %v1143_v18  ;;  %v1217_v40 = vmul.f32 %v4633_v7, %v1145_v54  ;;  %v1216_v54 = vmul.f32 %v4630_v60, %v1144_v63 }
 0x1b7   : > { %v1214_v58 = vmul.f32 %v4630_v60, %v1142_v20  ;;  %v1018_v37 = vadd.f32 1e-05, %v986_v14  ;;  %v987_v52 = vmax.f32 %v955_v19, 0.0  ;;  %v4742_v35 = vmul.f32 0.00390625, %v628_v17  ;;  %v6565_v14 = vld [vmem:[#allocation28_spill] sm:$0xff] }
 0x1b8   : > { %v924_v9 = vmul.f32 %v4730_v24, %v4730_v24  ;;  %v818_v44 = vpop.xlane.xlu0 %817  ;;  %v1287_v43 = vadd.f32 %v4641_v0, %v1215_v21  ;;  %v1289_v42 = vadd.f32 %v4641_v0, %v1217_v40 }
 0x1b9   : > { %3748 = vrsqrt.f32 %v1018_v37  ;;  %v1019_v39 = vadd.f32 1e-05, %v987_v52  ;;  %v892_v18 = vmul.f32 0.00390625, %v818_v44  ;;  %v925_v37 = vmul.f32 %v4742_v35, %v4742_v35 }
 0x1ba   : > { %vm1351_vm6 = vcmp.ge.f32.partialorder %v1287_v43, 0.0  ;;  %vm1353_vm7 = vcmp.ge.f32.partialorder %v1289_v42, 0.0  ;;  %v821_v62 = vpop.xlane.xlu1 %820  ;;  %v1415_v48 = vmul.f32 0.01, %v1287_v43  ;;  %v1417_v40 = vmul.f32 0.01, %v1289_v42 }
 0x1bb   : > { %v4753_v17 = vpop.eup %3744  ;;  %3750 = vrsqrt.f32 %v1019_v39  ;;  %v956_v21 = vsub.f32 %v892_v18, %v924_v9  ;;  %v893_v52 = vmul.f32 0.00390625, %v821_v62  ;;  %v1286_v63 = vadd.f32 %v4636_v59, %v1214_v58 }
 0x1bc   : > { %v1288_v44 = vadd.f32 %v4636_v59, %v1216_v54  ;;  %v631_v20 = vpop.xlane.xlu0 %630  ;;  %v1479_v4 = vsel %vm1351_vm6, %v1287_v43, %v1415_v48  ;;  %v1481_v32 = vsel %vm1353_vm7, %v1289_v42, %v1417_v40  ;;  %v6571_v58 = vsub.f32 %v4251_v12, %v4627_v36 }
 0x1bd   : > { %v4759_v11 = vpop.eup %3746  ;;  %v988_v19 = vmax.f32 %v956_v21, 0.0  ;;  %v4761_v28 = vmul.f32 0.00390625, %v631_v20  ;;  %v1541_v39 = vpack.c.bf16 %v1481_v32, %v1479_v4  ;;  %v957_v9 = vsub.f32 %v893_v52, %v925_v37 }
 0x1be   : > { %vm1350_vm8 = vcmp.ge.f32.partialorder %v1286_v63, 0.0  ;;  %vm1352_vm9 = vcmp.ge.f32.partialorder %v1288_v44, 0.0  ;;  %v634_v18 = vpop.xlane.xlu1 %633  ;;  %v1414_v38 = vmul.f32 0.01, %v1286_v63  ;;  %v1416_v62 = vmul.f32 0.01, %v1288_v44 }
 0x1bf   : > { %v1020_v41 = vadd.f32 1e-05, %v988_v19  ;;  %1812 = vmatprep.mubr.bf16.mxu1 %v1541_v39  ;;  %v989_v54 = vmax.f32 %v957_v9, 0.0  ;;  %v4767_v43 = vmul.f32 0.00390625, %v634_v18  ;;  %v926_v32 = vmul.f32 %v4761_v28, %v4761_v28  ;;  %v6570_v39 = vld [vmem:[#allocation36_spill] sm:$0xff] }
 0x1c0   : > { %v824_v4 = vpop.xlane.xlu0 %823  ;;  %v1478_v42 = vsel %vm1350_vm8, %v1286_v63, %v1414_v38  ;;  %v1480_v20 = vsel %vm1352_vm9, %v1288_v44, %v1416_v62  ;;  %v6572_v38 = vsub.f32 %v4262_v23, %v4647_v56  ;;  %v6574_v12 = vsub.f32 %v4254_v16, %v4647_v56 }
 0x1c1   : > { %6568 = vst [vmem:[#allocation12_spill] sm:$0xff] %v4767_v43  ;;  %3752 = vrsqrt.f32 %v1020_v41  ;;  %v894_v19 = vmul.f32 0.00390625, %v824_v4  ;;  %v1021_v48 = vadd.f32 1e-05, %v989_v54  ;;  %v1540_v40 = vpack.c.bf16 %v1480_v20, %v1478_v42 }
 0x1c2   : > { %v827_v30 = vpop.xlane.xlu1 %826  ;;  %v1147_v41 = vmul.f32 %v4713_v10, %v6571_v58  ;;  %v1149_v63 = vmul.f32 %v4728_v29, %v6572_v38  ;;  %v927_v44 = vmul.f32 %v4767_v43, %v4767_v43  ;;  %v6573_v54 = vsub.f32 %v4248_v8, %v4627_v36 }
 0x1c3   : > { %v4775_v21 = vpop.eup %3748  ;;  %v958_v18 = vsub.f32 %v894_v19, %v926_v32  ;;  %3754 = vrsqrt.f32 %v1021_v48  ;;  %1813 = vmatmul.mubr.bf16.gmra.mrb[36].mxu1 %v1540_v40  ;;  %v895_v62 = vmul.f32 0.00390625, %v827_v30  ;;  %v1148_v58 = vmul.f32 %v4728_v29, %v6574_v12 }
 0x1c4   : > { %v1146_v32 = vmul.f32 %v4713_v10, %v6573_v54  ;;  %v637_v4 = vpop.xlane.xlu0 %636  ;;  %v1219_v20 = vmul.f32 %v4633_v7, %v1147_v41  ;;  %v1221_v19 = vmul.f32 %v4633_v7, %v1149_v63  ;;  %v6575_v16 = vsub.f32 %v4299_v50, %v4668_v45  ;;  %v6578_v41 = vld [vmem:[#allocation43_spill] sm:$0xff] }
 0x1c5   : > { %v4795_v23 = vpop.eup %3750  ;;  %v990_v42 = vmax.f32 %v958_v18, 0.0  ;;  %v4799_v48 = vmul.f32 0.00390625, %v637_v4  ;;  %v959_v30 = vsub.f32 %v895_v62, %v927_v44  ;;  %v1220_v10 = vmul.f32 %v4630_v60, %v1148_v58 }
 0x1c6   : > { %v1218_v8 = vmul.f32 %v4630_v60, %v1146_v32  ;;  %v640_v36 = vpop.xlane.xlu1 %639  ;;  %v1151_v56 = vmul.f32 %v4753_v17, %v6575_v16  ;;  %v1291_v40 = vadd.f32 %v4641_v0, %v1219_v20  ;;  %v1293_v18 = vadd.f32 %v4641_v0, %v1221_v19 }
 0x1c7   : > { %v1022_v29 = vadd.f32 1e-05, %v990_v42  ;;  %v991_v63 = vmax.f32 %v959_v30, 0.0  ;;  %v1292_v62 = vadd.f32 %v4636_v59, %v1220_v10  ;;  %v4817_v16 = vmul.f32 0.00390625, %v640_v36 }
 0x1c8   : > { %v1290_v44 = vadd.f32 %v4636_v59, %v1218_v8  ;;  %v830_v12 = vpop.xlane.xlu0 %829  ;;  %vm1355_vm10 = vcmp.ge.f32.partialorder %v1291_v40, 0.0  ;;  %vm1357_vm11 = vcmp.ge.f32.partialorder %v1293_v18, 0.0  ;;  %v1419_v50 = vmul.f32 0.01, %v1291_v40 }
 0x1c9   : > { %3756 = vrsqrt.f32 %v1022_v29  ;;  %v1421_v58 = vmul.f32 0.01, %v1293_v18  ;;  %v1023_v4 = vadd.f32 1e-05, %v991_v63  ;;  %vm1356_vm13 = vcmp.ge.f32.partialorder %v1292_v62, 0.0 }
 0x1ca   : > { %vm1354_vm12 = vcmp.ge.f32.partialorder %v1290_v44, 0.0  ;;  %v833_v42 = vpop.xlane.xlu1 %832  ;;  %v1483_v19 = vsel %vm1355_vm10, %v1291_v40, %v1419_v50  ;;  %v1418_v30 = vmul.f32 0.01, %v1290_v44  ;;  %v1420_v8 = vmul.f32 0.01, %v1292_v62  ;;  %v6579_v50 = vld [vmem:[#allocation44_spill] sm:$0xff] }
 0x1cb   : > { %v4815_v20 = vpop.eup %3752  ;;  %v1485_v10 = vsel %vm1357_vm11, %v1293_v18, %v1421_v58  ;;  %3758 = vrsqrt.f32 %v1023_v4  ;;  %v928_v29 = vmul.f32 %v4799_v48, %v4799_v48  ;;  %v896_v38 = vmul.f32 0.00390625, %v830_v12 }
 0x1cc   : > { %v643_v32 = vpop.xlane.xlu0 %642  ;;  %v1543_v52 = vpack.c.bf16 %v1485_v10, %v1483_v19  ;;  %v1482_v9 = vsel %vm1354_vm12, %v1290_v44, %v1418_v30  ;;  %v1484_v63 = vsel %vm1356_vm13, %v1292_v62, %v1420_v8  ;;  %v1104_v54 = vsub.f32 %v6578_v41, %v4817_v16 }
 0x1cd   : > { %v4823_v37 = vpop.eup %3754  ;;  %v1542_v40 = vpack.c.bf16 %v1484_v63, %v1482_v9  ;;  %v1105_v36 = vsub.f32 %v6579_v50, %v4817_v16  ;;  %v960_v43 = vsub.f32 %v896_v38, %v928_v29  ;;  %v6580_v18 = vsub.f32 %v6553_v2, %v4680_v15 }
 0x1ce   : > { %v646_v12 = vpop.xlane.xlu1 %645  ;;  %1822 = vmatprep.mubr.bf16.mxu1 %v1543_v52  ;;  %v1223_v44 = vmul.f32 %v4633_v7, %v1151_v56  ;;  %v929_v62 = vmul.f32 %v4817_v16, %v4817_v16  ;;  %v897_v4 = vmul.f32 0.00390625, %v833_v42  ;;  %v6581_v9 = vsub.f32 %v4296_v47, %v4668_v45  ;;  %v6610_v16 = vld [vmem:[#allocation21_spill] sm:$0xff] }
 0x1cf   : > { %v1153_v58 = vmul.f32 %v4759_v11, %v6580_v18  ;;  %1823 = vmatmul.mubr.bf16.gmra.mrb[40].mxu1 %v1542_v40  ;;  %v992_v38 = vmax.f32 %v960_v43, 0.0  ;;  %v6582_v2 = vsub.f32 %v4302_v55, %v4680_v15  ;;  %v4843_v8 = vmul.f32 0.00390625, %v643_v32 }
 0x1d0   : > { %v1150_v19 = vmul.f32 %v4753_v17, %v6581_v9  ;;  %v836_v56 = vpop.xlane.xlu0 %835  ;;  %v1295_v10 = vadd.f32 %v4641_v0, %v1223_v44  ;;  %v961_v42 = vsub.f32 %v897_v4, %v929_v62  ;;  %v4847_v47 = vmul.f32 0.00390625, %v646_v12 }
 0x1d1   : > { %v1225_v30 = vmul.f32 %v4633_v7, %v1153_v58  ;;  %v1152_v52 = vmul.f32 %v4759_v11, %v6582_v2  ;;  %v1024_v45 = vadd.f32 1e-05, %v992_v38 }
 0x1d2   : > { %v1222_v29 = vmul.f32 %v4630_v60, %v1150_v19  ;;  %v839_v15 = vpop.xlane.xlu1 %838  ;;  %vm1359_vm14 = vcmp.ge.f32.partialorder %v1295_v10, 0.0  ;;  %v1423_v32 = vmul.f32 0.01, %v1295_v10  ;;  %v993_v63 = vmax.f32 %v961_v42, 0.0 }
 0x1d3   : > { %v1297_v17 = vadd.f32 %v4641_v0, %v1225_v30  ;;  %v1224_v43 = vmul.f32 %v4630_v60, %v1152_v52  ;;  %v4853_v11 = vpop.eup %3756  ;;  %3760 = vrsqrt.f32 %v1024_v45  ;;  %v1107_v30 = vsub.f32 %v4182_v25, %v4843_v8 }
 0x1d4   : > { %v1294_v40 = vadd.f32 %v4636_v59, %v1222_v29  ;;  %v649_v12 = vpop.xlane.xlu0 %648  ;;  %v1487_v44 = vsel %vm1359_vm14, %v1295_v10, %v1423_v32  ;;  %v1025_v62 = vadd.f32 1e-05, %v993_v63  ;;  %v6616_v25 = vsub.f32 %v4192_v31, %v4847_v47 }
 0x1d5   : > { %vm1361_vm15 = vcmp.ge.f32.partialorder %v1297_v17, 0.0  ;;  %v1425_v18 = vmul.f32 0.01, %v1297_v17  ;;  %v1296_v58 = vadd.f32 %v4636_v59, %v1224_v43  ;;  %v4857_v9 = vpop.eup %3758  ;;  %v930_v43 = vmul.f32 %v4843_v8, %v4843_v8 }
 0x1d6   : > { %vm1358_vm0 = vcmp.ge.f32.partialorder %v1294_v40, 0.0  ;;  %v1422_v4 = vmul.f32 0.01, %v1294_v40  ;;  %v652_v2 = vpop.xlane.xlu1 %651  ;;  %3762 = vrsqrt.f32 %v1025_v62  ;;  %v931_v62 = vmul.f32 %v4847_v47, %v4847_v47 }
 0x1d7   : > { %v1489_v19 = vsel %vm1361_vm15, %v1297_v17, %v1425_v18  ;;  %vm1360_vm1 = vcmp.ge.f32.partialorder %v1296_v58, 0.0  ;;  %v1424_v38 = vmul.f32 0.01, %v1296_v58  ;;  %v898_v17 = vmul.f32 0.00390625, %v836_v56 }
 0x1d8   : > { %v1545_v52 = vpack.c.bf16 %v1489_v19, %v1487_v44  ;;  %v1486_v42 = vsel %vm1358_vm0, %v1294_v40, %v1422_v4  ;;  %v842_v32 = vpop.xlane.xlu0 %841  ;;  %v6583_v18 = vsub.f32 %v6555_v57, %v4697_v3  ;;  %v6584_v40 = vsub.f32 %v6557_v49, %v4703_v6 }
 0x1d9   : > { %v1488_v45 = vsel %vm1360_vm1, %v1296_v58, %v1424_v38  ;;  %v962_v4 = vsub.f32 %v898_v17, %v930_v43  ;;  %v899_v19 = vmul.f32 0.00390625, %v839_v15  ;;  %v6585_v56 = vsub.f32 %v6554_v46, %v4697_v3 }
 0x1da   : > { %1832 = vmatprep.mubr.bf16.mxu1 %v1545_v52  ;;  %v1544_v63 = vpack.c.bf16 %v1488_v45, %v1486_v42  ;;  %v1155_v44 = vmul.f32 %v4775_v21, %v6583_v18  ;;  %v1157_v58 = vmul.f32 %v4795_v23, %v6584_v40  ;;  %v6586_v57 = vsub.f32 %v6556_v5, %v4703_v6  ;;  %v845_v42 = vpop.xlane.xlu1 %844 }
 0x1db   : > { %v1154_v38 = vmul.f32 %v4775_v21, %v6585_v56  ;;  %v4887_v18 = vmul.f32 0.00390625, %v649_v12  ;;  %v4889_v43 = vmul.f32 0.00390625, %v652_v2  ;;  %v994_v15 = vmax.f32 %v962_v4, 0.0 }
 0x1dc   : > { %v1156_v52 = vmul.f32 %v4795_v23, %v6586_v57  ;;  %1833 = vmatmul.mubr.bf16.gmra.mrb[44].mxu1 %v1544_v63  ;;  %v1227_v49 = vmul.f32 %v4633_v7, %v1155_v44  ;;  %v1229_v45 = vmul.f32 %v4633_v7, %v1157_v58  ;;  %v963_v17 = vsub.f32 %v899_v19, %v931_v62  ;;  %v655_v58 = vpop.xlane.xlu0 %654 }
 0x1dd   : > { %v1226_v3 = vmul.f32 %v4630_v60, %v1154_v38  ;;  %v4899_v12 = vpop.eup %3760  ;;  %v1026_v2 = vadd.f32 1e-05, %v994_v15 }
 0x1de   : > { %v1228_v46 = vmul.f32 %v4630_v60, %v1156_v52  ;;  %v1299_v6 = vadd.f32 %v4641_v0, %v1227_v49  ;;  %v1301_v5 = vadd.f32 %v4641_v0, %v1229_v45  ;;  %v995_v63 = vmax.f32 %v963_v17, 0.0  ;;  %v658_v62 = vpop.xlane.xlu1 %657 }
 0x1df   : > { %v1298_v44 = vadd.f32 %v4636_v59, %v1226_v3  ;;  %3764 = vrsqrt.f32 %v1026_v2  ;;  %v932_v2 = vmul.f32 %v4887_v18, %v4887_v18 }
 0x1e0   : > { %v1300_v40 = vadd.f32 %v4636_v59, %v1228_v46  ;;  %vm1363_vm2 = vcmp.ge.f32.partialorder %v1299_v6, 0.0  ;;  %vm1365_vm3 = vcmp.ge.f32.partialorder %v1301_v5, 0.0  ;;  %v1427_v4 = vmul.f32 0.01, %v1299_v6  ;;  %v4903_v38 = vpop.eup %3762 }
 0x1e1   : > { %v1429_v19 = vmul.f32 0.01, %v1301_v5  ;;  %v1027_v56 = vadd.f32 1e-05, %v995_v63  ;;  %vm1362_vm4 = vcmp.ge.f32.partialorder %v1298_v44, 0.0  ;;  %v900_v63 = vmul.f32 0.00390625, %v842_v32 }
 0x1e2   : > { %vm1364_vm5 = vcmp.ge.f32.partialorder %v1300_v40, 0.0  ;;  %v1491_v57 = vsel %vm1363_vm2, %v1299_v6, %v1427_v4  ;;  %v1426_v49 = vmul.f32 0.01, %v1298_v44  ;;  %v1428_v45 = vmul.f32 0.01, %v1300_v40 }
 0x1e3   : > { %v1493_v52 = vsel %vm1365_vm3, %v1301_v5, %v1429_v19  ;;  %3766 = vrsqrt.f32 %v1027_v56  ;;  %v6587_v6 = vsub.f32 %v6563_v26, %v4730_v24  ;;  %v6588_v4 = vsub.f32 %v6565_v14, %v4742_v35  ;;  %v851_v56 = vpop.xlane.xlu1 %850 }
 0x1e4   : > { %v1547_v15 = vpack.c.bf16 %v1493_v52, %v1491_v57  ;;  %v1490_v46 = vsel %vm1362_vm4, %v1298_v44, %v1426_v49  ;;  %v1492_v21 = vsel %vm1364_vm5, %v1300_v40, %v1428_v45  ;;  %v933_v44 = vmul.f32 %v4889_v43, %v4889_v43  ;;  %v848_v40 = vpop.xlane.xlu0 %847 }
 0x1e5   : > { %v1546_v23 = vpack.c.bf16 %v1492_v21, %v1490_v46  ;;  %v1159_v5 = vmul.f32 %v4815_v20, %v6587_v6  ;;  %v1161_v19 = vmul.f32 %v4823_v37, %v6588_v4  ;;  %v964_v57 = vsub.f32 %v900_v63, %v932_v2 }
 0x1e6   : > { %1842 = vmatprep.mubr.bf16.mxu1 %v1547_v15  ;;  %v901_v52 = vmul.f32 0.00390625, %v845_v42  ;;  %v6589_v32 = vsub.f32 %v6562_v33, %v4730_v24  ;;  %v6590_v26 = vsub.f32 %v6564_v13, %v4742_v35  ;;  %v4931_v15 = vmul.f32 0.00390625, %v655_v58  ;;  %v6591_v13 = vld [vmem:[#allocation8_spill] sm:$0xff] }
 0x1e7   : > { %1843 = vmatmul.mubr.bf16.gmra.mrb[48].mxu1 %v1546_v23  ;;  %v1231_v14 = vmul.f32 %v4633_v7, %v1159_v5  ;;  %v1233_v45 = vmul.f32 %v4633_v7, %v1161_v19  ;;  %v4933_v46 = vmul.f32 0.00390625, %v658_v62  ;;  %v996_v42 = vmax.f32 %v964_v57, 0.0  ;;  %v6592_v23 = vld [vmem:[#allocation9_spill] sm:$0xff] }
 0x1e8   : > { %v1158_v21 = vmul.f32 %v4815_v20, %v6589_v32  ;;  %v1160_v49 = vmul.f32 %v4823_v37, %v6590_v26  ;;  %v965_v2 = vsub.f32 %v901_v52, %v933_v44  ;;  %v661_v57 = vpop.xlane.xlu0 %660  ;;  %v664_v52 = vpop.xlane.xlu1 %663 }
 0x1e9   : > { %v1303_v20 = vadd.f32 %v4641_v0, %v1231_v14  ;;  %v1305_v35 = vadd.f32 %v4641_v0, %v1233_v45  ;;  %v1028_v58 = vadd.f32 1e-05, %v996_v42  ;;  %v4945_v4 = vpop.eup %3764 }
 0x1ea   : > { %v1230_v24 = vmul.f32 %v4630_v60, %v1158_v21  ;;  %v1232_v33 = vmul.f32 %v4630_v60, %v1160_v49  ;;  %v997_v6 = vmax.f32 %v965_v2, 0.0  ;;  %v6593_v2 = vld [vmem:[#allocation10_spill] sm:$0xff] }
 0x1eb   : > { %vm1367_vm6 = vcmp.ge.f32.partialorder %v1303_v20, 0.0  ;;  %vm1369_vm7 = vcmp.ge.f32.partialorder %v1305_v35, 0.0  ;;  %v1431_v19 = vmul.f32 0.01, %v1303_v20  ;;  %v1433_v44 = vmul.f32 0.01, %v1305_v35 }
 0x1ec   : > { %v1302_v62 = vadd.f32 %v4636_v59, %v1230_v24  ;;  %v1304_v5 = vadd.f32 %v4636_v59, %v1232_v33  ;;  %3768 = vrsqrt.f32 %v1028_v58  ;;  %v1029_v32 = vadd.f32 1e-05, %v997_v6  ;;  %v6594_v33 = vld [vmem:[#allocation11_spill] sm:$0xff]  ;;  %v6605_v24 = vld [vmem:[#allocation16_spill] sm:$0xff] }
 0x1ed   : > { %v4947_v21 = vpop.eup %3766  ;;  %v1495_v26 = vsel %vm1367_vm6, %v1303_v20, %v1431_v19  ;;  %v1497_v49 = vsel %vm1369_vm7, %v1305_v35, %v1433_v44  ;;  %v934_v58 = vmul.f32 %v4931_v15, %v4931_v15  ;;  %v902_v6 = vmul.f32 0.00390625, %v848_v40  ;;  %v6596_v19 = vld [vmem:[#allocation12_spill] sm:$0xff] }
 0x1ee   : > { %vm1366_vm8 = vcmp.ge.f32.partialorder %v1302_v62, 0.0  ;;  %vm1368_vm9 = vcmp.ge.f32.partialorder %v1304_v5, 0.0  ;;  %v1430_v14 = vmul.f32 0.01, %v1302_v62  ;;  %v1432_v45 = vmul.f32 0.01, %v1304_v5 }
 0x1ef   : > { %v1549_v42 = vpack.c.bf16 %v1497_v49, %v1495_v26  ;;  %3770 = vrsqrt.f32 %v1029_v32  ;;  %v6595_v20 = vsub.f32 %v6567_v27, %v4761_v28  ;;  %v6597_v44 = vsub.f32 %v6570_v39, %v6596_v19  ;;  %v6598_v49 = vld [vmem:[#allocation33_spill] sm:$0xff] }
 0x1f0   : > { %v1494_v63 = vsel %vm1366_vm8, %v1302_v62, %v1430_v14  ;;  %v1496_v17 = vsel %vm1368_vm9, %v1304_v5, %v1432_v45  ;;  %v935_v62 = vmul.f32 %v4933_v46, %v4933_v46  ;;  %v966_v5 = vsub.f32 %v902_v6, %v934_v58  ;;  %v854_v45 = vpop.xlane.xlu0 %853 }
 0x1f1   : > { %1852 = vmatprep.mubr.bf16.mxu1 %v1549_v42  ;;  %v1548_v3 = vpack.c.bf16 %v1496_v17, %v1494_v63  ;;  %v1163_v35 = vmul.f32 %v4853_v11, %v6595_v20  ;;  %v1165_v32 = vmul.f32 %v4857_v9, %v6597_v44  ;;  %v903_v26 = vmul.f32 0.00390625, %v851_v56  ;;  %v6600_v63 = vld [vmem:[#allocation35_spill] sm:$0xff]  ;;  %v857_v42 = vpop.xlane.xlu1 %856 }
 0x1f2   : > { %v6599_v40 = vsub.f32 %v6598_v49, %v4761_v28  ;;  %v6601_v27 = vsub.f32 %v6600_v63, %v6596_v19  ;;  %v4975_v44 = vmul.f32 0.00390625, %v661_v57  ;;  %v4977_v56 = vmul.f32 0.00390625, %v664_v52 }
 0x1f3   : > { %1853 = vmatmul.mubr.bf16.gmra.mrb[52].mxu1 %v1548_v3  ;;  %v1235_v39 = vmul.f32 %v4633_v7, %v1163_v35  ;;  %v1237_v20 = vmul.f32 %v4633_v7, %v1165_v32  ;;  %v998_v58 = vmax.f32 %v966_v5, 0.0  ;;  %v967_v28 = vsub.f32 %v903_v26, %v935_v62  ;;  %v6602_v3 = vld [vmem:[#allocation13_spill] sm:$0xff]  ;;  %v6603_v35 = vld [vmem:[#allocation14_spill] sm:$0xff] }
 0x1f4   : > { %v1162_v17 = vmul.f32 %v4853_v11, %v6599_v40  ;;  %v1164_v14 = vmul.f32 %v4857_v9, %v6601_v27  ;;  %v667_v27 = vpop.xlane.xlu0 %666  ;;  %v1121_v37 = vsub.f32 %v6605_v24, %v4977_v56  ;;  %v936_v29 = vmul.f32 %v4975_v44, %v4975_v44 }
 0x1f5   : > { %v1307_v19 = vadd.f32 %v4641_v0, %v1235_v39  ;;  %v1309_v9 = vadd.f32 %v4641_v0, %v1237_v20  ;;  %v1030_v57 = vadd.f32 1e-05, %v998_v58  ;;  %v999_v40 = vmax.f32 %v967_v28, 0.0 }
 0x1f6   : > { %v1234_v11 = vmul.f32 %v4630_v60, %v1162_v17  ;;  %v1236_v6 = vmul.f32 %v4630_v60, %v1164_v14  ;;  %v4989_v5 = vpop.eup %3768  ;;  %v670_v14 = vpop.xlane.xlu1 %669  ;;  %v904_v55 = vmul.f32 0.00390625, %v854_v45 }
 0x1f7   : > { %vm1371_vm10 = vcmp.ge.f32.partialorder %v1307_v19, 0.0  ;;  %vm1373_vm11 = vcmp.ge.f32.partialorder %v1309_v9, 0.0  ;;  %v1435_v26 = vmul.f32 0.01, %v1307_v19  ;;  %v1437_v17 = vmul.f32 0.01, %v1309_v9 }
 0x1f8   : > { %v1306_v52 = vadd.f32 %v4636_v59, %v1234_v11  ;;  %v1308_v62 = vadd.f32 %v4636_v59, %v1236_v6  ;;  %3772 = vrsqrt.f32 %v1030_v57  ;;  %v1031_v63 = vadd.f32 1e-05, %v999_v40  ;;  %v6604_v6 = vld [vmem:[#allocation15_spill] sm:$0xff] }
 0x1f9   : > { %v4991_v39 = vpop.eup %3770  ;;  %v1499_v20 = vsel %vm1371_vm10, %v1307_v19, %v1435_v26  ;;  %v1501_v58 = vsel %vm1373_vm11, %v1309_v9, %v1437_v17  ;;  %v6606_v19 = vld [vmem:[#allocation42_spill] sm:$0xff]  ;;  %v1169_v17 = vmul.f32 %v4903_v38, %v1105_v36 }
 0x1fa   : > { %vm1370_vm12 = vcmp.ge.f32.partialorder %v1306_v52, 0.0  ;;  %vm1372_vm13 = vcmp.ge.f32.partialorder %v1308_v62, 0.0  ;;  %v1434_v28 = vmul.f32 0.01, %v1306_v52  ;;  %v1436_v11 = vmul.f32 0.01, %v1308_v62 }
 0x1fb   : > { %v1551_v49 = vpack.c.bf16 %v1501_v58, %v1499_v20  ;;  %3774 = vrsqrt.f32 %v1031_v63  ;;  %v6607_v9 = vsub.f32 %v6606_v19, %v4799_v48  ;;  %v905_v63 = vmul.f32 0.00390625, %v857_v42  ;;  %v6608_v20 = vld [vmem:[#allocation41_spill] sm:$0xff] }
 0x1fc   : > { %v1498_v57 = vsel %vm1370_vm12, %v1306_v52, %v1434_v28  ;;  %v1500_v40 = vsel %vm1372_vm13, %v1308_v62, %v1436_v11  ;;  %v937_v52 = vmul.f32 %v4977_v56, %v4977_v56  ;;  %v968_v62 = vsub.f32 %v904_v55, %v936_v29  ;;  %v860_v55 = vpop.xlane.xlu0 %859  ;;  %v863_v29 = vpop.xlane.xlu1 %862 }
 0x1fd   : > { %1862 = vmatprep.mubr.bf16.mxu1 %v1551_v49  ;;  %v1550_v10 = vpack.c.bf16 %v1500_v40, %v1498_v57  ;;  %v1167_v26 = vmul.f32 %v4899_v12, %v6607_v9  ;;  %v6609_v45 = vsub.f32 %v6608_v20, %v4799_v48  ;;  %v1168_v58 = vmul.f32 %v4903_v38, %v1104_v54  ;;  %v6611_v38 = vld [vmem:[#allocation22_spill] sm:$0xff] }
 0x1fe   : > { %v1241_v36 = vmul.f32 %v4633_v7, %v1169_v17  ;;  %v5019_v28 = vmul.f32 0.00390625, %v667_v27  ;;  %v5021_v11 = vmul.f32 0.00390625, %v670_v14  ;;  %v1000_v42 = vmax.f32 %v968_v62, 0.0 }
 0x1ff   : > { %v1166_v49 = vmul.f32 %v4899_v12, %v6609_v45  ;;  %1863 = vmatmul.mubr.bf16.gmra.mrb[56].mxu1 %v1550_v10  ;;  %v1239_v50 = vmul.f32 %v4633_v7, %v1167_v26  ;;  %v969_v48 = vsub.f32 %v905_v63, %v937_v52  ;;  %v1240_v57 = vmul.f32 %v4630_v60, %v1168_v58 }
 0x200   : > { %v1313_v54 = vadd.f32 %v4641_v0, %v1241_v36  ;;  %v1032_v14 = vadd.f32 1e-05, %v1000_v42  ;;  %v676_v36 = vpop.xlane.xlu1 %675  ;;  %v938_v27 = vmul.f32 %v5019_v28, %v5019_v28  ;;  %v906_v32 = vmul.f32 0.00390625, %v860_v55 }
 0x201   : > { %v1238_v12 = vmul.f32 %v4630_v60, %v1166_v49  ;;  %v1311_v41 = vadd.f32 %v4641_v0, %v1239_v50  ;;  %v1001_v40 = vmax.f32 %v969_v48, 0.0  ;;  %v1312_v9 = vadd.f32 %v4636_v59, %v1240_v57  ;;  %v673_v50 = vpop.xlane.xlu0 %672  ;;  %v6612_v48 = vld [vmem:[#allocation23_spill] sm:$0xff]  ;;  %v6613_v57 = vld [vmem:[#allocation24_spill] sm:$0xff] }
 0x202   : > { %v5033_v26 = vpop.eup %3772  ;;  %vm1377_vm15 = vcmp.ge.f32.partialorder %v1313_v54, 0.0  ;;  %v1441_v52 = vmul.f32 0.01, %v1313_v54  ;;  %3776 = vrsqrt.f32 %v1032_v14  ;;  %v1125_v10 = vsub.f32 %v6613_v57, %v5021_v11 }
 0x203   : > { %v1310_v19 = vadd.f32 %v4636_v59, %v1238_v12  ;;  %vm1375_vm14 = vcmp.ge.f32.partialorder %v1311_v41, 0.0  ;;  %v1439_v17 = vmul.f32 0.01, %v1311_v41  ;;  %v1033_v62 = vadd.f32 1e-05, %v1001_v40 }
 0x204   : > { %vm1376_vm1 = vcmp.ge.f32.partialorder %v1312_v9, 0.0  ;;  %v1505_v45 = vsel %vm1377_vm15, %v1313_v54, %v1441_v52  ;;  %v1440_v58 = vmul.f32 0.01, %v1312_v9  ;;  %v1171_v54 = vmul.f32 %v4945_v4, %v1107_v30 }
 0x205   : > { %vm1374_vm0 = vcmp.ge.f32.partialorder %v1310_v19, 0.0  ;;  %v5035_v63 = vpop.eup %3774  ;;  %v1503_v20 = vsel %vm1375_vm14, %v1311_v41, %v1439_v17  ;;  %v1438_v49 = vmul.f32 0.01, %v1310_v19  ;;  %3778 = vrsqrt.f32 %v1033_v62 }
 0x206   : > { %v1553_v42 = vpack.c.bf16 %v1505_v45, %v1503_v20  ;;  %v1504_v40 = vsel %vm1376_vm1, %v1312_v9, %v1440_v58  ;;  %v6614_v17 = vsub.f32 %v4198_v34, %v4847_v47  ;;  %v970_v9 = vsub.f32 %v906_v32, %v938_v27  ;;  %v869_v27 = vpop.xlane.xlu1 %868 }
 0x207   : > { %v1502_v14 = vsel %vm1374_vm0, %v1310_v19, %v1438_v49  ;;  %v939_v19 = vmul.f32 %v5021_v11, %v5021_v11  ;;  %v907_v62 = vmul.f32 0.00390625, %v863_v29  ;;  %v6615_v55 = vsub.f32 %v4176_v22, %v4843_v8 }
 0x208   : > { %1872 = vmatprep.mubr.bf16.mxu1 %v1553_v42  ;;  %v1552_v41 = vpack.c.bf16 %v1504_v40, %v1502_v14  ;;  %v1173_v52 = vmul.f32 %v4947_v21, %v6614_v17  ;;  %v1172_v30 = vmul.f32 %v4947_v21, %v6616_v25  ;;  %v1243_v34 = vmul.f32 %v4633_v7, %v1171_v54  ;;  %v6617_v21 = vld [vmem:[#allocation29_spill] sm:$0xff] }
 0x209   : > { %v1170_v20 = vmul.f32 %v4945_v4, %v6615_v55  ;;  %v5063_v49 = vmul.f32 0.00390625, %v673_v50  ;;  %v5065_v58 = vmul.f32 0.00390625, %v676_v36  ;;  %v1002_v32 = vmax.f32 %v970_v9, 0.0  ;;  %v866_v4 = vpop.xlane.xlu0 %865  ;;  %v6618_v50 = vld [vmem:[#allocation30_spill] sm:$0xff] }
 0x20a   : > { %1873 = vmatmul.mubr.bf16.gmra.mrb[60].mxu1 %v1552_v41  ;;  %v1245_v45 = vmul.f32 %v4633_v7, %v1173_v52  ;;  %v971_v29 = vsub.f32 %v907_v62, %v939_v19  ;;  %v1244_v8 = vmul.f32 %v4630_v60, %v1172_v30  ;;  %v1315_v31 = vadd.f32 %v4641_v0, %v1243_v34  ;;  %v682_v42 = vpop.xlane.xlu1 %681 }
 0x20b   : > { %v1242_v22 = vmul.f32 %v4630_v60, %v1170_v20  ;;  %v1034_v36 = vadd.f32 1e-05, %v1002_v32  ;;  %v940_v14 = vmul.f32 %v5063_v49, %v5063_v49  ;;  %v908_v12 = vmul.f32 0.00390625, %v866_v4 }
 0x20c   : > { %v1317_v47 = vadd.f32 %v4641_v0, %v1245_v45  ;;  %v1003_v40 = vmax.f32 %v971_v29, 0.0  ;;  %v1316_v54 = vadd.f32 %v4636_v59, %v1244_v8  ;;  %v5077_v17 = vpop.eup %3776  ;;  %vm1379_vm2 = vcmp.ge.f32.partialorder %v1315_v31, 0.0  ;;  %v6619_v45 = vld [vmem:[#allocation31_spill] sm:$0xff]  ;;  %v6620_v29 = vld [vmem:[#allocation32_spill] sm:$0xff] }
 0x20d   : > { %v1314_v41 = vadd.f32 %v4636_v59, %v1242_v22  ;;  %v1443_v52 = vmul.f32 0.01, %v1315_v31  ;;  %3780 = vrsqrt.f32 %v1034_v36  ;;  %v679_v8 = vpop.xlane.xlu0 %678  ;;  %v6623_v4 = vsub.f32 %v4227_v51, %v4887_v18 }
 0x20e   : > { %vm1381_vm3 = vcmp.ge.f32.partialorder %v1317_v47, 0.0  ;;  %v1445_v19 = vmul.f32 0.01, %v1317_v47  ;;  %v1035_v9 = vadd.f32 1e-05, %v1003_v40  ;;  %vm1380_vm5 = vcmp.ge.f32.partialorder %v1316_v54, 0.0 }
 0x20f   : > { %vm1378_vm4 = vcmp.ge.f32.partialorder %v1314_v41, 0.0  ;;  %v5079_v62 = vpop.eup %3778  ;;  %v1507_v55 = vsel %vm1379_vm2, %v1315_v31, %v1443_v52  ;;  %v1442_v25 = vmul.f32 0.01, %v1314_v41  ;;  %v1444_v30 = vmul.f32 0.01, %v1316_v54 }
 0x210   : > { %v1509_v20 = vsel %vm1381_vm3, %v1317_v47, %v1445_v19  ;;  %3782 = vrsqrt.f32 %v1035_v9  ;;  %v6621_v47 = vsub.f32 %v4230_v53, %v4887_v18  ;;  %v6622_v19 = vsub.f32 %v4245_v1, %v4889_v43 }
 0x211   : > { %v1555_v34 = vpack.c.bf16 %v1509_v20, %v1507_v55  ;;  %v1506_v36 = vsel %vm1378_vm4, %v1314_v41, %v1442_v25  ;;  %v1508_v40 = vsel %vm1380_vm5, %v1316_v54, %v1444_v30  ;;  %v941_v41 = vmul.f32 %v5065_v58, %v5065_v58 }
 0x212   : > { %v1554_v31 = vpack.c.bf16 %v1508_v40, %v1506_v36  ;;  %v1175_v52 = vmul.f32 %v4989_v5, %v6621_v47  ;;  %v1177_v9 = vmul.f32 %v4991_v39, %v6622_v19  ;;  %v972_v54 = vsub.f32 %v908_v12, %v940_v14  ;;  %v6626_v14 = vld [vmem:[#allocation38_spill] sm:$0xff] }
 0x213   : > { %1882 = vmatprep.mubr.bf16.mxu1 %v1555_v34  ;;  %v909_v55 = vmul.f32 0.00390625, %v869_v27  ;;  %v1174_v20 = vmul.f32 %v4989_v5, %v6623_v4  ;;  %v6624_v53 = vsub.f32 %v4242_v61, %v4889_v43  ;;  %v5107_v34 = vmul.f32 0.00390625, %v679_v8  ;;  %v6625_v43 = vld [vmem:[#allocation37_spill] sm:$0xff]  ;;  %v872_v8 = vpop.xlane.xlu0 %871 }
 0x214   : > { %1883 = vmatmul.mubr.bf16.gmra.mrb[64].mxu1 %v1554_v31  ;;  %v1247_v1 = vmul.f32 %v4633_v7, %v1175_v52  ;;  %v1249_v30 = vmul.f32 %v4633_v7, %v1177_v9  ;;  %v5109_v36 = vmul.f32 0.00390625, %v682_v42  ;;  %v1004_v12 = vmax.f32 %v972_v54, 0.0  ;;  %v875_v31 = vpop.xlane.xlu1 %874 }
 0x215   : > { %v1176_v25 = vmul.f32 %v4991_v39, %v6624_v53  ;;  %v973_v27 = vsub.f32 %v909_v55, %v941_v41  ;;  %v1246_v51 = vmul.f32 %v4630_v60, %v1174_v20 }
 0x216   : > { %v1319_v5 = vadd.f32 %v4641_v0, %v1247_v1  ;;  %v1321_v61 = vadd.f32 %v4641_v0, %v1249_v30  ;;  %v1036_v42 = vadd.f32 1e-05, %v1004_v12  ;;  %v6627_v12 = vld [vmem:[#allocation39_spill] sm:$0xff] }
 0x217   : > { %v1248_v18 = vmul.f32 %v4630_v60, %v1176_v25  ;;  %v1005_v47 = vmax.f32 %v973_v27, 0.0  ;;  %v1318_v52 = vadd.f32 %v4636_v59, %v1246_v51  ;;  %v5121_v9 = vpop.eup %3780  ;;  %v1132_v27 = vsub.f32 %v6627_v12, %v5109_v36  ;;  %v6628_v51 = vld [vmem:[#allocation40_spill] sm:$0xff]  ;;  %v685_v32 = vpop.xlane.xlu0 %684 }
 0x218   : > { %vm1383_vm6 = vcmp.ge.f32.partialorder %v1319_v5, 0.0  ;;  %vm1385_vm7 = vcmp.ge.f32.partialorder %v1321_v61, 0.0  ;;  %v1447_v41 = vmul.f32 0.01, %v1319_v5  ;;  %v1449_v54 = vmul.f32 0.01, %v1321_v61  ;;  %v688_v22 = vpop.xlane.xlu1 %687 }
 0x219   : > { %v1320_v19 = vadd.f32 %v4636_v59, %v1248_v18  ;;  %3784 = vrsqrt.f32 %v1036_v42  ;;  %v1037_v55 = vadd.f32 1e-05, %v1005_v47  ;;  %vm1382_vm8 = vcmp.ge.f32.partialorder %v1318_v52, 0.0 }
 0x21a   : > { %v5123_v4 = vpop.eup %3782  ;;  %v1511_v20 = vsel %vm1383_vm6, %v1319_v5, %v1447_v41  ;;  %v1513_v53 = vsel %vm1385_vm7, %v1321_v61, %v1449_v54  ;;  %v1446_v25 = vmul.f32 0.01, %v1318_v52  ;;  %v1133_v18 = vsub.f32 %v6628_v51, %v5109_v36 }
 0x21b   : > { %vm1384_vm9 = vcmp.ge.f32.partialorder %v1320_v19, 0.0  ;;  %v1448_v1 = vmul.f32 0.01, %v1320_v19  ;;  %v1557_v30 = vpack.c.bf16 %v1513_v53, %v1511_v20  ;;  %3786 = vrsqrt.f32 %v1037_v55 }
 0x21c   : > { %v1510_v39 = vsel %vm1382_vm8, %v1318_v52, %v1446_v25  ;;  %v942_v42 = vmul.f32 %v5107_v34, %v5107_v34  ;;  %v910_v47 = vmul.f32 0.00390625, %v872_v8  ;;  %v6629_v61 = vsub.f32 %v6592_v23, %v4931_v15 }
 0x21d   : > { %v1512_v40 = vsel %vm1384_vm9, %v1320_v19, %v1448_v1  ;;  %1892 = vmatprep.mubr.bf16.mxu1 %v1557_v30  ;;  %v6630_v54 = vsub.f32 %v6594_v33, %v4933_v46  ;;  %v943_v52 = vmul.f32 %v5109_v36, %v5109_v36  ;;  %v911_v20 = vmul.f32 0.00390625, %v875_v31 }
 0x21e   : > { %v1556_v5 = vpack.c.bf16 %v1512_v40, %v1510_v39  ;;  %v1179_v41 = vmul.f32 %v5033_v26, %v6629_v61  ;;  %v974_v19 = vsub.f32 %v910_v47, %v942_v42  ;;  %v6631_v8 = vsub.f32 %v6591_v13, %v4931_v15  ;;  %v6634_v42 = vld [vmem:[#allocation46_spill] sm:$0xff] }
 0x21f   : > { %v1181_v55 = vmul.f32 %v5035_v63, %v6630_v54  ;;  %v6632_v23 = vsub.f32 %v6593_v2, %v4933_v46  ;;  %v5151_v25 = vmul.f32 0.00390625, %v685_v32  ;;  %v5153_v1 = vmul.f32 0.00390625, %v688_v22  ;;  %v6633_v2 = vld [vmem:[#allocation45_spill] sm:$0xff] }
 0x220   : > { %v1178_v39 = vmul.f32 %v5033_v26, %v6631_v8  ;;  %1893 = vmatmul.mubr.bf16.gmra.mrb[68].mxu1 %v1556_v5  ;;  %v1251_v33 = vmul.f32 %v4633_v7, %v1179_v41  ;;  %v1006_v31 = vmax.f32 %v974_v19, 0.0  ;;  %v975_v30 = vsub.f32 %v911_v20, %v943_v52  ;;  %v878_v19 = vpop.xlane.xlu0 %877 }
 0x221   : > { %v1180_v40 = vmul.f32 %v5035_v63, %v6632_v23  ;;  %v1253_v53 = vmul.f32 %v4633_v7, %v1181_v55  ;;  %v944_v63 = vmul.f32 %v5151_v25, %v5151_v25  ;;  %v912_v47 = vmul.f32 0.00390625, %v878_v19 }
 0x222   : > { %v1250_v15 = vmul.f32 %v4630_v60, %v1178_v39  ;;  %v1323_v26 = vadd.f32 %v4641_v0, %v1251_v33  ;;  %v1038_v32 = vadd.f32 1e-05, %v1006_v31  ;;  %v1007_v5 = vmax.f32 %v975_v30, 0.0  ;;  %v6636_v30 = vld [vmem:[#allocation48_spill] sm:$0xff] }
 0x223   : > { %v1252_v13 = vmul.f32 %v4630_v60, %v1180_v40  ;;  %v1325_v46 = vadd.f32 %v4641_v0, %v1253_v53  ;;  %v5165_v41 = vpop.eup %3784  ;;  %v6635_v53 = vld [vmem:[#allocation47_spill] sm:$0xff]  ;;  %v6638_v19 = vsub.f32 %v6602_v3, %v4975_v44 }
 0x224   : > { %v1322_v22 = vadd.f32 %v4636_v59, %v1250_v15  ;;  %vm1387_vm10 = vcmp.ge.f32.partialorder %v1323_v26, 0.0  ;;  %v1451_v54 = vmul.f32 0.01, %v1323_v26  ;;  %3788 = vrsqrt.f32 %v1038_v32 }
 0x225   : > { %v1324_v61 = vadd.f32 %v4636_v59, %v1252_v13  ;;  %vm1389_vm11 = vcmp.ge.f32.partialorder %v1325_v46, 0.0  ;;  %v1453_v55 = vmul.f32 0.01, %v1325_v46  ;;  %v1039_v52 = vadd.f32 1e-05, %v1007_v5  ;;  %v5167_v20 = vpop.eup %3786  ;;  %v881_v13 = vpop.xlane.xlu1 %880 }
 0x226   : > { %vm1386_vm12 = vcmp.ge.f32.partialorder %v1322_v22, 0.0  ;;  %v1515_v8 = vsel %vm1387_vm10, %v1323_v26, %v1451_v54  ;;  %v1450_v23 = vmul.f32 0.01, %v1322_v22  ;;  %v1136_v31 = vsub.f32 %v6635_v53, %v5153_v1 }
 0x227   : > { %vm1388_vm13 = vcmp.ge.f32.partialorder %v1324_v61, 0.0  ;;  %v1517_v39 = vsel %vm1389_vm11, %v1325_v46, %v1453_v55  ;;  %v1452_v40 = vmul.f32 0.01, %v1324_v61  ;;  %3790 = vrsqrt.f32 %v1039_v52 }
 0x228   : > { %v1559_v33 = vpack.c.bf16 %v1517_v39, %v1515_v8  ;;  %v1137_v15 = vsub.f32 %v6636_v30, %v5153_v1  ;;  %v1514_v32 = vsel %vm1386_vm12, %v1322_v22, %v1450_v23  ;;  %v6637_v46 = vsub.f32 %v6603_v35, %v4975_v44 }
 0x229   : > { %v1516_v5 = vsel %vm1388_vm13, %v1324_v61, %v1452_v40  ;;  %v1185_v55 = vmul.f32 %v5079_v62, %v1121_v37  ;;  %v945_v22 = vmul.f32 %v5153_v1, %v5153_v1  ;;  %v976_v61 = vsub.f32 %v912_v47, %v944_v63 }
 0x22a   : > { %1902 = vmatprep.mubr.bf16.mxu1 %v1559_v33  ;;  %v1558_v26 = vpack.c.bf16 %v1516_v5, %v1514_v32  ;;  %v1183_v54 = vmul.f32 %v5077_v17, %v6637_v46  ;;  %v913_v52 = vmul.f32 0.00390625, %v881_v13  ;;  %v1182_v8 = vmul.f32 %v5077_v17, %v6638_v19 }
 0x22b   : > { %v6639_v35 = vsub.f32 %v6604_v6, %v4977_v56  ;;  %v1257_v37 = vmul.f32 %v4633_v7, %v1185_v55  ;;  %v6640_v23 = vsub.f32 %v6611_v38, %v5019_v28  ;;  %v1189_v44 = vmul.f32 %v5123_v4, %v1125_v10 }
 0x22c   : > { %1903 = vmatmul.mubr.bf16.gmra.mrb[72].mxu1 %v1558_v26  ;;  %v1255_v24 = vmul.f32 %v4633_v7, %v1183_v54  ;;  %v1008_v3 = vmax.f32 %v976_v61, 0.0  ;;  %v977_v17 = vsub.f32 %v913_v52, %v945_v22  ;;  %v1254_v56 = vmul.f32 %v4630_v60, %v1182_v8 }
 0x22d   : > { %v1184_v39 = vmul.f32 %v5079_v62, %v6639_v35  ;;  %v1187_v63 = vmul.f32 %v5121_v9, %v6640_v23  ;;  %v1329_v47 = vadd.f32 %v4641_v0, %v1257_v37  ;;  %v1261_v38 = vmul.f32 %v4633_v7, %v1189_v44 }
 0x22e   : > { %v1327_v62 = vadd.f32 %v4641_v0, %v1255_v24  ;;  %v1040_v33 = vadd.f32 1e-05, %v1008_v3  ;;  %v1009_v13 = vmax.f32 %v977_v17, 0.0  ;;  %v1326_v57 = vadd.f32 %v4636_v59, %v1254_v56  ;;  %v5211_v32 = vpop.eup %3788 }
 0x22f   : > { %v1256_v6 = vmul.f32 %v4630_v60, %v1184_v39  ;;  %v1259_v40 = vmul.f32 %v4633_v7, %v1187_v63  ;;  %vm1393_vm15 = vcmp.ge.f32.partialorder %v1329_v47, 0.0  ;;  %v1457_v26 = vmul.f32 0.01, %v1329_v47 }
 0x230   : > { %vm1391_vm14 = vcmp.ge.f32.partialorder %v1327_v62, 0.0  ;;  %v1455_v5 = vmul.f32 0.01, %v1327_v62  ;;  %3792 = vrsqrt.f32 %v1040_v33  ;;  %v1041_v46 = vadd.f32 1e-05, %v1009_v13 }
 0x231   : > { %v1328_v10 = vadd.f32 %v4636_v59, %v1256_v6  ;;  %vm1390_vm0 = vcmp.ge.f32.partialorder %v1326_v57, 0.0  ;;  %v5213_v54 = vpop.eup %3790  ;;  %v1521_v22 = vsel %vm1393_vm15, %v1329_v47, %v1457_v26  ;;  %v1454_v61 = vmul.f32 0.01, %v1326_v57 }
 0x232   : > { %v1519_v55 = vsel %vm1391_vm14, %v1327_v62, %v1455_v5  ;;  %3794 = vrsqrt.f32 %v1041_v46  ;;  %v1331_v8 = vadd.f32 %v4641_v0, %v1259_v40  ;;  %v1333_v35 = vadd.f32 %v4641_v0, %v1261_v38 }
 0x233   : > { %vm1392_vm1 = vcmp.ge.f32.partialorder %v1328_v10, 0.0  ;;  %v1456_v52 = vmul.f32 0.01, %v1328_v10  ;;  %v1561_v19 = vpack.c.bf16 %v1521_v22, %v1519_v55  ;;  %v1518_v39 = vsel %vm1390_vm0, %v1326_v57, %v1454_v61 }
 0x234   : > { %v6641_v37 = vsub.f32 %v6610_v16, %v5019_v28  ;;  %v6642_v63 = vsub.f32 %v6612_v48, %v5021_v11  ;;  %vm1395_vm2 = vcmp.ge.f32.partialorder %v1331_v8, 0.0  ;;  %vm1397_vm3 = vcmp.ge.f32.partialorder %v1333_v35, 0.0 }
 0x235   : > { %v1520_v24 = vsel %vm1392_vm1, %v1328_v10, %v1456_v52  ;;  %1912 = vmatprep.mubr.bf16.mxu1 %v1561_v19  ;;  %v1459_v17 = vmul.f32 0.01, %v1331_v8  ;;  %v1461_v56 = vmul.f32 0.01, %v1333_v35  ;;  %v6643_v28 = vsub.f32 %v6618_v50, %v5063_v49 }
 0x236   : > { %v1186_v23 = vmul.f32 %v5121_v9, %v6641_v37  ;;  %v1188_v44 = vmul.f32 %v5123_v4, %v6642_v63  ;;  %v1560_v3 = vpack.c.bf16 %v1520_v24, %v1518_v39  ;;  %v6644_v11 = vsub.f32 %v6620_v29, %v5065_v58 }
 0x237   : > { %v1191_v16 = vmul.f32 %v5165_v41, %v6643_v28  ;;  %v1523_v9 = vsel %vm1395_vm2, %v1331_v8, %v1459_v17  ;;  %v6645_v4 = vsub.f32 %v6617_v21, %v5063_v49  ;;  %v6646_v40 = vsub.f32 %v6619_v45, %v5065_v58 }
 0x238   : > { %v1258_v6 = vmul.f32 %v4630_v60, %v1186_v23  ;;  %v1260_v62 = vmul.f32 %v4630_v60, %v1188_v44  ;;  %1913 = vmatmul.mubr.bf16.gmra.mrb[76].mxu1 %v1560_v3  ;;  %v1193_v48 = vmul.f32 %v5167_v20, %v6644_v11  ;;  %v1525_v50 = vsel %vm1397_vm3, %v1333_v35, %v1461_v56 }
 0x239   : > { %v1190_v47 = vmul.f32 %v5165_v41, %v6645_v4  ;;  %v1192_v38 = vmul.f32 %v5167_v20, %v6646_v40  ;;  %v1263_v57 = vmul.f32 %v4633_v7, %v1191_v16  ;;  %v1563_v29 = vpack.c.bf16 %v1525_v50, %v1523_v9 }
 0x23a   : > { %v1330_v33 = vadd.f32 %v4636_v59, %v1258_v6  ;;  %v1332_v13 = vadd.f32 %v4636_v59, %v1260_v62  ;;  %v1265_v10 = vmul.f32 %v4633_v7, %v1193_v48  ;;  %v3793_v45 = vpop.eup %3792  ;;  %v6647_v61 = vsub.f32 %v6626_v14, %v5107_v34 }
 0x23b   : > { %v1262_v5 = vmul.f32 %v4630_v60, %v1190_v47  ;;  %v1264_v49 = vmul.f32 %v4630_v60, %v1192_v38  ;;  %1922 = vmatprep.mubr.bf16.mxu1 %v1563_v29  ;;  %v1335_v41 = vadd.f32 %v4641_v0, %v1263_v57  ;;  %v1197_v19 = vmul.f32 %v5213_v54, %v1133_v18 }
 0x23c   : > { %vm1394_vm4 = vcmp.ge.f32.partialorder %v1330_v33, 0.0  ;;  %vm1396_vm5 = vcmp.ge.f32.partialorder %v1332_v13, 0.0  ;;  %v1458_v21 = vmul.f32 0.01, %v1330_v33  ;;  %v1460_v58 = vmul.f32 0.01, %v1332_v13  ;;  %v3795_v8 = vpop.eup %3794 }
 0x23d   : > { %v1337_v20 = vadd.f32 %v4641_v0, %v1265_v10  ;;  %v1334_v26 = vadd.f32 %v4636_v59, %v1262_v5  ;;  %v1336_v46 = vadd.f32 %v4636_v59, %v1264_v49  ;;  %v1195_v52 = vmul.f32 %v5211_v32, %v6647_v61  ;;  %v5309_v61 = vld [vmem:[%s6363_s5 + $0x8] sm:$0x3f] }
 0x23e   : > { %v1522_v55 = vsel %vm1394_vm4, %v1330_v33, %v1458_v21  ;;  %v1524_v22 = vsel %vm1396_vm5, %v1332_v13, %v1460_v58  ;;  %vm1399_vm6 = vcmp.ge.f32.partialorder %v1335_v41, 0.0  ;;  %v1463_v39 = vmul.f32 0.01, %v1335_v41 }
 0x23f   : > { %v1562_v35 = vpack.c.bf16 %v1524_v22, %v1522_v55  ;;  %vm1401_vm7 = vcmp.ge.f32.partialorder %v1337_v20, 0.0  ;;  %v1465_v24 = vmul.f32 0.01, %v1337_v20  ;;  %vm1398_vm8 = vcmp.ge.f32.partialorder %v1334_v26, 0.0 }
 0x240   : > { %vm1400_vm9 = vcmp.ge.f32.partialorder %v1336_v46, 0.0  ;;  %v1462_v37 = vmul.f32 0.01, %v1334_v26  ;;  %v1527_v23 = vsel %vm1399_vm6, %v1335_v41, %v1463_v39  ;;  %v1464_v63 = vmul.f32 0.01, %v1336_v46 }
 0x241   : > { %1923 = vmatmul.mubr.bf16.gmra.mrb[80].mxu1 %v1562_v35  ;;  %v1267_v14 = vmul.f32 %v4633_v7, %v1195_v52  ;;  %v1269_v44 = vmul.f32 %v4633_v7, %v1197_v19  ;;  %v1529_v3 = vsel %vm1401_vm7, %v1337_v20, %v1465_v24  ;;  %v6648_v18 = vsub.f32 %v6625_v43, %v5107_v34 }
 0x242   : > { %v1526_v51 = vsel %vm1398_vm8, %v1334_v26, %v1462_v37  ;;  %v1196_v56 = vmul.f32 %v5213_v54, %v1132_v27  ;;  %v1565_v6 = vpack.c.bf16 %v1529_v3, %v1527_v23  ;;  %v1528_v62 = vsel %vm1400_vm9, %v1336_v46, %v1464_v63  ;;  %v6651_v46 = vld [vmem:[#allocation6_spill] sm:$0xff] }
 0x243   : > { %v1194_v17 = vmul.f32 %v5211_v32, %v6648_v18  ;;  %v1339_v28 = vadd.f32 %v4641_v0, %v1267_v14  ;;  %v1341_v16 = vadd.f32 %v4641_v0, %v1269_v44  ;;  %v1564_v9 = vpack.c.bf16 %v1528_v62, %v1526_v51 }
 0x244   : > { %v1268_v48 = vmul.f32 %v4630_v60, %v1196_v56  ;;  %v6649_v34 = vsub.f32 %v6634_v42, %v5151_v25  ;;  %1932 = vmatprep.mubr.bf16.mxu1 %v1565_v6  ;;  %v1201_v54 = vmul.f32 %v3795_v8, %v1137_v15  ;;  %v6650_v42 = vsub.f32 %v6633_v2, %v5151_v25 }
 0x245   : > { %v1266_v11 = vmul.f32 %v4630_v60, %v1194_v17  ;;  %vm1403_vm10 = vcmp.ge.f32.partialorder %v1339_v28, 0.0  ;;  %vm1405_vm11 = vcmp.ge.f32.partialorder %v1341_v16, 0.0  ;;  %v1467_v36 = vmul.f32 0.01, %v1339_v28 }
 0x246   : > { %v1199_v43 = vmul.f32 %v3793_v45, %v6649_v34  ;;  %v1469_v12 = vmul.f32 0.01, %v1341_v16  ;;  %v1340_v32 = vadd.f32 %v4636_v59, %v1268_v48  ;;  %v1198_v38 = vmul.f32 %v3793_v45, %v6650_v42 }
 0x247   : > { %v1338_v27 = vadd.f32 %v4636_v59, %v1266_v11  ;;  %v1531_v47 = vsel %vm1403_vm10, %v1339_v28, %v1467_v36  ;;  %v1200_v50 = vmul.f32 %v3795_v8, %v1136_v31  ;;  %v1273_v30 = vmul.f32 %v4633_v7, %v1201_v54 }
 0x248   : > { %v1271_v4 = vmul.f32 %v4633_v7, %v1199_v43  ;;  %v1533_v40 = vsel %vm1405_vm11, %v1341_v16, %v1469_v12  ;;  %vm1404_vm13 = vcmp.ge.f32.partialorder %v1340_v32, 0.0  ;;  %v1468_v57 = vmul.f32 0.01, %v1340_v32 }
 0x249   : > { %v1567_v33 = vpack.c.bf16 %v1533_v40, %v1531_v47  ;;  %vm1402_vm12 = vcmp.ge.f32.partialorder %v1338_v27, 0.0  ;;  %v1466_v13 = vmul.f32 0.01, %v1338_v27  ;;  %1933 = vmatmul.mubr.bf16.gmra.mrb[84].mxu1 %v1564_v9  ;;  %v1270_v29 = vmul.f32 %v4630_v60, %v1198_v38 }
 0x24a   : > { %v1343_v15 = vadd.f32 %v4641_v0, %v1271_v4  ;;  %v1272_v25 = vmul.f32 %v4630_v60, %v1200_v50  ;;  %v1532_v2 = vsel %vm1404_vm13, %v1340_v32, %v1468_v57  ;;  %v1345_v10 = vadd.f32 %v4641_v0, %v1273_v30 }
 0x24b   : > { %1942 = vmatprep.mubr.bf16.mxu1 %v1567_v33  ;;  %v1530_v53 = vsel %vm1402_vm12, %v1338_v27, %v1466_v13  ;;  %v1342_v31 = vadd.f32 %v4636_v59, %v1270_v29  ;;  %v1604_v55 = vsub.s32 3, %v6651_v46  ;;  %v3716_v33 = vld [vmem:[%s6361_s3 + $0x40] sm:$0xff]  }
 0x24c   : > { %v1471_v1 = vmul.f32 0.01, %v1343_v15  ;;  %vm1407_vm14 = vcmp.ge.f32.partialorder %v1343_v15, 0.0  ;;  %v1344_v5 = vadd.f32 %v4636_v59, %v1272_v25  ;;  %v1566_v49 = vpack.c.bf16 %v1532_v2, %v1530_v53  ;;  %v5301_v59 = vld [vmem:[%s6363_s5] sm:$0x3f]  ;;  %3499 = vmatprep.subr.bf16.mxu0 %v3716_v33 }
 0x24d   : > { %vm1409_vm15 = vcmp.ge.f32.partialorder %v1345_v10, 0.0  ;;  %v1473_v7 = vmul.f32 0.01, %v1345_v10  ;;  %v1470_v20 = vmul.f32 0.01, %v1342_v31  ;;  %vm1406_vm1 = vcmp.ge.f32.partialorder %v1342_v31, 0.0 }
 0x24e   : > { %v1472_v21 = vmul.f32 0.01, %v1344_v5  ;;  %v1535_v58 = vsel %vm1407_vm14, %v1343_v15, %v1471_v1  ;;  %vm1408_vm0 = vcmp.ge.f32.partialorder %v1344_v5, 0.0  ;;  %v5304_v22 = vrot.slane %v5301_v59, %v1604_v55 }
 0x24f   : > { %v1537_v45 = vsel %vm1409_vm15, %v1345_v10, %v1473_v7  ;;  %v1534_v0 = vsel %vm1406_vm1, %v1342_v31, %v1470_v20  ;;  %v5312_v52 = vrot.slane %v5309_v61, %v1604_v55  ;;  %v3718_v7 = vld [vmem:[%s6361_s3 + $0x48] sm:$0xff]  }
 0x250   : > { %v1569_v41 = vpack.c.bf16 %v1537_v45, %v1535_v58  ;;  %v1536_v60 = vsel %vm1408_vm0, %v1344_v5, %v1472_v21  ;;  %v3717_v5 = vld [vmem:[%s6361_s3] sm:$0xff]   ;;  %v3719_v45 = vld [vmem:[%s6361_s3 + $0x8] sm:$0xff]  }
 0x251   : > { %1943 = vmatmul.mubr.bf16.gmra.mrb[88].mxu1 %v1566_v49  ;;  %v1568_v26 = vpack.c.bf16 %v1536_v60, %v1534_v0  ;;  %3500 = vmatpush3.bf16.msra.mxu0 %v3717_v5 }
 0x252   : > { %1952 = vmatprep.mubr.bf16.mxu1 %v1569_v41  ;;  %3501 = vmatprep.subr.bf16.mxu0 %v3718_v7 }
 0x255   : > { %3502 = vmatpush3.bf16.msra.mxu0 %v3719_v45 }
 0x259   : > { %1953 = vmatmul.mubr.bf16.gmra.mrb[92].mxu1 %v1568_v26 }
 0x287   : > { %v1804_v19 = vpop.f32.mrb[32].mxu1 }
 0x288   : > { %v5315_v8 = vadd.f32 %v1804_v19, %v5304_v22  ;;  %v1806_v35 = vpop.f32.mrb[33].mxu1 }
 0x289   : > { %v5318_v39 = vadd.f32 %v1806_v35, %v5312_v52  ;;  %v1808_v24 = vpop.f32.mrb[34].mxu1 }
 0x28a   : > { %v5321_v37 = vadd.f32 %v1808_v24, %v5304_v22  ;;  %v1810_v23 = vpop.f32.mrb[35].mxu1  ;;  %v2091_v44 = vmul.f32 %v5315_v8, %v5315_v8 }
 0x28b   : > { %v5324_v63 = vadd.f32 %v1810_v23, %v5312_v52  ;;  %v1963_v14 = vadd.f32 %v5318_v39, %v5315_v8  ;;  %v2092_v3 = vmul.f32 %v5318_v39, %v5318_v39 }
 0x28c   : > { %v2093_v18 = vmul.f32 %v5321_v37, %v5321_v37 }
 0x28d   : > { %1964 = vadd.xlane.f32.xlu0 %v1963_v14  ;;  %v1966_v51 = vadd.f32 %v5324_v63, %v5321_v37  ;;  %v2094_v17 = vmul.f32 %v5324_v63, %v5324_v63  ;;  %v2155_v56 = vadd.f32 %v2092_v3, %v2091_v44  ;;  %v3720_v14 = vld [vmem:[%s6361_s3 + $0x50] sm:$0xff]   ;;  %v3722_v3 = vld [vmem:[%s6361_s3 + $0x58] sm:$0xff]  }
 0x28e   : > { %v3721_v44 = vld [vmem:[%s6361_s3 + $0x10] sm:$0xff]   ;;  %3503 = vmatprep.subr.bf16.mxu0 %v3720_v14 }
 0x28f   : > { %1967 = vadd.xlane.f32.xlu1 %v1966_v51  ;;  %v2158_v6 = vadd.f32 %v2094_v17, %v2093_v18  ;;  %3504 = vmatpush3.bf16.msra.mxu0 %v3721_v44 }
 0x290   : > { %3505 = vmatprep.subr.bf16.mxu0 %v3722_v3 }
 0x291   : > { %2156 = vadd.xlane.f32.xlu0 %v2155_v56  ;;  %v3723_v56 = vld [vmem:[%s6361_s3 + $0x18] sm:$0xff]  }
 0x293   : > { %2159 = vadd.xlane.f32.xlu1 %v2158_v6  ;;  %3506 = vmatpush3.bf16.msra.mxu0 %v3723_v56 }
 0x296   : > { %v1814_v62 = vpop.f32.mrb[36].mxu1 }
 0x297   : > { %v5339_v28 = vadd.f32 %v1814_v62, %v5304_v22  ;;  %v1816_v16 = vpop.f32.mrb[37].mxu1 }
 0x298   : > { %v5342_v9 = vadd.f32 %v1816_v16, %v5312_v52  ;;  %v1818_v11 = vpop.f32.mrb[38].mxu1  ;;  %v3724_v16 = vld [vmem:[%s6361_s3 + $0x60] sm:$0xff]  }
 0x299   : > { %v5345_v48 = vadd.f32 %v1818_v11, %v5304_v22  ;;  %v1820_v34 = vpop.f32.mrb[39].mxu1  ;;  %v2095_v12 = vmul.f32 %v5339_v28, %v5339_v28  ;;  %3507 = vmatprep.subr.bf16.mxu0 %v3724_v16 }
 0x29a   : > { %v5348_v43 = vadd.f32 %v1820_v34, %v5312_v52  ;;  %v1969_v36 = vadd.f32 %v5342_v9, %v5339_v28  ;;  %v2096_v27 = vmul.f32 %v5342_v9, %v5342_v9  ;;  %v3725_v34 = vld [vmem:[%s6361_s3 + $0x20] sm:$0xff]  }
 0x29b   : > { %v2097_v54 = vmul.f32 %v5345_v48, %v5345_v48  ;;  %3508 = vmatpush3.bf16.msra.mxu0 %v3725_v34 }
 0x29c   : > { %1970 = vadd.xlane.f32.xlu0 %v1969_v36  ;;  %v1972_v32 = vadd.f32 %v5348_v43, %v5345_v48  ;;  %v2098_v4 = vmul.f32 %v5348_v43, %v5348_v43  ;;  %v2161_v47 = vadd.f32 %v2096_v27, %v2095_v12  ;;  %v3726_v27 = vld [vmem:[%s6361_s3 + $0x68] sm:$0xff]  }
 0x29d   : > { %3509 = vmatprep.subr.bf16.mxu0 %v3726_v27 }
 0x29e   : > { %1973 = vadd.xlane.f32.xlu1 %v1972_v32  ;;  %v2164_v40 = vadd.f32 %v2098_v4, %v2097_v54 }
 0x2a0   : > { %2162 = vadd.xlane.f32.xlu0 %v2161_v47 }
 0x2a2   : > { %v1824_v42 = vpop.f32.mrb[40].mxu1  ;;  %2165 = vadd.xlane.f32.xlu1 %v2164_v40 }
 0x2a3   : > { %v5363_v38 = vadd.f32 %v1824_v42, %v5304_v22  ;;  %v1826_v50 = vpop.f32.mrb[41].mxu1 }
 0x2a4   : > { %v5369_v13 = vadd.f32 %v1826_v50, %v5312_v52  ;;  %v1828_v57 = vpop.f32.mrb[42].mxu1 }
 0x2a5   : > { %v5372_v30 = vadd.f32 %v1828_v57, %v5304_v22  ;;  %v1830_v15 = vpop.f32.mrb[43].mxu1  ;;  %v2099_v2 = vmul.f32 %v5363_v38, %v5363_v38  ;;  %v3727_v57 = vld [vmem:[%s6361_s3 + $0x28] sm:$0xff]  }
 0x2a6   : > { %v5375_v29 = vadd.f32 %v1830_v15, %v5312_v52  ;;  %v1975_v25 = vadd.f32 %v5369_v13, %v5363_v38  ;;  %v2100_v10 = vmul.f32 %v5369_v13, %v5369_v13  ;;  %3510 = vmatpush3.bf16.msra.mxu0 %v3727_v57 }
 0x2a7   : > { %v2101_v53 = vmul.f32 %v5372_v30, %v5372_v30 }
 0x2a8   : > { %1976 = vadd.xlane.f32.xlu0 %v1975_v25  ;;  %v1978_v1 = vadd.f32 %v5375_v29, %v5372_v30  ;;  %v2102_v31 = vmul.f32 %v5375_v29, %v5375_v29  ;;  %v2167_v49 = vadd.f32 %v2100_v10, %v2099_v2 }
 0x2aa   : > { %1979 = vadd.xlane.f32.xlu1 %v1978_v1  ;;  %v2170_v21 = vadd.f32 %v2102_v31, %v2101_v53  ;;  %v3728_v53 = vld [vmem:[%s6361_s3 + $0x70] sm:$0xff]  }
 0x2ab   : > { %v3729_v31 = vld [vmem:[%s6361_s3 + $0x30] sm:$0xff]   ;;  %3511 = vmatprep.subr.bf16.mxu0 %v3728_v53 }
 0x2ac   : > { %2168 = vadd.xlane.f32.xlu0 %v2167_v49  ;;  %3512 = vmatpush3.bf16.msra.mxu0 %v3729_v31 }
 0x2ae   : > { %2171 = vadd.xlane.f32.xlu1 %v2170_v21 }
 0x2af   : > { %v1834_v58 = vpop.f32.mrb[44].mxu1 }
 0x2b0   : > { %v5399_v41 = vadd.f32 %v1834_v58, %v5304_v22  ;;  %v1836_v20 = vpop.f32.mrb[45].mxu1 }
 0x2b1   : > { %v5402_v60 = vadd.f32 %v1836_v20, %v5312_v52  ;;  %v1838_v0 = vpop.f32.mrb[46].mxu1 }
 0x2b2   : > { %v5405_v26 = vadd.f32 %v1838_v0, %v5304_v22  ;;  %v1840_v55 = vpop.f32.mrb[47].mxu1  ;;  %v2103_v24 = vmul.f32 %v5399_v41, %v5399_v41 }
 0x2b3   : > { %v5408_v19 = vadd.f32 %v1840_v55, %v5312_v52  ;;  %v1981_v35 = vadd.f32 %v5402_v60, %v5399_v41  ;;  %v2104_v23 = vmul.f32 %v5402_v60, %v5402_v60 }
 0x2b4   : > { %v2105_v18 = vmul.f32 %v5405_v26, %v5405_v26 }
 0x2b5   : > { %1982 = vadd.xlane.f32.xlu0 %v1981_v35  ;;  %v1984_v51 = vadd.f32 %v5408_v19, %v5405_v26  ;;  %v2106_v17 = vmul.f32 %v5408_v19, %v5408_v19  ;;  %v2173_v6 = vadd.f32 %v2104_v23, %v2103_v24 }
 0x2b7   : > { %1985 = vadd.xlane.f32.xlu1 %v1984_v51  ;;  %v2176_v62 = vadd.f32 %v2106_v17, %v2105_v18  ;;  %v3730_v18 = vld [vmem:[%s6361_s3 + $0x78] sm:$0xff]  }
 0x2b8   : > { %v3731_v17 = vld [vmem:[%s6361_s3 + $0x38] sm:$0xff]   ;;  %3513 = vmatprep.subr.bf16.mxu0 %v3730_v18 }
 0x2b9   : > { %2174 = vadd.xlane.f32.xlu0 %v2173_v6  ;;  %3514 = vmatpush3.bf16.msra.mxu0 %v3731_v17 }
 0x2ba   : > { %v1844_v11 = vpop.f32.mrb[48].mxu1 }
 0x2bb   : > { %v5441_v36 = vadd.f32 %v1844_v11, %v5304_v22  ;;  %v1846_v12 = vpop.f32.mrb[49].mxu1  ;;  %2177 = vadd.xlane.f32.xlu1 %v2176_v62 }
 0x2bc   : > { %v5447_v32 = vadd.f32 %v1846_v12, %v5312_v52  ;;  %v1848_v54 = vpop.f32.mrb[50].mxu1 }
 0x2bd   : > { %v5450_v4 = vadd.f32 %v1848_v54, %v5304_v22  ;;  %v1850_v47 = vpop.f32.mrb[51].mxu1  ;;  %v2107_v50 = vmul.f32 %v5441_v36, %v5441_v36 }
 0x2be   : > { %v5453_v40 = vadd.f32 %v1850_v47, %v5312_v52  ;;  %v1987_v42 = vadd.f32 %v5447_v32, %v5441_v36  ;;  %v2108_v33 = vmul.f32 %v5447_v32, %v5447_v32 }
 0x2bf   : > { %v2109_v25 = vmul.f32 %v5450_v4, %v5450_v4 }
 0x2c0   : > { %1988 = vadd.xlane.f32.xlu0 %v1987_v42  ;;  %v1990_v15 = vadd.f32 %v5453_v40, %v5450_v4  ;;  %v2110_v2 = vmul.f32 %v5453_v40, %v5453_v40  ;;  %v2179_v10 = vadd.f32 %v2108_v33, %v2107_v50 }
 0x2c2   : > { %1991 = vadd.xlane.f32.xlu1 %v1990_v15  ;;  %v2182_v1 = vadd.f32 %v2110_v2, %v2109_v25 }
 0x2c4   : > { %2180 = vadd.xlane.f32.xlu0 %v2179_v10 }
 0x2c6   : > { %v1854_v5 = vpop.f32.mrb[52].mxu1  ;;  %2183 = vadd.xlane.f32.xlu1 %v2182_v1 }
 0x2c7   : > { %v5477_v49 = vadd.f32 %v1854_v5, %v5304_v22  ;;  %v1856_v7 = vpop.f32.mrb[53].mxu1 }
 0x2c8   : > { %v5480_v21 = vadd.f32 %v1856_v7, %v5312_v52  ;;  %v1858_v58 = vpop.f32.mrb[54].mxu1 }
 0x2c9   : > { %v5483_v45 = vadd.f32 %v1858_v58, %v5304_v22  ;;  %v1860_v20 = vpop.f32.mrb[55].mxu1  ;;  %v2111_v35 = vmul.f32 %v5477_v49, %v5477_v49 }
 0x2ca   : > { %v5486_v0 = vadd.f32 %v1860_v20, %v5312_v52  ;;  %v1993_v55 = vadd.f32 %v5480_v21, %v5477_v49  ;;  %v2112_v24 = vmul.f32 %v5480_v21, %v5480_v21 }
 0x2cb   : > { %v2113_v14 = vmul.f32 %v5483_v45, %v5483_v45 }
 0x2cc   : > { %1994 = vadd.xlane.f32.xlu0 %v1993_v55  ;;  %v1996_v23 = vadd.f32 %v5486_v0, %v5483_v45  ;;  %v2114_v44 = vmul.f32 %v5486_v0, %v5486_v0  ;;  %v2185_v3 = vadd.f32 %v2112_v24, %v2111_v35 }
 0x2ce   : > { %1997 = vadd.xlane.f32.xlu1 %v1996_v23  ;;  %v2188_v51 = vadd.f32 %v2114_v44, %v2113_v14 }
 0x2d0   : > { %2186 = vadd.xlane.f32.xlu0 %v2185_v3 }
 0x2d2   : > { %v1864_v56 = vpop.f32.mrb[56].mxu1  ;;  %2189 = vadd.xlane.f32.xlu1 %v2188_v51 }
 0x2d3   : > { %v5507_v6 = vadd.f32 %v1864_v56, %v5304_v22  ;;  %v1866_v62 = vpop.f32.mrb[57].mxu1 }
 0x2d4   : > { %v5510_v16 = vadd.f32 %v1866_v62, %v5312_v52  ;;  %v1868_v11 = vpop.f32.mrb[58].mxu1 }
 0x2d5   : > { %v5513_v34 = vadd.f32 %v1868_v11, %v5304_v22  ;;  %v1870_v12 = vpop.f32.mrb[59].mxu1  ;;  %v2115_v47 = vmul.f32 %v5507_v6, %v5507_v6 }
 0x2d6   : > { %v5516_v27 = vadd.f32 %v1870_v12, %v5312_v52  ;;  %v1999_v54 = vadd.f32 %v5510_v16, %v5507_v6  ;;  %v2116_v42 = vmul.f32 %v5510_v16, %v5510_v16 }
 0x2d7   : > { %v2117_v33 = vmul.f32 %v5513_v34, %v5513_v34 }
 0x2d8   : > { %2000 = vadd.xlane.f32.xlu0 %v1999_v54  ;;  %v2002_v50 = vadd.f32 %v5516_v27, %v5513_v34  ;;  %v2118_v57 = vmul.f32 %v5516_v27, %v5516_v27  ;;  %v2191_v15 = vadd.f32 %v2116_v42, %v2115_v47 }
 0x2da   : > { %2003 = vadd.xlane.f32.xlu1 %v2002_v50  ;;  %v2194_v25 = vadd.f32 %v2118_v57, %v2117_v33 }
 0x2dc   : > { %2192 = vadd.xlane.f32.xlu0 %v2191_v15 }
 0x2dd   : > { %v1874_v2 = vpop.f32.mrb[60].mxu1 }
 0x2de   : > { %v5531_v10 = vadd.f32 %v1874_v2, %v5304_v22  ;;  %v1876_v1 = vpop.f32.mrb[61].mxu1  ;;  %2195 = vadd.xlane.f32.xlu1 %v2194_v25 }
 0x2df   : > { %v5534_v53 = vadd.f32 %v1876_v1, %v5312_v52  ;;  %v1878_v31 = vpop.f32.mrb[62].mxu1 }
 0x2e0   : > { %v5537_v5 = vadd.f32 %v1878_v31, %v5304_v22  ;;  %v1880_v7 = vpop.f32.mrb[63].mxu1  ;;  %v2119_v55 = vmul.f32 %v5531_v10, %v5531_v10 }
 0x2e1   : > { %v5540_v58 = vadd.f32 %v1880_v7, %v5312_v52  ;;  %v2005_v20 = vadd.f32 %v5534_v53, %v5531_v10  ;;  %v2120_v35 = vmul.f32 %v5534_v53, %v5534_v53 }
 0x2e2   : > { %v2121_v23 = vmul.f32 %v5537_v5, %v5537_v5 }
 0x2e3   : > { %2006 = vadd.xlane.f32.xlu0 %v2005_v20  ;;  %v2008_v24 = vadd.f32 %v5540_v58, %v5537_v5  ;;  %v2122_v14 = vmul.f32 %v5540_v58, %v5540_v58  ;;  %v2197_v44 = vadd.f32 %v2120_v35, %v2119_v55 }
 0x2e5   : > { %2009 = vadd.xlane.f32.xlu1 %v2008_v24  ;;  %v2200_v3 = vadd.f32 %v2122_v14, %v2121_v23 }
 0x2e7   : > { %2198 = vadd.xlane.f32.xlu0 %v2197_v44  ;;  %v1884_v51 = vpop.f32.mrb[64].mxu1 }
 0x2e8   : > { %v5555_v18 = vadd.f32 %v1884_v51, %v5304_v22  ;;  %v1886_v17 = vpop.f32.mrb[65].mxu1 }
 0x2e9   : > { %2201 = vadd.xlane.f32.xlu1 %v2200_v3  ;;  %v5558_v56 = vadd.f32 %v1886_v17, %v5312_v52  ;;  %v1888_v62 = vpop.f32.mrb[66].mxu1 }
 0x2ea   : > { %v5561_v11 = vadd.f32 %v1888_v62, %v5304_v22  ;;  %v1890_v12 = vpop.f32.mrb[67].mxu1  ;;  %v2123_v54 = vmul.f32 %v5555_v18, %v5555_v18 }
 0x2eb   : > { %v2124_v47 = vmul.f32 %v5558_v56, %v5558_v56  ;;  %v5568_v42 = vadd.f32 %v1890_v12, %v5312_v52  ;;  %v2011_v50 = vadd.f32 %v5558_v56, %v5555_v18 }
 0x2ec   : > { %v2125_v33 = vmul.f32 %v5561_v11, %v5561_v11 }
 0x2ed   : > { %v2126_v57 = vmul.f32 %v5568_v42, %v5568_v42  ;;  %2012 = vadd.xlane.f32.xlu0 %v2011_v50  ;;  %v2014_v15 = vadd.f32 %v5568_v42, %v5561_v11  ;;  %v2203_v25 = vadd.f32 %v2124_v47, %v2123_v54 }
 0x2ef   : > { %2015 = vadd.xlane.f32.xlu1 %v2014_v15  ;;  %v2206_v2 = vadd.f32 %v2126_v57, %v2125_v33 }
 0x2f1   : > { %2204 = vadd.xlane.f32.xlu0 %v2203_v25 }
 0x2f3   : > { %v1894_v1 = vpop.f32.mrb[68].mxu1  ;;  %2207 = vadd.xlane.f32.xlu1 %v2206_v2 }
 0x2f4   : > { %v5579_v31 = vadd.f32 %v1894_v1, %v5304_v22  ;;  %v1896_v7 = vpop.f32.mrb[69].mxu1 }
 0x2f5   : > { %v5582_v20 = vadd.f32 %v1896_v7, %v5312_v52  ;;  %v1898_v55 = vpop.f32.mrb[70].mxu1 }
 0x2f6   : > { %6652 = vst [vmem:[#allocation17_spill] sm:$0xff] %v5579_v31  ;;  %v5585_v35 = vadd.f32 %v1898_v55, %v5304_v22  ;;  %v1900_v24 = vpop.f32.mrb[71].mxu1  ;;  %v2127_v23 = vmul.f32 %v5579_v31, %v5579_v31 }
 0x2f7   : > { %6653 = vst [vmem:[#allocation18_spill] sm:$0xff] %v5582_v20  ;;  %v2128_v14 = vmul.f32 %v5582_v20, %v5582_v20  ;;  %v5592_v44 = vadd.f32 %v1900_v24, %v5312_v52  ;;  %v2017_v3 = vadd.f32 %v5582_v20, %v5579_v31 }
 0x2f8   : > { %6654 = vst [vmem:[#allocation19_spill] sm:$0xff] %v5585_v35  ;;  %v2129_v51 = vmul.f32 %v5585_v35, %v5585_v35 }
 0x2f9   : > { %6655 = vst [vmem:[#allocation20_spill] sm:$0xff] %v5592_v44  ;;  %v2130_v17 = vmul.f32 %v5592_v44, %v5592_v44  ;;  %2018 = vadd.xlane.f32.xlu0 %v2017_v3  ;;  %v2020_v62 = vadd.f32 %v5592_v44, %v5585_v35  ;;  %v2209_v12 = vadd.f32 %v2128_v14, %v2127_v23 }
 0x2fb   : > { %2021 = vadd.xlane.f32.xlu1 %v2020_v62  ;;  %v2212_v54 = vadd.f32 %v2130_v17, %v2129_v51 }
 0x2fd   : > { %2210 = vadd.xlane.f32.xlu0 %v2209_v12 }
 0x2ff   : > { %v1904_v47 = vpop.f32.mrb[72].mxu1  ;;  %2213 = vadd.xlane.f32.xlu1 %v2212_v54 }
 0x300   : > { %v5603_v50 = vadd.f32 %v1904_v47, %v5304_v22  ;;  %v1906_v33 = vpop.f32.mrb[73].mxu1 }
 0x301   : > { %v5606_v57 = vadd.f32 %v1906_v33, %v5312_v52  ;;  %v1908_v15 = vpop.f32.mrb[74].mxu1 }
 0x302   : > { %6656 = vst [vmem:[#allocation25_spill] sm:$0xff] %v5603_v50  ;;  %v5609_v25 = vadd.f32 %v1908_v15, %v5304_v22  ;;  %v1910_v2 = vpop.f32.mrb[75].mxu1  ;;  %v2131_v1 = vmul.f32 %v5603_v50, %v5603_v50 }
 0x303   : > { %6657 = vst [vmem:[#allocation26_spill] sm:$0xff] %v5606_v57  ;;  %v2132_v7 = vmul.f32 %v5606_v57, %v5606_v57  ;;  %v5616_v55 = vadd.f32 %v1910_v2, %v5312_v52  ;;  %v2023_v24 = vadd.f32 %v5606_v57, %v5603_v50 }
 0x304   : > { %6658 = vst [vmem:[#allocation27_spill] sm:$0xff] %v5609_v25  ;;  %v2133_v23 = vmul.f32 %v5609_v25, %v5609_v25 }
 0x305   : > { %6659 = vst [vmem:[#allocation28_spill] sm:$0xff] %v5616_v55  ;;  %v2134_v14 = vmul.f32 %v5616_v55, %v5616_v55  ;;  %2024 = vadd.xlane.f32.xlu0 %v2023_v24  ;;  %v2026_v3 = vadd.f32 %v5616_v55, %v5609_v25  ;;  %v2215_v51 = vadd.f32 %v2132_v7, %v2131_v1 }
 0x307   : > { %2027 = vadd.xlane.f32.xlu1 %v2026_v3  ;;  %v2218_v17 = vadd.f32 %v2134_v14, %v2133_v23 }
 0x309   : > { %2216 = vadd.xlane.f32.xlu0 %v2215_v51 }
 0x30b   : > { %v1914_v62 = vpop.f32.mrb[76].mxu1  ;;  %2219 = vadd.xlane.f32.xlu1 %v2218_v17 }
 0x30c   : > { %v5627_v12 = vadd.f32 %v1914_v62, %v5304_v22  ;;  %v1916_v54 = vpop.f32.mrb[77].mxu1 }
 0x30d   : > { %v5630_v47 = vadd.f32 %v1916_v54, %v5312_v52  ;;  %v1918_v33 = vpop.f32.mrb[78].mxu1 }
 0x30e   : > { %6660 = vst [vmem:[#allocation34_spill] sm:$0xff] %v5627_v12  ;;  %v5633_v15 = vadd.f32 %v1918_v33, %v5304_v22  ;;  %v1920_v2 = vpop.f32.mrb[79].mxu1  ;;  %v2135_v24 = vmul.f32 %v5627_v12, %v5627_v12 }
 0x30f   : > { %6661 = vst [vmem:[#allocation36_spill] sm:$0xff] %v5630_v47  ;;  %v2136_v1 = vmul.f32 %v5630_v47, %v5630_v47  ;;  %v5640_v7 = vadd.f32 %v1920_v2, %v5312_v52  ;;  %v2029_v23 = vadd.f32 %v5630_v47, %v5627_v12 }
 0x310   : > { %6662 = vst [vmem:[#allocation43_spill] sm:$0xff] %v5633_v15  ;;  %v2137_v14 = vmul.f32 %v5633_v15, %v5633_v15 }
 0x311   : > { %6663 = vst [vmem:[#allocation44_spill] sm:$0xff] %v5640_v7  ;;  %v2138_v3 = vmul.f32 %v5640_v7, %v5640_v7  ;;  %2030 = vadd.xlane.f32.xlu0 %v2029_v23  ;;  %v2032_v51 = vadd.f32 %v5640_v7, %v5633_v15  ;;  %v2221_v62 = vadd.f32 %v2136_v1, %v2135_v24 }
 0x313   : > { %2033 = vadd.xlane.f32.xlu1 %v2032_v51  ;;  %v2224_v12 = vadd.f32 %v2138_v3, %v2137_v14 }
 0x314   : > { %v1924_v17 = vpop.f32.mrb[80].mxu1 }
 0x315   : > { %v5651_v54 = vadd.f32 %v1924_v17, %v5304_v22  ;;  %v1926_v33 = vpop.f32.mrb[81].mxu1  ;;  %2222 = vadd.xlane.f32.xlu0 %v2221_v62 }
 0x316   : > { %v5654_v2 = vadd.f32 %v1926_v33, %v5312_v52  ;;  %v1928_v47 = vpop.f32.mrb[82].mxu1 }
 0x317   : > { %6664 = vst [vmem:[#allocation8_spill] sm:$0xff] %v5651_v54  ;;  %v5657_v55 = vadd.f32 %v1928_v47, %v5304_v22  ;;  %v1930_v23 = vpop.f32.mrb[83].mxu1  ;;  %v2139_v7 = vmul.f32 %v5651_v54, %v5651_v54  ;;  %2225 = vadd.xlane.f32.xlu1 %v2224_v12 }
 0x318   : > { %6665 = vst [vmem:[#allocation9_spill] sm:$0xff] %v5654_v2  ;;  %v2140_v24 = vmul.f32 %v5654_v2, %v5654_v2  ;;  %v5664_v1 = vadd.f32 %v1930_v23, %v5312_v52  ;;  %v2035_v51 = vadd.f32 %v5654_v2, %v5651_v54 }
 0x319   : > { %6666 = vst [vmem:[#allocation10_spill] sm:$0xff] %v5657_v55  ;;  %v2141_v14 = vmul.f32 %v5657_v55, %v5657_v55 }
 0x31a   : > { %6667 = vst [vmem:[#allocation11_spill] sm:$0xff] %v5664_v1  ;;  %v2142_v47 = vmul.f32 %v5664_v1, %v5664_v1  ;;  %2036 = vadd.xlane.f32.xlu0 %v2035_v51  ;;  %v2038_v3 = vadd.f32 %v5664_v1, %v5657_v55  ;;  %v2227_v62 = vadd.f32 %v2140_v24, %v2139_v7 }
 0x31c   : > { %2039 = vadd.xlane.f32.xlu1 %v2038_v3  ;;  %v1934_v17 = vpop.f32.mrb[84].mxu1  ;;  %v2230_v54 = vadd.f32 %v2142_v47, %v2141_v14 }
 0x31d   : > { %v5675_v33 = vadd.f32 %v1934_v17, %v5304_v22  ;;  %v1936_v12 = vpop.f32.mrb[85].mxu1  ;;  %v1965_v17 = vpop.xlane.xlu0 %1964 }
 0x31e   : > { %v5678_v23 = vadd.f32 %v1936_v12, %v5312_v52  ;;  %2228 = vadd.xlane.f32.xlu0 %v2227_v62  ;;  %v1938_v2 = vpop.f32.mrb[86].mxu1  ;;  %v5701_v55 = vmul.f32 0.00390625, %v1965_v17 }
 0x31f   : > { %6668 = vst [vmem:[#allocation12_spill] sm:$0xff] %v5675_v33  ;;  %v5681_v15 = vadd.f32 %v1938_v2, %v5304_v22  ;;  %v1940_v51 = vpop.f32.mrb[87].mxu1  ;;  %v2143_v1 = vmul.f32 %v5675_v33, %v5675_v33 }
 0x320   : > { %6669 = vst [vmem:[#allocation33_spill] sm:$0xff] %v5678_v23  ;;  %v2144_v7 = vmul.f32 %v5678_v23, %v5678_v23  ;;  %v5688_v24 = vadd.f32 %v1940_v51, %v5312_v52  ;;  %2231 = vadd.xlane.f32.xlu1 %v2230_v54  ;;  %v2041_v3 = vadd.f32 %v5678_v23, %v5675_v33  ;;  %v1968_v23 = vpop.xlane.xlu1 %1967 }
 0x321   : > { %6670 = vst [vmem:[#allocation35_spill] sm:$0xff] %v5681_v15  ;;  %v2145_v14 = vmul.f32 %v5681_v15, %v5681_v15  ;;  %v5706_v57 = vmul.f32 0.00390625, %v1968_v23 }
 0x322   : > { %6671 = vst [vmem:[#allocation13_spill] sm:$0xff] %v5688_v24  ;;  %v2146_v2 = vmul.f32 %v5688_v24, %v5688_v24  ;;  %2042 = vadd.xlane.f32.xlu0 %v2041_v3  ;;  %v2044_v47 = vadd.f32 %v5688_v24, %v5681_v15  ;;  %v2233_v12 = vadd.f32 %v2144_v7, %v2143_v1  ;;  %v2157_v1 = vpop.xlane.xlu0 %2156 }
 0x324   : > { %2045 = vadd.xlane.f32.xlu1 %v2044_v47  ;;  %v1944_v62 = vpop.f32.mrb[88].mxu1  ;;  %v2236_v3 = vadd.f32 %v2146_v2, %v2145_v14  ;;  %v2251_v2 = vmul.f32 0.00390625, %v2157_v1 }
 0x325   : > { %v5699_v51 = vadd.f32 %v1944_v62, %v5304_v22  ;;  %v1946_v54 = vpop.f32.mrb[89].mxu1 }
 0x326   : > { %v5704_v33 = vadd.f32 %v1946_v54, %v5312_v52  ;;  %2234 = vadd.xlane.f32.xlu0 %v2233_v12  ;;  %v1948_v25 = vpop.f32.mrb[90].mxu1  ;;  %v2160_v12 = vpop.xlane.xlu1 %2159 }
 0x327   : > { %6672 = vst [vmem:[#allocation14_spill] sm:$0xff] %v5699_v51  ;;  %v5709_v24 = vadd.f32 %v1948_v25, %v5304_v22  ;;  %v1950_v47 = vpop.f32.mrb[91].mxu1  ;;  %v2147_v7 = vmul.f32 %v5699_v51, %v5699_v51  ;;  %v2283_v25 = vmul.f32 %v5701_v55, %v5701_v55  ;;  %v2252_v15 = vmul.f32 0.00390625, %v2160_v12 }
 0x328   : > { %6673 = vst [vmem:[#allocation15_spill] sm:$0xff] %v5704_v33  ;;  %v2148_v17 = vmul.f32 %v5704_v33, %v5704_v33  ;;  %v5716_v62 = vadd.f32 %v1950_v47, %v5312_v52  ;;  %2237 = vadd.xlane.f32.xlu1 %v2236_v3  ;;  %v2047_v14 = vadd.f32 %v5704_v33, %v5699_v51 }
 0x329   : > { %6674 = vst [vmem:[#allocation16_spill] sm:$0xff] %v5709_v24  ;;  %v2149_v23 = vmul.f32 %v5709_v24, %v5709_v24  ;;  %v2284_v3 = vmul.f32 %v5706_v57, %v5706_v57  ;;  %v2315_v33 = vsub.f32 %v2251_v2, %v2283_v25 }
 0x32a   : > { %6675 = vst [vmem:[#allocation42_spill] sm:$0xff] %v5716_v62  ;;  %v2150_v54 = vmul.f32 %v5716_v62, %v5716_v62  ;;  %2048 = vadd.xlane.f32.xlu0 %v2047_v14  ;;  %v2050_v47 = vadd.f32 %v5716_v62, %v5709_v24  ;;  %v2239_v50 = vadd.f32 %v2148_v17, %v2147_v7 }
 0x32b   : > { %v2316_v44 = vsub.f32 %v2252_v15, %v2284_v3  ;;  %v2347_v20 = vmax.f32 %v2315_v33, 0.0 }
 0x32c   : > { %2051 = vadd.xlane.f32.xlu1 %v2050_v47  ;;  %v1954_v51 = vpop.f32.mrb[92].mxu1  ;;  %v2242_v62 = vadd.f32 %v2150_v54, %v2149_v23 }
 0x32d   : > { %v5731_v35 = vadd.f32 %v1954_v51, %v5304_v22  ;;  %v1956_v1 = vpop.f32.mrb[93].mxu1  ;;  %v2348_v24 = vmax.f32 %v2316_v44, 0.0  ;;  %v2379_v15 = vadd.f32 1e-05, %v2347_v20  ;;  %v1971_v44 = vpop.xlane.xlu0 %1970 }
 0x32e   : > { %v5734_v31 = vadd.f32 %v1956_v1, %v5312_v52  ;;  %2240 = vadd.xlane.f32.xlu0 %v2239_v50  ;;  %v1958_v14 = vpop.f32.mrb[94].mxu1  ;;  %v5748_v23 = vmul.f32 0.00390625, %v1971_v44  ;;  %v2645_v44 = vsub.s32 5, %v6651_v46 }
 0x32f   : > { %v2151_v12 = vmul.f32 %v5731_v35, %v5731_v35  ;;  %v5739_v25 = vadd.f32 %v1958_v14, %v5304_v22  ;;  %v1960_v7 = vpop.f32.mrb[95].mxu1  ;;  %v2380_v17 = vadd.f32 1e-05, %v2348_v24  ;;  %3796 = vrsqrt.f32 %v2379_v15 }
 0x330   : > { %6676 = vst [vmem:[#allocation41_spill] sm:$0xff] %v5734_v31  ;;  %v2152_v51 = vmul.f32 %v5734_v31, %v5734_v31  ;;  %v5744_v33 = vadd.f32 %v1960_v7, %v5312_v52  ;;  %2243 = vadd.xlane.f32.xlu1 %v2242_v62  ;;  %v2053_v50 = vadd.f32 %v5734_v31, %v5731_v35  ;;  %v1974_v62 = vpop.xlane.xlu1 %1973  ;;  %v2573_v14 = vsub.s32 4, %v6651_v46 }
 0x331   : > { %6677 = vst [vmem:[#allocation21_spill] sm:$0xff] %v5739_v25  ;;  %v2153_v22 = vmul.f32 %v5739_v25, %v5739_v25  ;;  %3798 = vrsqrt.f32 %v2380_v17  ;;  %v5756_v2 = vmul.f32 0.00390625, %v1974_v62  ;;  %v2163_v54 = vpop.xlane.xlu0 %2162  ;;  %v2285_v47 = vmul.f32 %v5748_v23, %v5748_v23 }
 0x332   : > { %6678 = vst [vmem:[#allocation22_spill] sm:$0xff] %v5744_v33  ;;  %v2154_v20 = vmul.f32 %v5744_v33, %v5744_v33  ;;  %2054 = vadd.xlane.f32.xlu0 %v2053_v50  ;;  %v2056_v52 = vadd.f32 %v5744_v33, %v5739_v25  ;;  %v2245_v24 = vadd.f32 %v2152_v51, %v2151_v12  ;;  %v2253_v3 = vmul.f32 0.00390625, %v2163_v54 }
 0x333   : > { %v2286_v50 = vmul.f32 %v5756_v2, %v5756_v2  ;;  %v2443_v51 = vsub.f32 %v5315_v8, %v5701_v55  ;;  %v2444_v62 = vsub.f32 %v5318_v39, %v5701_v55  ;;  %v2445_v54 = vsub.f32 %v5321_v37, %v5706_v57 }
 0x334   : > { %2057 = vadd.xlane.f32.xlu1 %v2056_v52  ;;  %v2248_v1 = vadd.f32 %v2154_v20, %v2153_v22  ;;  %v2166_v7 = vpop.xlane.xlu1 %2165  ;;  %v2317_v15 = vsub.f32 %v2253_v3, %v2285_v47  ;;  %v5769_v22 = vrot.slane %v5301_v59, %v2573_v14  ;;  %v5772_v20 = vrot.slane %v5309_v61, %v2573_v14 }
 0x335   : > { %v2254_v17 = vmul.f32 0.00390625, %v2166_v7  ;;  %v2446_v8 = vsub.f32 %v5324_v63, %v5706_v57  ;;  %v1977_v55 = vpop.xlane.xlu0 %1976 }
 0x336   : > { %2246 = vadd.xlane.f32.xlu0 %v2245_v24  ;;  %v2349_v52 = vmax.f32 %v2317_v15, 0.0  ;;  %v5784_v46 = vmul.f32 0.00390625, %v1977_v55 }
 0x337   : > { %v2318_v12 = vsub.f32 %v2254_v17, %v2286_v50  ;;  %v5782_v50 = vrot.slane %v5309_v61, %v2645_v44 }
 0x338   : > { %2249 = vadd.xlane.f32.xlu1 %v2248_v1  ;;  %v2381_v47 = vadd.f32 1e-05, %v2349_v52  ;;  %v5777_v1 = vrot.slane %v5301_v59, %v2645_v44  ;;  %v1980_v52 = vpop.xlane.xlu1 %1979 }
 0x339   : > { %v3797_v24 = vpop.eup %3796  ;;  %v2350_v3 = vmax.f32 %v2318_v12, 0.0  ;;  %v5789_v63 = vmul.f32 0.00390625, %v1980_v52  ;;  %v2169_v57 = vpop.xlane.xlu0 %2168  ;;  %v2449_v52 = vsub.f32 %v5345_v48, %v5756_v2 }
 0x33a   : > { %v2507_v39 = vmul.f32 %v3797_v24, %v2443_v51  ;;  %v2508_v15 = vmul.f32 %v3797_v24, %v2444_v62  ;;  %3800 = vrsqrt.f32 %v2381_v47  ;;  %v2287_v51 = vmul.f32 %v5784_v46, %v5784_v46 }
 0x33b   : > { %v3799_v7 = vpop.eup %3798  ;;  %v2382_v17 = vadd.f32 1e-05, %v2350_v3  ;;  %v2255_v62 = vmul.f32 0.00390625, %v2169_v57  ;;  %v2447_v47 = vsub.f32 %v5339_v28, %v5748_v23  ;;  %v2288_v3 = vmul.f32 %v5789_v63, %v5789_v63 }
 0x33c   : > { %v2509_v14 = vmul.f32 %v3799_v7, %v2445_v54  ;;  %v2579_v37 = vmul.f32 %v5769_v22, %v2507_v39  ;;  %v2510_v59 = vmul.f32 %v3799_v7, %v2446_v8  ;;  %v2580_v12 = vmul.f32 %v5772_v20, %v2508_v15  ;;  %v2172_v7 = vpop.xlane.xlu1 %2171 }
 0x33d   : > { %3802 = vrsqrt.f32 %v2382_v17  ;;  %v2319_v39 = vsub.f32 %v2255_v62, %v2287_v51  ;;  %v2256_v55 = vmul.f32 0.00390625, %v2172_v7  ;;  %v2450_v51 = vsub.f32 %v5348_v43, %v5756_v2 }
 0x33e   : > { %v2581_v33 = vmul.f32 %v5769_v22, %v2509_v14  ;;  %v2582_v61 = vmul.f32 %v5772_v20, %v2510_v59  ;;  %v2652_v44 = vadd.f32 %v5782_v50, %v2580_v12  ;;  %v2651_v24 = vadd.f32 %v5777_v1, %v2579_v37 }
 0x33f   : > { %v2448_v14 = vsub.f32 %v5342_v9, %v5748_v23  ;;  %v2320_v37 = vsub.f32 %v2256_v55, %v2288_v3 }
 0x340   : > { %v2653_v54 = vadd.f32 %v5777_v1, %v2581_v33  ;;  %v2654_v8 = vadd.f32 %v5782_v50, %v2582_v61  ;;  %vm2716_vm2 = vcmp.ge.f32.partialorder %v2652_v44, 0.0  ;;  %v2780_v15 = vmul.f32 0.01, %v2652_v44 }
 0x341   : > { %vm2715_vm4 = vcmp.ge.f32.partialorder %v2651_v24, 0.0  ;;  %v2351_v33 = vmax.f32 %v2319_v39, 0.0  ;;  %v2779_v28 = vmul.f32 0.01, %v2651_v24  ;;  %v2352_v7 = vmax.f32 %v2320_v37, 0.0 }
 0x342   : > { %vm2718_vm3 = vcmp.ge.f32.partialorder %v2654_v8, 0.0  ;;  %v2782_v17 = vmul.f32 0.01, %v2654_v8  ;;  %vm2717_vm5 = vcmp.ge.f32.partialorder %v2653_v54, 0.0  ;;  %v2844_v59 = vsel %vm2716_vm2, %v2652_v44, %v2780_v15  ;;  %v1983_v9 = vpop.xlane.xlu0 %1982 }
 0x343   : > { %v2781_v57 = vmul.f32 0.01, %v2653_v54  ;;  %v2383_v62 = vadd.f32 1e-05, %v2351_v33  ;;  %v5808_v25 = vmul.f32 0.00390625, %v1983_v9  ;;  %v2843_v3 = vsel %vm2715_vm4, %v2651_v24, %v2779_v28 }
 0x344   : > { %v2846_v12 = vsel %vm2718_vm3, %v2654_v8, %v2782_v17  ;;  %v3801_v61 = vpop.eup %3800  ;;  %v2384_v48 = vadd.f32 1e-05, %v2352_v7  ;;  %v1986_v44 = vpop.xlane.xlu1 %1985 }
 0x345   : > { %v2908_v23 = vpack.c.bf16 %v2846_v12, %v2844_v59  ;;  %v2845_v39 = vsel %vm2717_vm5, %v2653_v54, %v2781_v57  ;;  %v2512_v55 = vmul.f32 %v3801_v61, %v2448_v14  ;;  %3804 = vrsqrt.f32 %v2383_v62 }
 0x346   : > { %v2907_v8 = vpack.c.bf16 %v2845_v39, %v2843_v3  ;;  %v2511_v15 = vmul.f32 %v3801_v61, %v2447_v47  ;;  %v5811_v17 = vmul.f32 0.00390625, %v1986_v44  ;;  %3806 = vrsqrt.f32 %v2384_v48  ;;  %v2175_v43 = vpop.xlane.xlu0 %2174 }
 0x347   : > { %v3803_v31 = vpop.eup %3802  ;;  %3099 = vmatprep.mubr.bf16.mxu0 %v2908_v23  ;;  %v2584_v33 = vmul.f32 %v5772_v20, %v2512_v55  ;;  %v2289_v24 = vmul.f32 %v5808_v25, %v5808_v25  ;;  %v2257_v54 = vmul.f32 0.00390625, %v2175_v43  ;;  %v2452_v3 = vsub.f32 %v5369_v13, %v5784_v46 }
 0x348   : > { %3100 = vmatmul.mubr.bf16.vlgmr.msra.gmra.mrb[32].mxu0 %v2907_v8  ;;  %v2514_v2 = vmul.f32 %v3803_v31, %v2450_v51  ;;  %v2513_v37 = vmul.f32 %v3803_v31, %v2449_v52  ;;  %v2178_v14 = vpop.xlane.xlu1 %2177  ;;  %v2583_v47 = vmul.f32 %v5769_v22, %v2511_v15  ;;  %v2290_v61 = vmul.f32 %v5811_v17, %v5811_v17 }
 0x349   : > { %v2656_v59 = vadd.f32 %v5782_v50, %v2584_v33  ;;  %v2321_v57 = vsub.f32 %v2257_v54, %v2289_v24  ;;  %v2258_v51 = vmul.f32 0.00390625, %v2178_v14  ;;  %v2454_v24 = vsub.f32 %v5375_v29, %v5789_v63 }
 0x34a   : > { %v2586_v28 = vmul.f32 %v5772_v20, %v2514_v2  ;;  %v2585_v12 = vmul.f32 %v5769_v22, %v2513_v37  ;;  %v2655_v62 = vadd.f32 %v5777_v1, %v2583_v47  ;;  %v2451_v47 = vsub.f32 %v5363_v38, %v5784_v46 }
 0x34b   : > { %vm2720_vm6 = vcmp.ge.f32.partialorder %v2656_v59, 0.0  ;;  %v2784_v52 = vmul.f32 0.01, %v2656_v59  ;;  %v2353_v7 = vmax.f32 %v2321_v57, 0.0  ;;  %v2322_v9 = vsub.f32 %v2258_v51, %v2290_v61 }
 0x34c   : > { %v2658_v31 = vadd.f32 %v5782_v50, %v2586_v28  ;;  %v2657_v23 = vadd.f32 %v5777_v1, %v2585_v12  ;;  %v2783_v33 = vmul.f32 0.01, %v2655_v62  ;;  %vm2719_vm9 = vcmp.ge.f32.partialorder %v2655_v62, 0.0 }
 0x34d   : > { %v2385_v55 = vadd.f32 1e-05, %v2353_v7  ;;  %v2354_v48 = vmax.f32 %v2322_v9, 0.0  ;;  %v1989_v44 = vpop.xlane.xlu0 %1988  ;;  %v2848_v8 = vsel %vm2720_vm6, %v2656_v59, %v2784_v52  ;;  %v2453_v29 = vsub.f32 %v5372_v30, %v5789_v63 }
 0x34e   : > { %vm2722_vm7 = vcmp.ge.f32.partialorder %v2658_v31, 0.0  ;;  %v2786_v39 = vmul.f32 0.01, %v2658_v31  ;;  %vm2721_vm8 = vcmp.ge.f32.partialorder %v2657_v23, 0.0  ;;  %v5827_v43 = vmul.f32 0.00390625, %v1989_v44 }
 0x34f   : > { %v3805_v15 = vpop.eup %3804  ;;  %v2785_v37 = vmul.f32 0.01, %v2657_v23  ;;  %v2386_v54 = vadd.f32 1e-05, %v2354_v48  ;;  %v1992_v14 = vpop.xlane.xlu1 %1991  ;;  %3808 = vrsqrt.f32 %v2385_v55  ;;  %v2847_v7 = vsel %vm2719_vm9, %v2655_v62, %v2783_v33 }
 0x350   : > { %v2850_v2 = vsel %vm2722_vm7, %v2658_v31, %v2786_v39  ;;  %v3807_v13 = vpop.eup %3806  ;;  %v5833_v59 = vmul.f32 0.00390625, %v1992_v14  ;;  %v2516_v61 = vmul.f32 %v3805_v15, %v2452_v3  ;;  %v2291_v31 = vmul.f32 %v5827_v43, %v5827_v43 }
 0x351   : > { %v2910_v28 = vpack.c.bf16 %v2850_v2, %v2848_v8  ;;  %3810 = vrsqrt.f32 %v2386_v54  ;;  %v2181_v12 = vpop.xlane.xlu0 %2180  ;;  %v2849_v57 = vsel %vm2721_vm8, %v2657_v23, %v2785_v37  ;;  %v2518_v51 = vmul.f32 %v3807_v13, %v2454_v24 }
 0x352   : > { %v2259_v52 = vmul.f32 0.00390625, %v2181_v12  ;;  %v2909_v46 = vpack.c.bf16 %v2849_v57, %v2847_v7  ;;  %v2588_v38 = vmul.f32 %v5772_v20, %v2516_v61  ;;  %v2515_v55 = vmul.f32 %v3805_v15, %v2451_v47 }
 0x353   : > { %3107 = vmatprep.mubr.bf16.mxu0 %v2910_v28  ;;  %v2184_v9 = vpop.xlane.xlu1 %2183  ;;  %v2590_v39 = vmul.f32 %v5772_v20, %v2518_v51  ;;  %v2292_v23 = vmul.f32 %v5833_v59, %v5833_v59  ;;  %v2517_v44 = vmul.f32 %v3807_v13, %v2453_v29  ;;  %v2455_v51 = vsub.f32 %v5399_v41, %v5808_v25 }
 0x354   : > { %v2323_v48 = vsub.f32 %v2259_v52, %v2291_v31  ;;  %v2260_v3 = vmul.f32 0.00390625, %v2184_v9  ;;  %3108 = vmatmul.mubr.bf16.gmra.mrb[36].mxu0 %v2909_v46  ;;  %v2660_v30 = vadd.f32 %v5782_v50, %v2588_v38  ;;  %v2587_v62 = vmul.f32 %v5769_v22, %v2515_v55 }
 0x355   : > { %v2662_v63 = vadd.f32 %v5782_v50, %v2590_v39  ;;  %v2589_v33 = vmul.f32 %v5769_v22, %v2517_v44  ;;  %v2456_v29 = vsub.f32 %v5402_v60, %v5808_v25  ;;  %v2457_v46 = vsub.f32 %v5405_v26, %v5811_v17 }
 0x356   : > { %v2355_v8 = vmax.f32 %v2323_v48, 0.0  ;;  %v2324_v2 = vsub.f32 %v2260_v3, %v2292_v23  ;;  %vm2724_vm10 = vcmp.ge.f32.partialorder %v2660_v30, 0.0  ;;  %v2788_v15 = vmul.f32 0.01, %v2660_v30 }
 0x357   : > { %vm2726_vm11 = vcmp.ge.f32.partialorder %v2662_v63, 0.0  ;;  %v2790_v37 = vmul.f32 0.01, %v2662_v63  ;;  %v2659_v28 = vadd.f32 %v5777_v1, %v2587_v62  ;;  %v2661_v13 = vadd.f32 %v5777_v1, %v2589_v33 }
 0x358   : > { %v2387_v24 = vadd.f32 1e-05, %v2355_v8  ;;  %v2356_v54 = vmax.f32 %v2324_v2, 0.0  ;;  %v2852_v12 = vsel %vm2724_vm10, %v2660_v30, %v2788_v15  ;;  %v2458_v38 = vsub.f32 %v5408_v19, %v5811_v17 }
 0x359   : > { %v1995_v14 = vpop.xlane.xlu0 %1994  ;;  %v2854_v57 = vsel %vm2726_vm11, %v2662_v63, %v2790_v37  ;;  %v3809_v61 = vpop.eup %3808  ;;  %vm2723_vm12 = vcmp.ge.f32.partialorder %v2659_v28, 0.0  ;;  %vm2725_vm13 = vcmp.ge.f32.partialorder %v2661_v13, 0.0  ;;  %v2787_v41 = vmul.f32 0.01, %v2659_v28 }
 0x35a   : > { %v5850_v47 = vmul.f32 0.00390625, %v1995_v14  ;;  %v2388_v31 = vadd.f32 1e-05, %v2356_v54  ;;  %v2912_v7 = vpack.c.bf16 %v2854_v57, %v2852_v12  ;;  %3812 = vrsqrt.f32 %v2387_v24 }
 0x35b   : > { %v1998_v52 = vpop.xlane.xlu1 %1997  ;;  %v3811_v9 = vpop.eup %3810  ;;  %v2789_v48 = vmul.f32 0.01, %v2661_v13  ;;  %v2851_v3 = vsel %vm2723_vm12, %v2659_v28, %v2787_v41  ;;  %v2520_v17 = vmul.f32 %v3809_v61, %v2456_v29  ;;  %v2519_v8 = vmul.f32 %v3809_v61, %v2455_v51 }
 0x35c   : > { %v5860_v39 = vmul.f32 0.00390625, %v1998_v52  ;;  %3115 = vmatprep.mubr.bf16.mxu0 %v2912_v7  ;;  %3814 = vrsqrt.f32 %v2388_v31  ;;  %v2293_v60 = vmul.f32 %v5850_v47, %v5850_v47  ;;  %v2522_v44 = vmul.f32 %v3811_v9, %v2458_v38 }
 0x35d   : > { %v2187_v55 = vpop.xlane.xlu0 %2186  ;;  %v2853_v19 = vsel %vm2725_vm13, %v2661_v13, %v2789_v48  ;;  %v2592_v2 = vmul.f32 %v5772_v20, %v2520_v17  ;;  %v2521_v15 = vmul.f32 %v3811_v9, %v2457_v46  ;;  %v2459_v37 = vsub.f32 %v5441_v36, %v5827_v43 }
 0x35e   : > { %v2261_v25 = vmul.f32 0.00390625, %v2187_v55  ;;  %v2294_v26 = vmul.f32 %v5860_v39, %v5860_v39  ;;  %v2911_v62 = vpack.c.bf16 %v2853_v19, %v2851_v3  ;;  %v2594_v33 = vmul.f32 %v5772_v20, %v2522_v44 }
 0x35f   : > { %v2190_v23 = vpop.xlane.xlu1 %2189  ;;  %v2591_v14 = vmul.f32 %v5769_v22, %v2519_v8  ;;  %v2460_v28 = vsub.f32 %v5447_v32, %v5827_v43  ;;  %v2664_v13 = vadd.f32 %v5782_v50, %v2592_v2  ;;  %v2593_v57 = vmul.f32 %v5769_v22, %v2521_v15 }
 0x360   : > { %v2325_v30 = vsub.f32 %v2261_v25, %v2293_v60  ;;  %v2262_v63 = vmul.f32 0.00390625, %v2190_v23  ;;  %3116 = vmatmul.mubr.bf16.gmra.mrb[40].mxu0 %v2911_v62  ;;  %v2666_v12 = vadd.f32 %v5782_v50, %v2594_v33  ;;  %v2461_v61 = vsub.f32 %v5450_v4, %v5833_v59 }
 0x361   : > { %v2462_v36 = vsub.f32 %v5453_v40, %v5833_v59  ;;  %v2792_v7 = vmul.f32 0.01, %v2664_v13  ;;  %v2663_v32 = vadd.f32 %v5777_v1, %v2591_v14  ;;  %vm2728_vm15 = vcmp.ge.f32.partialorder %v2664_v13, 0.0 }
 0x362   : > { %v2357_v24 = vmax.f32 %v2325_v30, 0.0  ;;  %v2326_v54 = vsub.f32 %v2262_v63, %v2294_v26  ;;  %vm2730_vm14 = vcmp.ge.f32.partialorder %v2666_v12, 0.0  ;;  %v2794_v46 = vmul.f32 0.01, %v2666_v12 }
 0x363   : > { %v2665_v38 = vadd.f32 %v5777_v1, %v2593_v57  ;;  %v2463_v4 = vsub.f32 %v5477_v49, %v5850_v47  ;;  %v2464_v40 = vsub.f32 %v5480_v21, %v5850_v47  ;;  %v2465_v48 = vsub.f32 %v5483_v45, %v5860_v39 }
 0x364   : > { %v2389_v51 = vadd.f32 1e-05, %v2357_v24  ;;  %v2358_v29 = vmax.f32 %v2326_v54, 0.0  ;;  %v3813_v55 = vpop.eup %3812  ;;  %v2858_v26 = vsel %vm2730_vm14, %v2666_v12, %v2794_v46  ;;  %v2856_v19 = vsel %vm2728_vm15, %v2664_v13, %v2792_v7 }
 0x365   : > { %v2001_v31 = vpop.xlane.xlu0 %2000  ;;  %vm2727_vm0 = vcmp.ge.f32.partialorder %v2663_v32, 0.0  ;;  %v2914_v44 = vpack.c.bf16 %v2858_v26, %v2856_v19  ;;  %vm2729_vm1 = vcmp.ge.f32.partialorder %v2665_v38, 0.0  ;;  %v2791_v30 = vmul.f32 0.01, %v2663_v32 }
 0x366   : > { %v5880_v52 = vmul.f32 0.00390625, %v2001_v31  ;;  %v2390_v43 = vadd.f32 1e-05, %v2358_v29  ;;  %3816 = vrsqrt.f32 %v2389_v51  ;;  %v3815_v41 = vpop.eup %3814  ;;  %v2793_v63 = vmul.f32 0.01, %v2665_v38 }
 0x367   : > { %v2004_v9 = vpop.xlane.xlu1 %2003  ;;  %v2524_v2 = vmul.f32 %v3813_v55, %v2460_v28  ;;  %v2526_v33 = vmul.f32 %v3815_v41, %v2462_v36  ;;  %3123 = vmatprep.mubr.bf16.mxu0 %v2914_v44  ;;  %v2855_v15 = vsel %vm2727_vm0, %v2663_v32, %v2791_v30  ;;  %v2523_v54 = vmul.f32 %v3813_v55, %v2459_v37 }
 0x368   : > { %v5888_v59 = vmul.f32 0.00390625, %v2004_v9  ;;  %3818 = vrsqrt.f32 %v2390_v43  ;;  %v2295_v60 = vmul.f32 %v5880_v52, %v5880_v52  ;;  %v2857_v24 = vsel %vm2729_vm1, %v2665_v38, %v2793_v63 }
 0x369   : > { %v2193_v25 = vpop.xlane.xlu0 %2192  ;;  %v2525_v14 = vmul.f32 %v3815_v41, %v2461_v61  ;;  %v2913_v51 = vpack.c.bf16 %v2857_v24, %v2855_v15  ;;  %v2596_v13 = vmul.f32 %v5772_v20, %v2524_v2  ;;  %v2466_v29 = vsub.f32 %v5486_v0, %v5860_v39 }
 0x36a   : > { %v2263_v23 = vmul.f32 0.00390625, %v2193_v25  ;;  %v2296_v3 = vmul.f32 %v5888_v59, %v5888_v59  ;;  %v2598_v31 = vmul.f32 %v5772_v20, %v2526_v33  ;;  %v2595_v7 = vmul.f32 %v5769_v22, %v2523_v54 }
 0x36b   : > { %v2196_v17 = vpop.xlane.xlu1 %2195  ;;  %v2597_v28 = vmul.f32 %v5769_v22, %v2525_v14  ;;  %v2467_v36 = vsub.f32 %v5507_v6, %v5880_v52  ;;  %3124 = vmatmul.mubr.bf16.gmra.mrb[44].mxu0 %v2913_v51  ;;  %v2668_v43 = vadd.f32 %v5782_v50, %v2596_v13  ;;  %v2470_v19 = vsub.f32 %v5516_v27, %v5888_v59 }
 0x36c   : > { %v2327_v62 = vsub.f32 %v2263_v23, %v2295_v60  ;;  %v2264_v8 = vmul.f32 0.00390625, %v2196_v17  ;;  %v2670_v46 = vadd.f32 %v5782_v50, %v2598_v31  ;;  %v2667_v0 = vadd.f32 %v5777_v1, %v2595_v7 }
 0x36d   : > { %v2669_v38 = vadd.f32 %v5777_v1, %v2597_v28  ;;  %vm2732_vm2 = vcmp.ge.f32.partialorder %v2668_v43, 0.0  ;;  %v2796_v25 = vmul.f32 0.01, %v2668_v43  ;;  %v2468_v23 = vsub.f32 %v5510_v16, %v5880_v52 }
 0x36e   : > { %v2359_v12 = vmax.f32 %v2327_v62, 0.0  ;;  %v2328_v57 = vsub.f32 %v2264_v8, %v2296_v3  ;;  %v2469_v3 = vsub.f32 %v5513_v34, %v5888_v59  ;;  %vm2734_vm3 = vcmp.ge.f32.partialorder %v2670_v46, 0.0 }
 0x36f   : > { %v2798_v62 = vmul.f32 0.01, %v2670_v46  ;;  %v2860_v2 = vsel %vm2732_vm2, %v2668_v43, %v2796_v25  ;;  %vm2731_vm4 = vcmp.ge.f32.partialorder %v2667_v0, 0.0  ;;  %vm2733_vm5 = vcmp.ge.f32.partialorder %v2669_v38, 0.0 }
 0x370   : > { %v2391_v32 = vadd.f32 1e-05, %v2359_v12  ;;  %v2360_v37 = vmax.f32 %v2328_v57, 0.0  ;;  %v2007_v61 = vpop.xlane.xlu0 %2006  ;;  %v3817_v55 = vpop.eup %3816  ;;  %v2795_v24 = vmul.f32 0.01, %v2667_v0 }
 0x371   : > { %v5907_v9 = vmul.f32 0.00390625, %v2007_v61  ;;  %v2862_v15 = vsel %vm2734_vm3, %v2670_v46, %v2798_v62  ;;  %v2797_v57 = vmul.f32 0.01, %v2669_v38  ;;  %v2528_v13 = vmul.f32 %v3817_v55, %v2464_v40 }
 0x372   : > { %3820 = vrsqrt.f32 %v2391_v32  ;;  %v2392_v41 = vadd.f32 1e-05, %v2360_v37  ;;  %v2010_v60 = vpop.xlane.xlu1 %2009  ;;  %v3819_v26 = vpop.eup %3818  ;;  %v2916_v12 = vpack.c.bf16 %v2862_v15, %v2860_v2  ;;  %v2859_v51 = vsel %vm2731_vm4, %v2667_v0, %v2795_v24 }
 0x373   : > { %v5918_v17 = vmul.f32 0.00390625, %v2010_v60  ;;  %v2471_v44 = vsub.f32 %v5531_v10, %v5907_v9  ;;  %v2297_v30 = vmul.f32 %v5907_v9, %v5907_v9  ;;  %v2530_v31 = vmul.f32 %v3819_v26, %v2466_v29 }
 0x374   : > { %v2199_v63 = vpop.xlane.xlu0 %2198  ;;  %3822 = vrsqrt.f32 %v2392_v41  ;;  %v2527_v7 = vmul.f32 %v3817_v55, %v2463_v4  ;;  %3131 = vmatprep.mubr.bf16.mxu0 %v2916_v12  ;;  %v2861_v37 = vsel %vm2733_vm5, %v2669_v38, %v2797_v57  ;;  %v2529_v61 = vmul.f32 %v3819_v26, %v2465_v48 }
 0x375   : > { %v2265_v8 = vmul.f32 0.00390625, %v2199_v63  ;;  %v2298_v16 = vmul.f32 %v5918_v17, %v5918_v17  ;;  %v2915_v43 = vpack.c.bf16 %v2861_v37, %v2859_v51  ;;  %v2600_v46 = vmul.f32 %v5772_v20, %v2528_v13 }
 0x376   : > { %v2202_v33 = vpop.xlane.xlu1 %2201  ;;  %v2602_v0 = vmul.f32 %v5772_v20, %v2530_v31  ;;  %v2599_v21 = vmul.f32 %v5769_v22, %v2527_v7  ;;  %v2472_v40 = vsub.f32 %v5534_v53, %v5907_v9  ;;  %v2601_v29 = vmul.f32 %v5769_v22, %v2529_v61 }
 0x377   : > { %v2329_v54 = vsub.f32 %v2265_v8, %v2297_v30  ;;  %v2266_v14 = vmul.f32 0.00390625, %v2202_v33  ;;  %v2473_v45 = vsub.f32 %v5537_v5, %v5918_v17  ;;  %3132 = vmatmul.mubr.bf16.gmra.mrb[48].mxu0 %v2915_v43  ;;  %v2672_v48 = vadd.f32 %v5782_v50, %v2600_v46 }
 0x378   : > { %v2674_v55 = vadd.f32 %v5782_v50, %v2602_v0  ;;  %v2474_v41 = vsub.f32 %v5540_v58, %v5918_v17  ;;  %v2671_v26 = vadd.f32 %v5777_v1, %v2599_v21  ;;  %v2673_v30 = vadd.f32 %v5777_v1, %v2601_v29 }
 0x379   : > { %v2361_v28 = vmax.f32 %v2329_v54, 0.0  ;;  %v2330_v32 = vsub.f32 %v2266_v14, %v2298_v16  ;;  %vm2736_vm6 = vcmp.ge.f32.partialorder %v2672_v48, 0.0  ;;  %v2800_v24 = vmul.f32 0.01, %v2672_v48 }
 0x37a   : > { %v2013_v4 = vpop.xlane.xlu0 %2012  ;;  %vm2738_vm7 = vcmp.ge.f32.partialorder %v2674_v55, 0.0  ;;  %v2802_v57 = vmul.f32 0.01, %v2674_v55  ;;  %vm2735_vm8 = vcmp.ge.f32.partialorder %v2671_v26, 0.0  ;;  %vm2737_vm9 = vcmp.ge.f32.partialorder %v2673_v30, 0.0 }
 0x37b   : > { %v2393_v49 = vadd.f32 1e-05, %v2361_v28  ;;  %v2362_v47 = vmax.f32 %v2330_v32, 0.0  ;;  %v5943_v39 = vmul.f32 0.00390625, %v2013_v4  ;;  %v2864_v51 = vsel %vm2736_vm6, %v2672_v48, %v2800_v24  ;;  %v6680_v24 = vld [vmem:[#allocation18_spill] sm:$0xff] }
 0x37c   : > { %v3821_v38 = vpop.eup %3820  ;;  %v2016_v25 = vpop.xlane.xlu1 %2015  ;;  %v2799_v31 = vmul.f32 0.01, %v2671_v26  ;;  %v2801_v7 = vmul.f32 0.01, %v2673_v30  ;;  %v2866_v28 = vsel %vm2738_vm7, %v2674_v55, %v2802_v57 }
 0x37d   : > { %v2394_v60 = vadd.f32 1e-05, %v2362_v47  ;;  %3824 = vrsqrt.f32 %v2393_v49  ;;  %v2475_v63 = vsub.f32 %v5555_v18, %v5943_v39  ;;  %v5953_v62 = vmul.f32 0.00390625, %v2016_v25 }
 0x37e   : > { %v2532_v8 = vmul.f32 %v3821_v38, %v2468_v23  ;;  %v3823_v16 = vpop.eup %3822  ;;  %v2476_v2 = vsub.f32 %v5558_v56, %v5943_v39  ;;  %v2299_v33 = vmul.f32 %v5943_v39, %v5943_v39  ;;  %v2205_v15 = vpop.xlane.xlu0 %2204  ;;  %v2531_v61 = vmul.f32 %v3821_v38, %v2467_v36 }
 0x37f   : > { %3826 = vrsqrt.f32 %v2394_v60  ;;  %v2267_v54 = vmul.f32 0.00390625, %v2205_v15  ;;  %v2300_v14 = vmul.f32 %v5953_v62, %v5953_v62  ;;  %v2534_v32 = vmul.f32 %v3823_v16, %v2470_v19 }
 0x380   : > { %v2208_v12 = vpop.xlane.xlu1 %2207  ;;  %v2604_v37 = vmul.f32 %v5772_v20, %v2532_v8  ;;  %v2918_v0 = vpack.c.bf16 %v2866_v28, %v2864_v51  ;;  %v2863_v21 = vsel %vm2735_vm8, %v2671_v26, %v2799_v31  ;;  %v2865_v49 = vsel %vm2737_vm9, %v2673_v30, %v2801_v7  ;;  %v6679_v8 = vld [vmem:[#allocation17_spill] sm:$0xff] }
 0x381   : > { %v2331_v23 = vsub.f32 %v2267_v54, %v2299_v33  ;;  %v2268_v13 = vmul.f32 0.00390625, %v2208_v12  ;;  %v2606_v47 = vmul.f32 %v5772_v20, %v2534_v32  ;;  %v2533_v27 = vmul.f32 %v3823_v16, %v2469_v3 }
 0x382   : > { %v2676_v4 = vadd.f32 %v5782_v50, %v2604_v37  ;;  %3139 = vmatprep.mubr.bf16.mxu0 %v2918_v0  ;;  %v2917_v55 = vpack.c.bf16 %v2865_v49, %v2863_v21  ;;  %v2603_v6 = vmul.f32 %v5769_v22, %v2531_v61  ;;  %v2477_v52 = vsub.f32 %v5561_v11, %v5953_v62  ;;  %v6681_v0 = vld [vmem:[#allocation19_spill] sm:$0xff] }
 0x383   : > { %v2363_v43 = vmax.f32 %v2331_v23, 0.0  ;;  %v2332_v46 = vsub.f32 %v2268_v13, %v2300_v14  ;;  %v2678_v38 = vadd.f32 %v5782_v50, %v2606_v47  ;;  %v2605_v34 = vmul.f32 %v5769_v22, %v2533_v27 }
 0x384   : > { %v2804_v60 = vmul.f32 0.01, %v2676_v4  ;;  %3140 = vmatmul.mubr.bf16.gmra.mrb[52].mxu0 %v2917_v55  ;;  %vm2740_vm10 = vcmp.ge.f32.partialorder %v2676_v4, 0.0  ;;  %v2675_v59 = vadd.f32 %v5777_v1, %v2603_v6  ;;  %v2478_v3 = vsub.f32 %v5568_v42, %v5953_v62 }
 0x385   : > { %v2395_v19 = vadd.f32 1e-05, %v2363_v43  ;;  %v2364_v29 = vmax.f32 %v2332_v46, 0.0  ;;  %vm2742_vm11 = vcmp.ge.f32.partialorder %v2678_v38, 0.0  ;;  %v2806_v57 = vmul.f32 0.01, %v2678_v38 }
 0x386   : > { %v2019_v48 = vpop.xlane.xlu0 %2018  ;;  %v2868_v13 = vsel %vm2740_vm10, %v2676_v4, %v2804_v60  ;;  %v2677_v28 = vadd.f32 %v5777_v1, %v2605_v34  ;;  %vm2739_vm12 = vcmp.ge.f32.partialorder %v2675_v59, 0.0  ;;  %v2803_v32 = vmul.f32 0.01, %v2675_v59 }
 0x387   : > { %v5976_v36 = vmul.f32 0.00390625, %v2019_v48  ;;  %v3825_v25 = vpop.eup %3824  ;;  %v2396_v26 = vadd.f32 1e-05, %v2364_v29  ;;  %3828 = vrsqrt.f32 %v2395_v19  ;;  %v2870_v7 = vsel %vm2742_vm11, %v2678_v38, %v2806_v57 }
 0x388   : > { %v2022_v30 = vpop.xlane.xlu1 %2021  ;;  %v2920_v43 = vpack.c.bf16 %v2870_v7, %v2868_v13  ;;  %v2536_v46 = vmul.f32 %v3825_v25, %v2472_v40  ;;  %vm2741_vm13 = vcmp.ge.f32.partialorder %v2677_v28, 0.0  ;;  %v2805_v49 = vmul.f32 0.01, %v2677_v28  ;;  %v6685_v7 = vld [vmem:[#allocation27_spill] sm:$0xff] }
 0x389   : > { %v2479_v16 = vsub.f32 %v6679_v8, %v5976_v36  ;;  %v5985_v33 = vmul.f32 0.00390625, %v2022_v30  ;;  %v3827_v15 = vpop.eup %3826  ;;  %v2480_v54 = vsub.f32 %v6680_v24, %v5976_v36  ;;  %v2301_v14 = vmul.f32 %v5976_v36, %v5976_v36  ;;  %v6693_v36 = vld [vmem:[#allocation10_spill] sm:$0xff] }
 0x38a   : > { %v2211_v12 = vpop.xlane.xlu0 %2210  ;;  %3830 = vrsqrt.f32 %v2396_v26  ;;  %v2538_v47 = vmul.f32 %v3827_v15, %v2474_v41  ;;  %3147 = vmatprep.mubr.bf16.mxu0 %v2920_v43  ;;  %v2608_v19 = vmul.f32 %v5772_v20, %v2536_v46  ;;  %v2535_v29 = vmul.f32 %v3825_v25, %v2471_v44  ;;  %v6682_v26 = vld [vmem:[#allocation20_spill] sm:$0xff] }
 0x38b   : > { %v2269_v51 = vmul.f32 0.00390625, %v2211_v12  ;;  %v2302_v23 = vmul.f32 %v5985_v33, %v5985_v33  ;;  %v2481_v21 = vsub.f32 %v6681_v0, %v5985_v33  ;;  %v2867_v53 = vsel %vm2739_vm12, %v2675_v59, %v2803_v32 }
 0x38c   : > { %v2214_v31 = vpop.xlane.xlu1 %2213  ;;  %v2869_v40 = vsel %vm2741_vm13, %v2677_v28, %v2805_v49  ;;  %v2610_v48 = vmul.f32 %v5772_v20, %v2538_v47  ;;  %v2537_v55 = vmul.f32 %v3827_v15, %v2473_v45  ;;  %v2680_v60 = vadd.f32 %v5782_v50, %v2608_v19  ;;  %v6683_v45 = vld [vmem:[#allocation25_spill] sm:$0xff] }
 0x38d   : > { %v2333_v37 = vsub.f32 %v2269_v51, %v2301_v14  ;;  %v2270_v61 = vmul.f32 0.00390625, %v2214_v31  ;;  %v2919_v38 = vpack.c.bf16 %v2869_v40, %v2867_v53  ;;  %v2482_v30 = vsub.f32 %v6682_v26, %v5985_v33  ;;  %v6684_v14 = vld [vmem:[#allocation26_spill] sm:$0xff] }
 0x38e   : > { %v2682_v10 = vadd.f32 %v5782_v50, %v2610_v48  ;;  %v2607_v9 = vmul.f32 %v5769_v22, %v2535_v29  ;;  %vm2744_vm14 = vcmp.ge.f32.partialorder %v2680_v60, 0.0  ;;  %v2808_v5 = vmul.f32 0.01, %v2680_v60 }
 0x38f   : > { %v2365_v4 = vmax.f32 %v2333_v37, 0.0  ;;  %v2334_v27 = vsub.f32 %v2270_v61, %v2302_v23  ;;  %3148 = vmatmul.mubr.bf16.gmra.mrb[56].mxu0 %v2919_v38  ;;  %v2609_v17 = vmul.f32 %v5769_v22, %v2537_v55 }
 0x390   : > { %vm2746_vm15 = vcmp.ge.f32.partialorder %v2682_v10, 0.0  ;;  %v2810_v31 = vmul.f32 0.01, %v2682_v10  ;;  %v2872_v61 = vsel %vm2744_vm14, %v2680_v60, %v2808_v5  ;;  %v2679_v49 = vadd.f32 %v5777_v1, %v2607_v9 }
 0x391   : > { %v2397_v6 = vadd.f32 1e-05, %v2365_v4  ;;  %v2366_v58 = vmax.f32 %v2334_v27, 0.0  ;;  %v3829_v44 = vpop.eup %3828  ;;  %v2681_v47 = vadd.f32 %v5777_v1, %v2609_v17 }
 0x392   : > { %v2025_v41 = vpop.xlane.xlu0 %2024  ;;  %v2874_v46 = vsel %vm2746_vm15, %v2682_v10, %v2810_v31  ;;  %v2540_v4 = vmul.f32 %v3829_v44, %v2476_v2  ;;  %vm2743_vm0 = vcmp.ge.f32.partialorder %v2679_v49, 0.0  ;;  %v2807_v40 = vmul.f32 0.01, %v2679_v49  ;;  %v6688_v31 = vld [vmem:[#allocation36_spill] sm:$0xff] }
 0x393   : > { %v6014_v34 = vmul.f32 0.00390625, %v2025_v41  ;;  %v2398_v25 = vadd.f32 1e-05, %v2366_v58  ;;  %3832 = vrsqrt.f32 %v2397_v6  ;;  %v2922_v29 = vpack.c.bf16 %v2874_v46, %v2872_v61 }
 0x394   : > { %v2028_v59 = vpop.xlane.xlu1 %2027  ;;  %v3831_v51 = vpop.eup %3830  ;;  %vm2745_vm1 = vcmp.ge.f32.partialorder %v2681_v47, 0.0  ;;  %v2809_v48 = vmul.f32 0.01, %v2681_v47  ;;  %v2612_v58 = vmul.f32 %v5772_v20, %v2540_v4  ;;  %v2871_v56 = vsel %vm2743_vm0, %v2679_v49, %v2807_v40  ;;  %v6689_v49 = vld [vmem:[#allocation43_spill] sm:$0xff] }
 0x395   : > { %v2483_v15 = vsub.f32 %v6683_v45, %v6014_v34  ;;  %v2484_v12 = vsub.f32 %v6684_v14, %v6014_v34  ;;  %v6023_v57 = vmul.f32 0.00390625, %v2028_v59  ;;  %3834 = vrsqrt.f32 %v2398_v25  ;;  %3155 = vmatprep.mubr.bf16.mxu0 %v2922_v29  ;;  %v6686_v59 = vld [vmem:[#allocation28_spill] sm:$0xff] }
 0x396   : > { %v2303_v23 = vmul.f32 %v6014_v34, %v6014_v34  ;;  %v2217_v13 = vpop.xlane.xlu0 %2216  ;;  %v2542_v53 = vmul.f32 %v3831_v51, %v2478_v3  ;;  %v2873_v2 = vsel %vm2745_vm1, %v2681_v47, %v2809_v48  ;;  %v2539_v38 = vmul.f32 %v3829_v44, %v2475_v63  ;;  %v6699_v34 = vld [vmem:[#allocation14_spill] sm:$0xff] }
 0x397   : > { %v2485_v28 = vsub.f32 %v6685_v7, %v6023_v57  ;;  %v2271_v32 = vmul.f32 0.00390625, %v2217_v13  ;;  %v2304_v37 = vmul.f32 %v6023_v57, %v6023_v57  ;;  %v2541_v42 = vmul.f32 %v3831_v51, %v2477_v52  ;;  %v6687_v51 = vld [vmem:[#allocation34_spill] sm:$0xff]  ;;  %v6701_v7 = vld [vmem:[#allocation16_spill] sm:$0xff] }
 0x398   : > { %v2220_v43 = vpop.xlane.xlu1 %2219  ;;  %v2614_v41 = vmul.f32 %v5772_v20, %v2542_v53  ;;  %v2921_v9 = vpack.c.bf16 %v2873_v2, %v2871_v56  ;;  %v2684_v25 = vadd.f32 %v5782_v50, %v2612_v58  ;;  %v2486_v5 = vsub.f32 %v6686_v59, %v6023_v57 }
 0x399   : > { %v2335_v27 = vsub.f32 %v2271_v32, %v2303_v23  ;;  %v2272_v19 = vmul.f32 0.00390625, %v2220_v43  ;;  %v2611_v18 = vmul.f32 %v5769_v22, %v2539_v38  ;;  %v2613_v62 = vmul.f32 %v5769_v22, %v2541_v42 }
 0x39a   : > { %v2686_v23 = vadd.f32 %v5782_v50, %v2614_v41  ;;  %3156 = vmatmul.mubr.bf16.gmra.mrb[60].mxu0 %v2921_v9  ;;  %vm2748_vm2 = vcmp.ge.f32.partialorder %v2684_v25, 0.0  ;;  %v2812_v11 = vmul.f32 0.01, %v2684_v25 }
 0x39b   : > { %v2367_v55 = vmax.f32 %v2335_v27, 0.0  ;;  %v2336_v6 = vsub.f32 %v2272_v19, %v2304_v37  ;;  %v2683_v40 = vadd.f32 %v5777_v1, %v2611_v18  ;;  %v2685_v48 = vadd.f32 %v5777_v1, %v2613_v62 }
 0x39c   : > { %vm2750_vm3 = vcmp.ge.f32.partialorder %v2686_v23, 0.0  ;;  %v2814_v46 = vmul.f32 0.01, %v2686_v23  ;;  %v2876_v19 = vsel %vm2748_vm2, %v2684_v25, %v2812_v11 }
 0x39d   : > { %v2399_v3 = vadd.f32 1e-05, %v2367_v55  ;;  %v2368_v60 = vmax.f32 %v2336_v6, 0.0  ;;  %v3833_v39 = vpop.eup %3832  ;;  %vm2747_vm4 = vcmp.ge.f32.partialorder %v2683_v40, 0.0  ;;  %vm2749_vm5 = vcmp.ge.f32.partialorder %v2685_v48, 0.0 }
 0x39e   : > { %v2031_v10 = vpop.xlane.xlu0 %2030  ;;  %v2878_v53 = vsel %vm2750_vm3, %v2686_v23, %v2814_v46  ;;  %v2544_v55 = vmul.f32 %v3833_v39, %v2480_v54  ;;  %v2811_v38 = vmul.f32 0.01, %v2683_v40  ;;  %v2813_v42 = vmul.f32 0.01, %v2685_v48  ;;  %v6690_v54 = vld [vmem:[#allocation44_spill] sm:$0xff] }
 0x39f   : > { %v6051_v17 = vmul.f32 0.00390625, %v2031_v10  ;;  %v2400_v63 = vadd.f32 1e-05, %v2368_v60  ;;  %v6056_v52 = vpop.eup %3834  ;;  %3836 = vrsqrt.f32 %v2399_v3  ;;  %v2924_v41 = vpack.c.bf16 %v2878_v53, %v2876_v19 }
 0x3a0   : > { %v2034_v44 = vpop.xlane.xlu1 %2033  ;;  %v2546_v56 = vmul.f32 %v6056_v52, %v2482_v30  ;;  %v2616_v24 = vmul.f32 %v5772_v20, %v2544_v55  ;;  %v2875_v23 = vsel %vm2747_vm4, %v2683_v40, %v2811_v38  ;;  %v2877_v26 = vsel %vm2749_vm5, %v2685_v48, %v2813_v42 }
 0x3a1   : > { %v2487_v13 = vsub.f32 %v6687_v51, %v6051_v17  ;;  %v2488_v32 = vsub.f32 %v6688_v31, %v6051_v17  ;;  %v6062_v37 = vmul.f32 0.00390625, %v2034_v44  ;;  %3838 = vrsqrt.f32 %v2400_v63  ;;  %3163 = vmatprep.mubr.bf16.mxu0 %v2924_v41  ;;  %v6691_v44 = vld [vmem:[#allocation8_spill] sm:$0xff] }
 0x3a2   : > { %v2305_v61 = vmul.f32 %v6051_v17, %v6051_v17  ;;  %v2223_v43 = vpop.xlane.xlu0 %2222  ;;  %v2618_v30 = vmul.f32 %v5772_v20, %v2546_v56  ;;  %v2543_v62 = vmul.f32 %v3833_v39, %v2479_v16  ;;  %v2688_v19 = vadd.f32 %v5782_v50, %v2616_v24  ;;  %v6694_v16 = vld [vmem:[#allocation11_spill] sm:$0xff] }
 0x3a3   : > { %v2489_v47 = vsub.f32 %v6689_v49, %v6062_v37  ;;  %v2273_v4 = vmul.f32 0.00390625, %v2223_v43  ;;  %v2306_v27 = vmul.f32 %v6062_v37, %v6062_v37  ;;  %v2490_v9 = vsub.f32 %v6690_v54, %v6062_v37 }
 0x3a4   : > { %v2226_v29 = vpop.xlane.xlu1 %2225  ;;  %v2690_v55 = vadd.f32 %v5782_v50, %v2618_v30  ;;  %vm2752_vm6 = vcmp.ge.f32.partialorder %v2688_v19, 0.0  ;;  %v2816_v42 = vmul.f32 0.01, %v2688_v19  ;;  %v2615_v24 = vmul.f32 %v5769_v22, %v2543_v62 }
 0x3a5   : > { %v2337_v6 = vsub.f32 %v2273_v4, %v2305_v61  ;;  %v2274_v58 = vmul.f32 0.00390625, %v2226_v29  ;;  %v6692_v61 = vld [vmem:[#allocation9_spill] sm:$0xff] }
 0x3a6   : > { %vm2754_vm7 = vcmp.ge.f32.partialorder %v2690_v55, 0.0  ;;  %v2880_v62 = vsel %vm2752_vm6, %v2688_v19, %v2816_v42  ;;  %v6698_v19 = vld [vmem:[#allocation13_spill] sm:$0xff] }
 0x3a7   : > { %v2037_v2 = vpop.xlane.xlu0 %2036  ;;  %v2369_v3 = vmax.f32 %v2337_v6, 0.0  ;;  %v2338_v60 = vsub.f32 %v2274_v58, %v2306_v27  ;;  %v2923_v27 = vpack.c.bf16 %v2877_v26, %v2875_v23 }
 0x3a8   : > { %v6080_v10 = vmul.f32 0.00390625, %v2037_v2 }
 0x3a9   : > { %v2040_v25 = vpop.xlane.xlu1 %2039  ;;  %v2401_v18 = vadd.f32 1e-05, %v2369_v3  ;;  %v2370_v63 = vmax.f32 %v2338_v60, 0.0  ;;  %v3837_v29 = vpop.eup %3836  ;;  %3164 = vmatmul.mubr.bf16.gmra.mrb[64].mxu0 %v2923_v27  ;;  %v2818_v3 = vmul.f32 0.01, %v2690_v55  ;;  %v2545_v60 = vmul.f32 %v6056_v52, %v2481_v21  ;;  %v6695_v21 = vld [vmem:[#allocation12_spill] sm:$0xff] }
 0x3aa   : > { %v2491_v11 = vsub.f32 %v6691_v44, %v6080_v10  ;;  %v2492_v43 = vsub.f32 %v6692_v61, %v6080_v10  ;;  %v6093_v46 = vmul.f32 0.00390625, %v2040_v25  ;;  %v2307_v40 = vmul.f32 %v6080_v10, %v6080_v10 }
 0x3ab   : > { %v2229_v4 = vpop.xlane.xlu0 %2228  ;;  %v2402_v53 = vadd.f32 1e-05, %v2370_v63  ;;  %v6099_v6 = vpop.eup %3838  ;;  %3840 = vrsqrt.f32 %v2401_v18  ;;  %v2882_v18 = vsel %vm2754_vm7, %v2690_v55, %v2818_v3  ;;  %v2617_v63 = vmul.f32 %v5769_v22, %v2545_v60 }
 0x3ac   : > { %v2275_v48 = vmul.f32 0.00390625, %v2229_v4  ;;  %v2493_v8 = vsub.f32 %v6693_v36, %v6093_v46  ;;  %v2494_v39 = vsub.f32 %v6694_v16, %v6093_v46  ;;  %v2308_v58 = vmul.f32 %v6093_v46, %v6093_v46 }
 0x3ad   : > { %v2232_v41 = vpop.xlane.xlu1 %2231  ;;  %3842 = vrsqrt.f32 %v2402_v53  ;;  %v2687_v4 = vadd.f32 %v5777_v1, %v2615_v24  ;;  %v2548_v27 = vmul.f32 %v3837_v29, %v2484_v12  ;;  %v6696_v53 = vld [vmem:[#allocation33_spill] sm:$0xff] }
 0x3ae   : > { %v2339_v56 = vsub.f32 %v2275_v48, %v2307_v40  ;;  %v2276_v2 = vmul.f32 0.00390625, %v2232_v41  ;;  %v2689_v41 = vadd.f32 %v5777_v1, %v2617_v63 }
 0x3af   : > { %v2043_v38 = vpop.xlane.xlu0 %2042  ;;  %vm2751_vm8 = vcmp.ge.f32.partialorder %v2687_v4, 0.0 }
 0x3b0   : > { %v2371_v25 = vmax.f32 %v2339_v56, 0.0  ;;  %v2340_v23 = vsub.f32 %v2276_v2, %v2308_v58  ;;  %v6112_v26 = vmul.f32 0.00390625, %v2043_v38  ;;  %v2926_v58 = vpack.c.bf16 %v2882_v18, %v2880_v62  ;;  %v6697_v2 = vld [vmem:[#allocation35_spill] sm:$0xff] }
 0x3b1   : > { %v2046_v30 = vpop.xlane.xlu1 %2045  ;;  %vm2753_vm9 = vcmp.ge.f32.partialorder %v2689_v41, 0.0  ;;  %v2817_v18 = vmul.f32 0.01, %v2689_v41 }
 0x3b2   : > { %v2403_v33 = vadd.f32 1e-05, %v2371_v25  ;;  %v2372_v0 = vmax.f32 %v2340_v23, 0.0  ;;  %v2496_v40 = vsub.f32 %v6696_v53, %v6112_v26  ;;  %v6124_v48 = vmul.f32 0.00390625, %v2046_v30  ;;  %3171 = vmatprep.mubr.bf16.mxu0 %v2926_v58 }
 0x3b3   : > { %v2235_v55 = vpop.xlane.xlu0 %2234  ;;  %v2309_v14 = vmul.f32 %v6112_v26, %v6112_v26  ;;  %v2815_v23 = vmul.f32 0.01, %v2687_v4 }
 0x3b4   : > { %3844 = vrsqrt.f32 %v2403_v33  ;;  %v2404_v56 = vadd.f32 1e-05, %v2372_v0  ;;  %v2277_v12 = vmul.f32 0.00390625, %v2235_v55  ;;  %v2310_v3 = vmul.f32 %v6124_v48, %v6124_v48 }
 0x3b5   : > { %v2238_v60 = vpop.xlane.xlu1 %2237  ;;  %v6135_v30 = vpop.eup %3840  ;;  %v2550_v33 = vmul.f32 %v6099_v6, %v2486_v5  ;;  %v2620_v0 = vmul.f32 %v5772_v20, %v2548_v27  ;;  %v6705_v44 = vsub.f32 %v6698_v19, %v6124_v48 }
 0x3b6   : > { %v2341_v24 = vsub.f32 %v2277_v12, %v2309_v14  ;;  %v2278_v25 = vmul.f32 0.00390625, %v2238_v60  ;;  %3846 = vrsqrt.f32 %v2404_v56  ;;  %v2547_v14 = vmul.f32 %v3837_v29, %v2483_v15  ;;  %v6700_v15 = vld [vmem:[#allocation15_spill] sm:$0xff] }
 0x3b7   : > { %v2049_v63 = vpop.xlane.xlu0 %2048  ;;  %v2879_v12 = vsel %vm2751_vm8, %v2687_v4, %v2815_v23  ;;  %v2881_v60 = vsel %vm2753_vm9, %v2689_v41, %v2817_v18  ;;  %v2622_v38 = vmul.f32 %v5772_v20, %v2550_v33  ;;  %v2692_v52 = vadd.f32 %v5782_v50, %v2620_v0  ;;  %v6149_v59 = vpop.eup %3842  ;;  %v6702_v33 = vld [vmem:[#allocation42_spill] sm:$0xff] }
 0x3b8   : > { %v2373_v62 = vmax.f32 %v2341_v24, 0.0  ;;  %v2342_v55 = vsub.f32 %v2278_v25, %v2310_v3  ;;  %v6142_v58 = vmul.f32 0.00390625, %v2049_v63  ;;  %v2925_v27 = vpack.c.bf16 %v2881_v60, %v2879_v12 }
 0x3b9   : > { %v2052_v56 = vpop.xlane.xlu1 %2051  ;;  %v2549_v3 = vmul.f32 %v6099_v6, %v2485_v28  ;;  %v2694_v24 = vadd.f32 %v5782_v50, %v2622_v38  ;;  %vm2756_vm10 = vcmp.ge.f32.partialorder %v2692_v52, 0.0  ;;  %v2820_v6 = vmul.f32 0.01, %v2692_v52 }
 0x3ba   : > { %v2405_v5 = vadd.f32 1e-05, %v2373_v62  ;;  %v2374_v42 = vmax.f32 %v2342_v55, 0.0  ;;  %v6159_v4 = vmul.f32 0.00390625, %v2052_v56  ;;  %3172 = vmatmul.mubr.bf16.gmra.mrb[68].mxu0 %v2925_v27  ;;  %v2311_v23 = vmul.f32 %v6142_v58, %v6142_v58 }
 0x3bb   : > { %v2241_v41 = vpop.xlane.xlu0 %2240  ;;  %vm2758_vm11 = vcmp.ge.f32.partialorder %v2694_v24, 0.0  ;;  %v2619_v12 = vmul.f32 %v5769_v22, %v2547_v14  ;;  %v2621_v60 = vmul.f32 %v5769_v22, %v2549_v3  ;;  %v2884_v27 = vsel %vm2756_vm10, %v2692_v52, %v2820_v6 }
 0x3bc   : > { %3848 = vrsqrt.f32 %v2405_v5  ;;  %v2406_v25 = vadd.f32 1e-05, %v2374_v42  ;;  %v2279_v57 = vmul.f32 0.00390625, %v2241_v41  ;;  %v2822_v42 = vmul.f32 0.01, %v2694_v24 }
 0x3bd   : > { %v2244_v18 = vpop.xlane.xlu1 %2243  ;;  %v2312_v62 = vmul.f32 %v6159_v4, %v6159_v4  ;;  %v2552_v52 = vmul.f32 %v6135_v30, %v2488_v32  ;;  %v2551_v54 = vmul.f32 %v6135_v30, %v2487_v13 }
 0x3be   : > { %v6166_v63 = vpop.eup %3844  ;;  %3850 = vrsqrt.f32 %v2406_v25  ;;  %v2343_v0 = vsub.f32 %v2279_v57, %v2311_v23  ;;  %v2280_v55 = vmul.f32 0.00390625, %v2244_v18  ;;  %v2886_v41 = vsel %vm2758_vm11, %v2694_v24, %v2822_v42 }
 0x3bf   : > { %v2055_v56 = vpop.xlane.xlu0 %2054  ;;  %v2928_v45 = vpack.c.bf16 %v2886_v41, %v2884_v27  ;;  %v2691_v23 = vadd.f32 %v5777_v1, %v2619_v12  ;;  %v2693_v57 = vadd.f32 %v5777_v1, %v2621_v60  ;;  %v6704_v12 = vld [vmem:[#allocation21_spill] sm:$0xff]  ;;  %v2554_v27 = vmul.f32 %v6149_v59, %v2490_v9 }
 0x3c0   : > { %v2375_v5 = vmax.f32 %v2343_v0, 0.0  ;;  %v6174_v28 = vmul.f32 0.00390625, %v2055_v56  ;;  %v6176_v25 = vpop.eup %3846  ;;  %v2344_v38 = vsub.f32 %v2280_v55, %v2312_v62  ;;  %v6703_v62 = vld [vmem:[#allocation41_spill] sm:$0xff]  ;;  %v2624_v41 = vmul.f32 %v5772_v20, %v2552_v52 }
 0x3c1   : > { %v2058_v29 = vpop.xlane.xlu1 %2057  ;;  %3179 = vmatprep.mubr.bf16.mxu0 %v2928_v45  ;;  %vm2755_vm12 = vcmp.ge.f32.partialorder %v2691_v23, 0.0  ;;  %vm2757_vm13 = vcmp.ge.f32.partialorder %v2693_v57, 0.0  ;;  %v2819_v6 = vmul.f32 0.01, %v2691_v23  ;;  %v2821_v42 = vmul.f32 0.01, %v2693_v57 }
 0x3c2   : > { %v2407_v18 = vadd.f32 1e-05, %v2375_v5  ;;  %v6182_v3 = vmul.f32 0.00390625, %v2058_v29  ;;  %v2376_v24 = vmax.f32 %v2344_v38, 0.0  ;;  %v2504_v55 = vsub.f32 %v6703_v62, %v6174_v28 }
 0x3c3   : > { %v2247_v0 = vpop.xlane.xlu0 %2246  ;;  %v2883_v56 = vsel %vm2755_vm12, %v2691_v23, %v2819_v6  ;;  %v2313_v31 = vmul.f32 %v6174_v28, %v6174_v28  ;;  %v2885_v5 = vsel %vm2757_vm13, %v2693_v57, %v2821_v42  ;;  %v2696_v14 = vadd.f32 %v5782_v50, %v2624_v41  ;;  %v3292_v57 = vld [vmem:[#allocation2] sm:$0x1] }
 0x3c4   : > { %3852 = vrsqrt.f32 %v2407_v18  ;;  %v2408_v60 = vadd.f32 1e-05, %v2376_v24  ;;  %v2281_v32 = vmul.f32 0.00390625, %v2247_v0  ;;  %v2314_v18 = vmul.f32 %v6182_v3, %v6182_v3  ;;  %3295 = vperm.xlu1 %3658, %v3292_v57  }
 0x3c5   : > { %v2250_v45 = vpop.xlane.xlu1 %2249  ;;  %v2927_v23 = vpack.c.bf16 %v2885_v5, %v2883_v56  ;;  %v2626_v0 = vmul.f32 %v5772_v20, %v2554_v27  ;;  %v2553_v9 = vmul.f32 %v6149_v59, %v2489_v47  ;;  %v2558_v17 = vmul.f32 %v6176_v25, %v2494_v39 }
 0x3c6   : > { %v6194_v38 = vpop.eup %3848  ;;  %3854 = vrsqrt.f32 %v2408_v60  ;;  %v2345_v24 = vsub.f32 %v2281_v32, %v2313_v31  ;;  %v2282_v6 = vmul.f32 0.00390625, %v2250_v45  ;;  %v2556_v60 = vmul.f32 %v6166_v63, %v2492_v43 }
 0x3c7   : > { %3180 = vmatmul.mubr.bf16.gmra.mrb[72].mxu0 %v2927_v23  ;;  %v2698_v51 = vadd.f32 %v5782_v50, %v2626_v0  ;;  %vm2760_vm14 = vcmp.ge.f32.partialorder %v2696_v14, 0.0  ;;  %v2824_v13 = vmul.f32 0.01, %v2696_v14  ;;  %v2623_v37 = vmul.f32 %v5769_v22, %v2551_v54 }
 0x3c8   : > { %v3851_v29 = vpop.eup %3850  ;;  %v2377_v52 = vmax.f32 %v2345_v24, 0.0  ;;  %v2346_v42 = vsub.f32 %v2282_v6, %v2314_v18  ;;  %v2625_v30 = vmul.f32 %v5769_v22, %v2553_v9  ;;  %v2628_v61 = vmul.f32 %v5772_v20, %v2556_v60 }
 0x3c9   : > { %vm2762_vm15 = vcmp.ge.f32.partialorder %v2698_v51, 0.0  ;;  %v2826_v43 = vmul.f32 0.01, %v2698_v51  ;;  %v2888_v59 = vsel %vm2760_vm14, %v2696_v14, %v2824_v13  ;;  %v2695_v16 = vadd.f32 %v5777_v1, %v2623_v37 }
 0x3ca   : > { %v2409_v49 = vadd.f32 1e-05, %v2377_v52  ;;  %v2378_v47 = vmax.f32 %v2346_v42, 0.0  ;;  %v2697_v56 = vadd.f32 %v5777_v1, %v2625_v30  ;;  %v2630_v31 = vmul.f32 %v5772_v20, %v2558_v17 }
 0x3cb   : > { %v2890_v45 = vsel %vm2762_vm15, %v2698_v51, %v2826_v43  ;;  %vm2759_vm0 = vcmp.ge.f32.partialorder %v2695_v16, 0.0  ;;  %v2823_v5 = vmul.f32 0.01, %v2695_v16  ;;  %v2700_v27 = vadd.f32 %v5782_v50, %v2628_v61 }
 0x3cc   : > { %3856 = vrsqrt.f32 %v2409_v49  ;;  %v2410_v39 = vadd.f32 1e-05, %v2378_v47  ;;  %v2930_v41 = vpack.c.bf16 %v2890_v45, %v2888_v59  ;;  %vm2761_vm1 = vcmp.ge.f32.partialorder %v2697_v56, 0.0 }
 0x3cd   : > { %v2825_v18 = vmul.f32 0.01, %v2697_v56  ;;  %v2887_v14 = vsel %vm2759_vm0, %v2695_v16, %v2823_v5  ;;  %v2702_v23 = vadd.f32 %v5782_v50, %v2630_v31  ;;  %vm2764_vm2 = vcmp.ge.f32.partialorder %v2700_v27, 0.0 }
 0x3ce   : > { %v6228_v32 = vpop.eup %3852  ;;  %3858 = vrsqrt.f32 %v2410_v39  ;;  %v2828_v24 = vmul.f32 0.01, %v2700_v27  ;;  %3187 = vmatprep.mubr.bf16.mxu0 %v2930_v41  ;;  %v2555_v54 = vmul.f32 %v6166_v63, %v2491_v11  ;;  %v2557_v9 = vmul.f32 %v6176_v25, %v2493_v8 }
 0x3cf   : > { %v2889_v0 = vsel %vm2761_vm1, %v2697_v56, %v2825_v18  ;;  %v2560_v57 = vmul.f32 %v6194_v38, %v2496_v40  ;;  %vm2766_vm3 = vcmp.ge.f32.partialorder %v2702_v23, 0.0  ;;  %v2830_v42 = vmul.f32 0.01, %v2702_v23 }
 0x3d0   : > { %v3855_v6 = vpop.eup %3854  ;;  %v2929_v52 = vpack.c.bf16 %v2889_v0, %v2887_v14  ;;  %v2892_v60 = vsel %vm2764_vm2, %v2700_v27, %v2828_v24  ;;  %v2627_v17 = vmul.f32 %v5769_v22, %v2555_v54  ;;  %v2629_v10 = vmul.f32 %v5769_v22, %v2557_v9  ;;  %v6711_v54 = vld [vmem:[#allocation22_spill] sm:$0xff] }
 0x3d1   : > { %v2562_v11 = vmul.f32 %v3851_v29, %v6705_v44  ;;  %v2632_v46 = vmul.f32 %v5772_v20, %v2560_v57  ;;  %v2894_v36 = vsel %vm2766_vm3, %v2702_v23, %v2830_v42  ;;  %v6706_v8 = vsub.f32 %v6695_v21, %v6112_v26 }
 0x3d2   : > { %3188 = vmatmul.mubr.bf16.gmra.mrb[76].mxu0 %v2929_v52  ;;  %v6707_v40 = vsub.f32 %v6697_v2, %v6124_v48  ;;  %v6708_v25 = vsub.f32 %v6700_v15, %v6142_v58  ;;  %v2932_v19 = vpack.c.bf16 %v2894_v36, %v2892_v60  ;;  %v2699_v13 = vadd.f32 %v5777_v1, %v2627_v17 }
 0x3d3   : > { %v2559_v53 = vmul.f32 %v6194_v38, %v6706_v8  ;;  %v2701_v37 = vadd.f32 %v5777_v1, %v2629_v10  ;;  %v2634_v49 = vmul.f32 %v5772_v20, %v2562_v11  ;;  %v2704_v26 = vadd.f32 %v5782_v50, %v2632_v46 }
 0x3d4   : > { %v2561_v63 = vmul.f32 %v3851_v29, %v6707_v40  ;;  %v2564_v51 = vmul.f32 %v6228_v32, %v6708_v25  ;;  %v6709_v48 = vsub.f32 %v6702_v33, %v6159_v4  ;;  %3195 = vmatprep.mubr.bf16.mxu0 %v2932_v19  ;;  %vm2763_vm4 = vcmp.ge.f32.partialorder %v2699_v13, 0.0 }
 0x3d5   : > { %v2631_v21 = vmul.f32 %v5769_v22, %v2559_v53  ;;  %vm2765_vm5 = vcmp.ge.f32.partialorder %v2701_v37, 0.0  ;;  %v2827_v29 = vmul.f32 0.01, %v2699_v13  ;;  %v2829_v47 = vmul.f32 0.01, %v2701_v37 }
 0x3d6   : > { %v2633_v38 = vmul.f32 %v5769_v22, %v2561_v63  ;;  %v2566_v2 = vmul.f32 %v3855_v6, %v6709_v48  ;;  %v3857_v15 = vpop.eup %3856  ;;  %v2706_v30 = vadd.f32 %v5782_v50, %v2634_v49  ;;  %vm2768_vm6 = vcmp.ge.f32.partialorder %v2704_v26, 0.0 }
 0x3d7   : > { %v2832_v61 = vmul.f32 0.01, %v2704_v26  ;;  %v2703_v43 = vadd.f32 %v5777_v1, %v2631_v21  ;;  %v2891_v16 = vsel %vm2763_vm4, %v2699_v13, %v2827_v29  ;;  %v2893_v39 = vsel %vm2765_vm5, %v2701_v37, %v2829_v47 }
 0x3d8   : > { %v3859_v59 = vpop.eup %3858  ;;  %v2705_v56 = vadd.f32 %v5777_v1, %v2633_v38  ;;  %v2636_v33 = vmul.f32 %v5772_v20, %v2564_v51  ;;  %v2931_v31 = vpack.c.bf16 %v2893_v39, %v2891_v16  ;;  %vm2770_vm7 = vcmp.ge.f32.partialorder %v2706_v30, 0.0 }
 0x3d9   : > { %v2834_v45 = vmul.f32 0.01, %v2706_v30  ;;  %v2896_v5 = vsel %vm2768_vm6, %v2704_v26, %v2832_v61  ;;  %vm2767_vm8 = vcmp.ge.f32.partialorder %v2703_v43, 0.0  ;;  %v2831_v27 = vmul.f32 0.01, %v2703_v43 }
 0x3da   : > { %vm2769_vm9 = vcmp.ge.f32.partialorder %v2705_v56, 0.0  ;;  %v2833_v41 = vmul.f32 0.01, %v2705_v56  ;;  %3196 = vmatmul.mubr.bf16.gmra.mrb[80].mxu0 %v2931_v31  ;;  %v2638_v14 = vmul.f32 %v5772_v20, %v2566_v2  ;;  %v2708_v23 = vadd.f32 %v5782_v50, %v2636_v33 }
 0x3db   : > { %v2898_v18 = vsel %vm2770_vm7, %v2706_v30, %v2834_v45  ;;  %v6710_v24 = vsub.f32 %v6699_v34, %v6142_v58  ;;  %v2506_v9 = vsub.f32 %v6711_v54, %v6182_v3  ;;  %v6712_v42 = vsub.f32 %v6701_v7, %v6159_v4 }
 0x3dc   : > { %v2934_v57 = vpack.c.bf16 %v2898_v18, %v2896_v5  ;;  %v2897_v52 = vsel %vm2769_vm9, %v2705_v56, %v2833_v41  ;;  %v2895_v17 = vsel %vm2767_vm8, %v2703_v43, %v2831_v27  ;;  %v2710_v10 = vadd.f32 %v5782_v50, %v2638_v14 }
 0x3dd   : > { %v2563_v0 = vmul.f32 %v6228_v32, %v6710_v24  ;;  %v2565_v60 = vmul.f32 %v3855_v6, %v6712_v42  ;;  %vm2772_vm10 = vcmp.ge.f32.partialorder %v2708_v23, 0.0  ;;  %v2836_v44 = vmul.f32 0.01, %v2708_v23 }
 0x3de   : > { %3203 = vmatprep.mubr.bf16.mxu0 %v2934_v57  ;;  %v2568_v34 = vmul.f32 %v3857_v15, %v2504_v55  ;;  %v2570_v32 = vmul.f32 %v3859_v59, %v2506_v9  ;;  %v2933_v46 = vpack.c.bf16 %v2897_v52, %v2895_v17  ;;  %vm2774_vm11 = vcmp.ge.f32.partialorder %v2710_v10, 0.0 }
 0x3df   : > { %v2635_v11 = vmul.f32 %v5769_v22, %v2563_v0  ;;  %v2637_v58 = vmul.f32 %v5769_v22, %v2565_v60  ;;  %v2838_v36 = vmul.f32 0.01, %v2710_v10  ;;  %v6713_v4 = vsub.f32 %v5731_v35, %v6174_v28 }
 0x3e0   : > { %v2640_v53 = vmul.f32 %v5772_v20, %v2568_v34  ;;  %v2642_v40 = vmul.f32 %v5772_v20, %v2570_v32  ;;  %v2900_v63 = vsel %vm2772_vm10, %v2708_v23, %v2836_v44  ;;  %v6714_v62 = vsub.f32 %v6704_v12, %v6182_v3 }
 0x3e1   : > { %v2567_v7 = vmul.f32 %v3857_v15, %v6713_v4  ;;  %v2707_v6 = vadd.f32 %v5777_v1, %v2635_v11  ;;  %v2709_v8 = vadd.f32 %v5777_v1, %v2637_v58  ;;  %v2902_v25 = vsel %vm2774_vm11, %v2710_v10, %v2838_v36 }
 0x3e2   : > { %v2569_v55 = vmul.f32 %v3859_v59, %v6714_v62  ;;  %v2936_v19 = vpack.c.bf16 %v2902_v25, %v2900_v63  ;;  %3204 = vmatmul.mubr.bf16.gmra.mrb[84].mxu0 %v2933_v46  ;;  %v2712_v13 = vadd.f32 %v5782_v50, %v2640_v53  ;;  %v2714_v37 = vadd.f32 %v5782_v50, %v2642_v40 }
 0x3e3   : > { %v2639_v51 = vmul.f32 %v5769_v22, %v2567_v7  ;;  %vm2771_vm12 = vcmp.ge.f32.partialorder %v2707_v6, 0.0  ;;  %vm2773_vm13 = vcmp.ge.f32.partialorder %v2709_v8, 0.0  ;;  %v2835_v35 = vmul.f32 0.01, %v2707_v6 }
 0x3e4   : > { %v2837_v28 = vmul.f32 0.01, %v2709_v8  ;;  %v2641_v20 = vmul.f32 %v5769_v22, %v2569_v55  ;;  %3211 = vmatprep.mubr.bf16.mxu0 %v2936_v19  ;;  %vm2776_vm14 = vcmp.ge.f32.partialorder %v2712_v13, 0.0  ;;  %vm2778_vm15 = vcmp.ge.f32.partialorder %v2714_v37, 0.0 }
 0x3e5   : > { %v2840_v3 = vmul.f32 0.01, %v2712_v13  ;;  %v2899_v12 = vsel %vm2771_vm12, %v2707_v6, %v2835_v35  ;;  %v2842_v26 = vmul.f32 0.01, %v2714_v37  ;;  %v2711_v21 = vadd.f32 %v5777_v1, %v2639_v51 }
 0x3e6   : > { %v2901_v49 = vsel %vm2773_vm13, %v2709_v8, %v2837_v28  ;;  %v2713_v38 = vadd.f32 %v5777_v1, %v2641_v20 }
 0x3e7   : > { %v2935_v48 = vpack.c.bf16 %v2901_v49, %v2899_v12  ;;  %v2904_v2 = vsel %vm2776_vm14, %v2712_v13, %v2840_v3  ;;  %v2906_v15 = vsel %vm2778_vm15, %v2714_v37, %v2842_v26  ;;  %v2839_v50 = vmul.f32 0.01, %v2711_v21 }
 0x3e8   : > { %v2841_v29 = vmul.f32 0.01, %v2713_v38  ;;  %v2938_v47 = vpack.c.bf16 %v2906_v15, %v2904_v2  ;;  %vm2777_vm0 = vcmp.ge.f32.partialorder %v2713_v38, 0.0  ;;  %vm2775_vm1 = vcmp.ge.f32.partialorder %v2711_v21, 0.0 }
 0x3e9   : > { %v2903_v30 = vsel %vm2775_vm1, %v2711_v21, %v2839_v50 }
 0x3ea   : > { %3212 = vmatmul.mubr.bf16.gmra.mrb[88].mxu0 %v2935_v48  ;;  %v2905_v22 = vsel %vm2777_vm0, %v2713_v38, %v2841_v29 }
 0x3eb   : > { %3219 = vmatprep.mubr.bf16.mxu0 %v2938_v47  ;;  %v2937_v61 = vpack.c.bf16 %v2905_v22, %v2903_v30 }
 0x3f2   : > { %3220 = vmatmul.mubr.bf16.gmra.mrb[92].mxu0 %v2937_v61 }
 0x41b   : > { %v3515_v43 = vpop.f32.mrb[32].mxu0 }
 0x41c   : > { %v3516_v59 = vpop.f32.mrb[33].mxu0 }
 0x41d   : > { %v3517_v16 = vadd.f32 %v3516_v59, %v3515_v43  ;;  %v3518_v39 = vpop.f32.mrb[34].mxu0 }
 0x41e   : > { %v3519_v56 = vpop.f32.mrb[35].mxu0 }
 0x41f   : > { %v3520_v1 = vadd.f32 %v3519_v56, %v3518_v39  ;;  %3228 = vxpose.xlu0.b32.start [1/16] (narrow) %v3517_v16, 8  ;;  %v6715_v16 = vmov 0  }
 0x423   : > { %3229 = vxpose.xlu0.b32.cont [2/16] (narrow) %v3520_v1, 8 }
 0x427   : > { %v3521_v33 = vpop.f32.mrb[36].mxu0 }
 0x428   : > { %v3522_v31 = vpop.f32.mrb[37].mxu0 }
 0x429   : > { %v3523_v45 = vadd.f32 %v3522_v31, %v3521_v33  ;;  %v3524_v5 = vpop.f32.mrb[38].mxu0 }
 0x42a   : > { %v3525_v27 = vpop.f32.mrb[39].mxu0 }
 0x42b   : > { %v3526_v41 = vadd.f32 %v3525_v27, %v3524_v5  ;;  %3230 = vxpose.xlu0.b32.cont [3/16] (narrow) %v3523_v45, 8 }
 0x42f   : > { %3231 = vxpose.xlu0.b32.cont [4/16] (narrow) %v3526_v41, 8 }
 0x433   : > { %v3527_v18 = vpop.f32.mrb[40].mxu0 }
 0x434   : > { %v3528_v14 = vpop.f32.mrb[41].mxu0 }
 0x435   : > { %v3529_v23 = vadd.f32 %v3528_v14, %v3527_v18  ;;  %v3530_v24 = vpop.f32.mrb[42].mxu0 }
 0x436   : > { %v3531_v0 = vpop.f32.mrb[43].mxu0 }
 0x437   : > { %v3532_v54 = vadd.f32 %v3531_v0, %v3530_v24  ;;  %3232 = vxpose.xlu0.b32.cont [5/16] (narrow) %v3529_v23, 8 }
 0x43b   : > { %3233 = vxpose.xlu0.b32.cont [6/16] (narrow) %v3532_v54, 8 }
 0x43e   : > { %v3533_v9 = vpop.f32.mrb[44].mxu0 }
 0x43f   : > { %v3534_v57 = vpop.f32.mrb[45].mxu0 }
 0x440   : > { %v3535_v52 = vadd.f32 %v3534_v57, %v3533_v9  ;;  %v3536_v42 = vpop.f32.mrb[46].mxu0 }
 0x441   : > { %v3537_v60 = vpop.f32.mrb[47].mxu0 }
 0x442   : > { %v3538_v17 = vadd.f32 %v3537_v60, %v3536_v42  ;;  %3234 = vxpose.xlu0.b32.cont [7/16] (narrow) %v3535_v52, 8 }
 0x446   : > { %3235 = vxpose.xlu0.b32.cont [8/16] (narrow) %v3538_v17, 8 }
 0x44a   : > { %v3539_v10 = vpop.f32.mrb[48].mxu0 }
 0x44b   : > { %v3540_v44 = vpop.f32.mrb[49].mxu0 }
 0x44c   : > { %v3541_v11 = vadd.f32 %v3540_v44, %v3539_v10  ;;  %v3542_v58 = vpop.f32.mrb[50].mxu0 }
 0x44d   : > { %v3543_v34 = vpop.f32.mrb[51].mxu0 }
 0x44e   : > { %v3544_v32 = vadd.f32 %v3543_v34, %v3542_v58  ;;  %3236 = vxpose.xlu0.b32.cont [9/16] (narrow) %v3541_v11, 8 }
 0x452   : > { %3237 = vxpose.xlu0.b32.cont [10/16] (narrow) %v3544_v32, 8 }
 0x457   : > { %v3545_v46 = vpop.f32.mrb[52].mxu0 }
 0x458   : > { %v3546_v36 = vpop.f32.mrb[53].mxu0 }
 0x459   : > { %v3547_v4 = vadd.f32 %v3546_v36, %v3545_v46  ;;  %v3548_v7 = vpop.f32.mrb[54].mxu0 }
 0x45a   : > { %v3549_v6 = vpop.f32.mrb[55].mxu0 }
 0x45b   : > { %v3550_v8 = vadd.f32 %v3549_v6, %v3548_v7  ;;  %3238 = vxpose.xlu0.b32.cont [11/16] (narrow) %v3547_v4, 8  ;;  %v3296_v7 = vpop.permute.xlu1 %3295  ;;  %v6716_v6 = vld [vmem:[#allocation7_spill] sm:$0xff] }
 0x45f   : > { %3239 = vxpose.xlu0.b32.cont [12/16] (narrow) %v3550_v8, 8  ;;  %v3301_v8 = vrot.slane %v3296_v7, %v6716_v6 }
 0x462   : > { %v3551_v53 = vpop.f32.mrb[56].mxu0 }
 0x463   : > { %v3552_v40 = vpop.f32.mrb[57].mxu0 }
 0x464   : > { %v3553_v63 = vadd.f32 %v3552_v40, %v3551_v53  ;;  %v3554_v25 = vpop.f32.mrb[58].mxu0 }
 0x465   : > { %v3555_v62 = vpop.f32.mrb[59].mxu0 }
 0x466   : > { %v3556_v55 = vadd.f32 %v3555_v62, %v3554_v25  ;;  %3240 = vxpose.xlu0.b32.cont [13/16] (narrow) %v3553_v63, 8 }
 0x46a   : > { %3241 = vxpose.xlu0.b32.cont [14/16] (narrow) %v3556_v55, 8 }
 0x46d   : > { %v3557_v51 = vpop.f32.mrb[60].mxu0 }
 0x46e   : > { %v3558_v19 = vpop.f32.mrb[61].mxu0 }
 0x46f   : > { %v3559_v35 = vadd.f32 %v3558_v19, %v3557_v51  ;;  %v3560_v28 = vpop.f32.mrb[62].mxu0 }
 0x470   : > { %v3561_v13 = vpop.f32.mrb[63].mxu0 }
 0x471   : > { %v3562_v37 = vadd.f32 %v3561_v13, %v3560_v28  ;;  %3242 = vxpose.xlu0.b32.cont [15/16] (narrow) %v3559_v35, 8  ;;  %v3935_v13 = vmov 1966171168  }
 0x475   : > { %3243 = vxpose.xlu0.b32.end [16/16] (narrow) %v3562_v37, 8  ;;  %v3320_v37 = vunpack.c.l.s4 %v3935_v13 }
 0x47c   : > { %v3563_v20 = vpop.f32.mrb[64].mxu0 }
 0x47d   : > { %v3564_v49 = vpop.f32.mrb[65].mxu0 }
 0x47e   : > { %v3565_v3 = vadd.f32 %v3564_v49, %v3563_v20  ;;  %v3566_v12 = vpop.f32.mrb[66].mxu0  ;;  %v3321_v20 = vunpack.c.0.s8 %v3320_v37 }
 0x47f   : > { %v3567_v26 = vpop.f32.mrb[67].mxu0 }
 0x480   : > { %v3568_v21 = vadd.f32 %v3567_v26, %v3566_v12  ;;  %3260 = vxpose.xlu1.b32.start [1/16] (narrow) %v3565_v3, 8  ;;  %v6717_v3 = vld [vmem:[#allocation6_spill] sm:$0xff] }
 0x481   : > { %v3324_v12 = vsub.s32 %v3321_v20, %v6717_v3 }
 0x484   : > { %3261 = vxpose.xlu1.b32.cont [2/16] (narrow) %v3568_v21, 8 }
 0x48d   : > { %v3569_v38 = vpop.f32.mrb[68].mxu0 }
 0x48e   : > { %v3570_v48 = vpop.f32.mrb[69].mxu0 }
 0x48f   : > { %v3571_v2 = vadd.f32 %v3570_v48, %v3569_v38  ;;  %v3572_v15 = vpop.f32.mrb[70].mxu0  ;;  %v6718_v48 = vlaneseq }
 0x490   : > { %v3573_v29 = vpop.f32.mrb[71].mxu0 }
 0x491   : > { %v3574_v47 = vadd.f32 %v3573_v29, %v3572_v15  ;;  %3262 = vxpose.xlu1.b32.cont [3/16] (narrow) %v3571_v2, 8  ;;  %vm3336_vm2 = vcmp.lt.s32.totalorder %v6718_v48, 256 }
 0x495   : > { %3263 = vxpose.xlu1.b32.cont [4/16] (narrow) %v3574_v47, 8 }
 0x49a   : > { %v3575_v50 = vpop.f32.mrb[72].mxu0 }
 0x49b   : > { %v3576_v22 = vpop.f32.mrb[73].mxu0 }
 0x49c   : > { %v3577_v30 = vadd.f32 %v3576_v22, %v3575_v50  ;;  %v3578_v61 = vpop.f32.mrb[74].mxu0 }
 0x49d   : > { %v3579_v43 = vpop.f32.mrb[75].mxu0 }
 0x49e   : > { %v3580_v59 = vadd.f32 %v3579_v43, %v3578_v61  ;;  %3264 = vxpose.xlu1.b32.cont [5/16] (narrow) %v3577_v30, 8  ;;  %3659 = vset.pattern.permute.xlu0 %v6715_v16 }
 0x4a2   : > { %3265 = vxpose.xlu1.b32.cont [6/16] (narrow) %v3580_v59, 8 }
 0x4a5   : > { %v3581_v39 = vpop.f32.mrb[76].mxu0 }
 0x4a6   : > { %v3582_v56 = vpop.f32.mrb[77].mxu0 }
 0x4a7   : > { %v3583_v1 = vadd.f32 %v3582_v56, %v3581_v39  ;;  %v3584_v33 = vpop.f32.mrb[78].mxu0 }
 0x4a8   : > { %v3585_v31 = vpop.f32.mrb[79].mxu0 }
 0x4a9   : > { %v3586_v45 = vadd.f32 %v3585_v31, %v3584_v33  ;;  %3266 = vxpose.xlu1.b32.cont [7/16] (narrow) %v3583_v1, 8 }
 0x4ad   : > { %3267 = vxpose.xlu1.b32.cont [8/16] (narrow) %v3586_v45, 8  ;;  %v3587_v5 = vpop.f32.mrb[80].mxu0 }
 0x4ae   : > { %v3588_v27 = vpop.f32.mrb[81].mxu0 }
 0x4af   : > { %v3589_v41 = vadd.f32 %v3588_v27, %v3587_v5  ;;  %v3590_v18 = vpop.f32.mrb[82].mxu0 }
 0x4b0   : > { %v3591_v14 = vpop.f32.mrb[83].mxu0 }
 0x4b1   : > { %v3592_v23 = vadd.f32 %v3591_v14, %v3590_v18  ;;  %3268 = vxpose.xlu1.b32.cont [9/16] (narrow) %v3589_v41, 8 }
 0x4b5   : > { %3269 = vxpose.xlu1.b32.cont [10/16] (narrow) %v3592_v23, 8  ;;  %v3593_v24 = vpop.f32.mrb[84].mxu0 }
 0x4b6   : > { %v3594_v0 = vpop.f32.mrb[85].mxu0 }
 0x4b7   : > { %v3595_v54 = vadd.f32 %v3594_v0, %v3593_v24  ;;  %v3596_v9 = vpop.f32.mrb[86].mxu0 }
 0x4b8   : > { %v3597_v57 = vpop.f32.mrb[87].mxu0 }
 0x4b9   : > { %v3598_v52 = vadd.f32 %v3597_v57, %v3596_v9  ;;  %3270 = vxpose.xlu1.b32.cont [11/16] (narrow) %v3595_v54, 8  ;;  %v3244_v53 = vpop.trf.xlu0 }
 0x4ba   : > { %v3302_v40 = vadd.f32 %v3301_v8, %v3244_v53 }
 0x4bc   : > { %v3491_v63 = vmul.f32 -1.442695, %v3302_v40 }
 0x4bd   : > { %3271 = vxpose.xlu1.b32.cont [12/16] (narrow) %v3598_v52, 8  ;;  %v3599_v42 = vpop.f32.mrb[88].mxu0 }
 0x4be   : > { %v3600_v60 = vpop.f32.mrb[89].mxu0  ;;  %3860 = vpow2.f32 %v3491_v63 }
 0x4bf   : > { %v3601_v17 = vadd.f32 %v3600_v60, %v3599_v42  ;;  %v3602_v10 = vpop.f32.mrb[90].mxu0 }
 0x4c0   : > { %v3603_v44 = vpop.f32.mrb[91].mxu0 }
 0x4c1   : > { %v3604_v11 = vadd.f32 %v3603_v44, %v3602_v10  ;;  %3272 = vxpose.xlu1.b32.cont [13/16] (narrow) %v3601_v17, 8 }
 0x4c5   : > { %3273 = vxpose.xlu1.b32.cont [14/16] (narrow) %v3604_v11, 8  ;;  %v3605_v58 = vpop.f32.mrb[92].mxu0 }
 0x4c6   : > { %v3606_v34 = vpop.f32.mrb[93].mxu0 }
 0x4c7   : > { %v3607_v32 = vadd.f32 %v3606_v34, %v3605_v58  ;;  %v3608_v46 = vpop.f32.mrb[94].mxu0 }
 0x4c8   : > { %v3609_v36 = vpop.f32.mrb[95].mxu0  ;;  %v3861_v51 = vpop.eup %3860 }
 0x4c9   : > { %v3610_v4 = vadd.f32 %v3609_v36, %v3608_v46  ;;  %3274 = vxpose.xlu1.b32.cont [15/16] (narrow) %v3607_v32, 8  ;;  %v3310_v19 = vadd.f32 1.0, %v3861_v51 }
 0x4cd   : > { %3275 = vxpose.xlu1.b32.end [16/16] (narrow) %v3610_v4, 8 }
 0x511   : > { %v3276_v25 = vpop.trf.xlu1 }
 0x512   : > { %v3303_v62 = vadd.f32 %v3301_v8, %v3276_v25 }
 0x514   : > { %v3492_v55 = vmul.f32 -1.442695, %v3303_v62 }
 0x516   : > { %3862 = vpow2.f32 %v3492_v55 }
 0x517   : > { %3864 = vrcp.f32 %v3310_v19 }
 0x520   : > { %v3863_v35 = vpop.eup %3862 }
 0x521   : > { %v3311_v28 = vadd.f32 1.0, %v3863_v35  ;;  %v3865_v49 = vpop.eup %3864 }
 0x523   : > { %3866 = vrcp.f32 %v3311_v28 }
 0x52d   : > { %v3867_v26 = vpop.eup %3866 }
 0x52e   : > { %v3318_v21 = vcombine.low %v3865_v49, %v3867_v26 }
 0x530   : > { %v3325_v38 = vrot.slane %v3318_v21, %v3324_v12 }
 0x532   : > { %v3332_v2 = vrot.slane %v3325_v38, %v3324_v12 }
 0x534   : > { %3338 = vst.msk [vmem:[%s247_s20] sm:$0x3] %vm3336_vm2, %v3332_v2 }
 0x535   : > { %3883 = shalt.err (!%p3880_p3)
}
 0x536   : > { %s3884_s14 = scalar_lea.hbm %s6316_s27, 32  ;;  %s3888_s16 = scalar_lea.hbm %s6364_s6, 128 }
 0x537   : > { %p3885_p4 = scmp.ne.s32.totalorder %s6316_s27, %s3884_s14  ;;  %p3889_p9 = scmp.lt.u32.totalorder %s6316_s27, %s6364_s6 }
 0x538   : > { %p3890_p10 = scmp.lt.u32.totalorder %s3888_s16, %s3884_s14  ;;  %p3892_p12 = scmp.lt.u32.totalorder %s3884_s14, %s6316_s27 }
 0x539   : > { %p3886_p7 = pnand %p3885_p4, %p4010_p5 }
 0x53a   : > { %p3891_p11 = por %p3890_p10, %p3889_p9 }
 0x53b   : > { %p3887_p8 = pneg %p3886_p7 }
 0x53c   : > { %p3893_p13 = por %p3892_p12, %p3891_p11 }
 0x53e   : > { %p3894_p0 = pnand %p3893_p13, %p3887_p8 }
 0x540   : > { %3897 = shalt.err (!%p3894_p0)
}
 0x541   : > { %3617 = dma.vmem_to_hbm [thread:$0]  (%p4010_p5), %s6318_s21, 32, %s6316_s27, %s3340_s29  }
 0x542 PF: > { %p3623_p1 = scmp.ge.s32.totalorder %s3932_s26, 2  ;;  %s3366_s19 = sand.u32 1, %s3920_s23  }
 0x543   : > { %s3367_s20 = scalar_lea.sflag [#allocation4], %s3366_s19 }
 0x544   : > { %p3620_p2 = pnand %p3623_p1, %p4014_p6 }
 0x546   : > { %3915 = dma.done.wait (!%p3620_p2), %s3367_s20, 32  }
 0x547   : > { %3917 = vsyncadd (!%p3620_p2), %s3367_s20, 4294967264  ;;  %p18_p3 = scmp.ge.s32.totalorder %s3998_s28, 6   ;;  %s6719_s23 = smov %s3924_s24 }
 0x548   : > { %s6720_s24 = smov %s3928_s25  ;;  %s6721_s25 = smov %s4008_s7 }
 0x549   : > { %s6722_s26 = smov %s3998_s28  ;;  %20 = sbr.rel (!%p18_p3) target bundleno = 6 (0x6), region = 79 }
 0x550   :  { %3372 = vsyncpa [#allocation4], 1 }
 0x551   :  { %3374 = vsyncpa [#allocation4 + $0x1], 1 }

</bundles_post_ra>
